<compile_context>
chip_gen: v5e
topology: v5e:2x2
jax: 0.10.0
libtpu: 0.0.40
codegen_flags: <defaults>
</compile_context>

<pallas_src>
import numpy as np
import jax
import jax.numpy as jnp
from jax.experimental import pallas as pl
from jax.experimental.pallas import tpu as pltpu

# ---- model hyper-parameters (small shapes consistent with HGA.forward) ------
N, C, L, T, V = 2, 16, 6, 8, 50   # L must equal num_layers=6; V >= 50 (max node idx 49)
C4 = C // 4                       # inter_channels
K = 3                             # EdgeConv k
VP = 128                          # lane-padded V (lane-dense tiles, unmasked stores)
BN_EPS = 1e-5
NEG = -1e30

LAYERS = [
    [1, 0, 20, 26, 25, 45],
    [0, 20, 12, 16, 2, 4, 8, 25, 45, 37, 41, 27, 29, 33],
    [12, 16, 2, 4, 8, 13, 17, 3, 5, 9, 3, 28, 37, 41, 27, 29, 33, 38, 42, 28, 30, 34],
    [13, 17, 3, 5, 9, 14, 18, 6, 10, 3, 28, 38, 42, 28, 30, 34, 39, 43, 31, 35],
    [14, 18, 6, 10, 15, 19, 7, 11, 39, 43, 31, 35, 40, 44, 32, 36],
    [15, 19, 7, 11, 21, 22, 23, 24, 40, 44, 32, 36, 46, 47, 48, 49],
]

# ---- packed-parameter slab layout (single VMEM operand, (40, 768)) ----------
ROW_WD = 0          # rows 0:4    cols 0:C      -> conv_down weight (BN folded)
COL_BD = C          # rows 0:4    col  C        -> conv_down bias   (BN folded)
ROW_WE = 8          # rows 8:16   cols 0:C4     -> stacked edge weights [w1;w2] (BN folded)
ROW_WA = 16         # rows 16:32  cols 0:C4     -> aggregate Conv1d weight
COL_BA = C4         # rows 16:32  col  C4       -> aggregate Conv1d bias
ROW_AM = 32         # rows 32:38  cols 0:L*VP   -> block-diagonal node-averaging matrix
P_ROWS, P_COLS = 40, L * VP


# ----------------------------- Pallas kernel ---------------------------------
def _make_kernel(nb):
    def hga_kernel(x_ref, p_ref, out_ref):
        # x_ref : (nb, C, T, L*VP)  lane-dense, T on sublanes
        # p_ref : (P_ROWS, P_COLS)  packed, BN-folded parameters
        # Slice parameters directly off the ref (no whole-slab value extract).
        wd = p_ref[ROW_WD:ROW_WD + C4, 0:C]                   # (C4, C)
        bd = p_ref[ROW_WD:ROW_WD + C4, COL_BD:COL_BD + 1]     # (C4, 1)
        we = p_ref[ROW_WE:ROW_WE + 2 * C4, 0:C4]              # (2*C4, C4) = [w1; w2]
        wa = p_ref[ROW_WA:ROW_WA + C, 0:C4]                   # (C, C4)
        ba = p_ref[ROW_WA:ROW_WA + C, COL_BA:COL_BA + 1]      # (C, 1)
        amt = p_ref[ROW_AM:ROW_AM + L, 0:L * VP]              # (L, L*VP) block-diag averaging

        for b in range(nb):
            # ---- conv_down (1x1 conv + folded BN) + ReLU: one fused matmul ------
            xmax = jnp.max(x_ref[b], axis=1)                                   # (C, L*VP), max over T (sublane reduce)
            z = jnp.dot(wd, xmax, preferred_element_type=jnp.float32) + bd     # (C4, L*VP)
            z = jnp.maximum(z, 0.0)
            # per-layer node mean via block-diagonal averaging matrix (A . B^T)
            xs = jax.lax.dot_general(z, amt, (((1,), (1,)), ((), ())),
                                     preferred_element_type=jnp.float32)       # (C4, L)

            # ---- EdgeConv.knn(k=3): rank by -||x_v-x_u||^2; per-row constant
            #      -||x_v||^2 dropped (cannot change a per-row top-k). Fully
            #      vectorized rank counting over a (L, L, L) broadcast.
            gram = jax.lax.dot_general(xs, xs, (((0,), (0,)), ((), ())),
                                       preferred_element_type=jnp.float32)     # (L, L)
            sq = jnp.sum(xs * xs, axis=0, keepdims=True)                       # (1, L)
            d = 2.0 * gram - sq                                                # (L, L)
            w_i = jax.lax.broadcasted_iota(jnp.int32, (L, L, L), 1)
            u_i = jax.lax.broadcasted_iota(jnp.int32, (L, L, L), 2)
            dvw = d[:, :, None]                                                # d[v, w]
            dvu = d[:, None, :]                                                # d[v, u]
            beats = (dvw > dvu) | ((dvw == dvu) & (w_i < u_i))                 # (L, W, U)
            count = jnp.sum(jnp.where(beats, 1.0, 0.0), axis=1)                # (L, U): rank of u in row v
            negmask = jnp.where(count < float(K), 0.0, NEG)                    # 0 iff u in knn(v)

            # ---- EdgeConv: one stacked matmul, broadcast masked max, fused epilogue.
            #      max_k LeakyReLU(w1(x_u - x_v) + w2 x_v)
            #        == LeakyReLU(Q[:,v] - P[:,v] + max_{u in knn(v)} P[:,u])
            R = jnp.dot(we, xs, preferred_element_type=jnp.float32)            # (2*C4, L)
            P = R[0:C4, :]
            Q = R[C4:2 * C4, :]
            a0 = jnp.max(P[:, None, :] + negmask[None, :, :], axis=2)          # (C4, L)
            e = Q - P + a0
            att0 = jnp.where(e >= 0.0, e, 0.2 * e)                             # LeakyReLU(0.2)

            # ---- aggregate Conv1d + sigmoid gating, weighted sum over L ----------
            att = jnp.dot(wa, att0, preferred_element_type=jnp.float32) + ba   # (C, L)
            sig = 1.0 / (1.0 + jnp.exp(-att))                                  # exact sigmoid (exp on EUP)

            # per-l accumulation keeps vreg pressure at ~2 slices; lane-aligned slices
            acc = x_ref[b, :, :, 0:VP] * sig[:, 0:1, None]                     # (C, T, VP)
            for l in range(1, L):
                acc = acc + x_ref[b, :, :, l * VP:(l + 1) * VP] * sig[:, l:l + 1, None]
            out_ref[b] = acc

    return hga_kernel


def make_hga_call(nb):
    steps = N // nb
    return pl.pallas_call(
        _make_kernel(nb),
        out_shape=jax.ShapeDtypeStruct((N, C, T, VP), jnp.float32),
        grid_spec=pltpu.PrefetchScalarGridSpec(
            num_scalar_prefetch=0,
            grid=(steps,),
            in_specs=[
                pl.BlockSpec((nb, C, T, L * VP), lambda n: (n, 0, 0, 0)),   # x (padded+flattened)
                pl.BlockSpec((P_ROWS, P_COLS), lambda n: (0, 0)),           # packed params
            ],
            out_specs=pl.BlockSpec((nb, C, T, VP), lambda n: (n, 0, 0, 0)),
        ),
        compiler_params=pltpu.CompilerParams(dimension_semantics=("parallel",)),
    )


def _pick_batch_block():
    """Keep the 2-wide parallel grid only on dual-TensorCore chips (v4/v5p/v7x);
    collapse to a single grid step (batch inside the block) on v5e/v6e."""
    try:
        kind = jax.devices()[0].device_kind.lower()
    except Exception:
        return N
    dual_tc = ("v4" in kind) or ("v5p" in kind) or ("v7" in kind)
    return 1 if dual_tc else N


def pack_params(w_down, b_down, w_edge, w_agg, b_agg, a_flat, bn_scale):
    """Fold inference BN into the conv weights and pack everything into one slab."""
    w1 = w_edge[:, :C4]
    w2 = w_edge[:, C4:]
    we = jnp.concatenate([w1, w2], axis=0) * bn_scale        # (2*C4, C4)
    pk = jnp.zeros((P_ROWS, P_COLS), jnp.float32)
    pk = pk.at[ROW_WD:ROW_WD + C4, 0:C].set(w_down * bn_scale)
    pk = pk.at[ROW_WD:ROW_WD + C4, COL_BD].set(b_down * bn_scale)
    pk = pk.at[ROW_WE:ROW_WE + 2 * C4, 0:C4].set(we)
    pk = pk.at[ROW_WA:ROW_WA + C, 0:C4].set(w_agg)
    pk = pk.at[ROW_WA:ROW_WA + C, COL_BA].set(b_agg)
    pk = pk.at[ROW_AM:ROW_AM + L, 0:L * VP].set(a_flat)
    return pk


# --------------------------- pure-JAX reference ------------------------------
def hga_reference(x, p):
    inv = 1.0 / jnp.sqrt(1.0 + BN_EPS)                            # inference BN (mean0/var1)
    x_t = jnp.max(x, axis=3)                                      # (N, C, L, V)
    y = jnp.einsum('dc,nclv->ndlv', p['w_down'], x_t) + p['b_down'][None, :, None, None]
    y = jnp.maximum(y * inv, 0.0)
    xs = jnp.einsum('ndlv,lv->ndl', y, p['a_mat'])                # (N, C4, L)

    gram = jnp.einsum('ncv,ncu->nvu', xs, xs)
    sq = jnp.sum(xs * xs, axis=1)
    dist = 2.0 * gram - sq[:, :, None] - sq[:, None, :]
    idx = jax.lax.top_k(dist, K)[1]                               # (N, L, K)
    xsb = jnp.broadcast_to(xs[:, :, None, :], (N, C4, L, L))
    idxb = jnp.broadcast_to(idx[:, None, :, :], (N, C4, L, K))
    feat = jnp.take_along_axis(xsb, idxb, axis=-1)                # (N, C4, L, K)

    w1 = p['w_edge'][:, :C4]
    w2 = p['w_edge'][:, C4:]
    e = (jnp.einsum('dc,nclk->ndlk', w1, feat - xs[:, :, :, None]) +
         jnp.einsum('dc,ncl->ndl', w2, xs)[..., None])
    e = e * inv
    e = jnp.where(e >= 0.0, e, 0.2 * e)
    att0 = jnp.max(e, axis=-1)                                    # (N, C4, L)
    att = jnp.einsum('cd,ndl->ncl', p['w_agg'], att0) + p['b_agg'][None, :, None]
    sig = jax.nn.sigmoid(att)
    return jnp.sum(x * sig[:, :, :, None, None], axis=2)


# ------------------------------------ main ------------------------------------
if __name__ == "__main__":
    key = jax.random.PRNGKey(0)
    kx, k1, k2, k3, k4, k5 = jax.random.split(key, 6)

    x = jax.random.normal(kx, (N, C, L, T, V), dtype=jnp.float32)

    # deterministic parameter init (shapes match the PyTorch module)
    w_down = (jax.random.normal(k1, (C4, C), jnp.float32) * np.sqrt(2.0 / C4)).astype(jnp.float32)
    b_down = jax.random.normal(k2, (C4,), jnp.float32) * 0.1
    w_edge = (jax.random.normal(k3, (C4, 2 * C4), jnp.float32) * np.sqrt(2.0 / C4)).astype(jnp.float32)
    w_agg = jax.random.normal(k4, (C, C4), jnp.float32) * 0.5
    b_agg = jax.random.normal(k5, (C,), jnp.float32) * 0.1

    # layer-set averaging matrices (duplicate indices count with multiplicity, like PyTorch mean)
    a_np = np.zeros((L, V), np.float32)
    a_flat_np = np.zeros((L, L * VP), np.float32)
    for i, lst in enumerate(LAYERS):
        for v in lst:
            a_np[i, v] += 1.0
            a_flat_np[i, i * VP + v] += 1.0
        a_np[i] /= float(len(lst))
        a_flat_np[i] /= float(len(lst))
    a_mat = jnp.asarray(a_np)
    a_flat = jnp.asarray(a_flat_np)

    # inference-mode BatchNorm fold: gamma=1, beta=0, mean=0, var=1
    bn_scale = np.float32(1.0 / np.sqrt(1.0 + BN_EPS))
    packed = pack_params(w_down, b_down, w_edge, w_agg, b_agg, a_flat, bn_scale)

    nb = _pick_batch_block()
    hga_call = make_hga_call(nb)

    @jax.jit
    def hga_forward(xin, pk):
        # lane-pad V -> VP and flatten (L, VP) so the kernel sees lane-dense tiles
        xp = jnp.pad(xin, ((0, 0), (0, 0), (0, 0), (0, 0), (0, VP - V)))
        xk = jnp.transpose(xp, (0, 1, 3, 2, 4)).reshape(N, C, T, L * VP)
        out_p = hga_call(xk, pk)                                  # (N, C, T, VP)
        return out_p[..., :V]

    out = jax.block_until_ready(hga_forward(x, packed))

    params = dict(w_down=w_down, b_down=b_down, a_mat=a_mat,
                  w_edge=w_edge, w_agg=w_agg, b_agg=b_agg)
    ref = jax.block_until_ready(hga_reference(x, params))

    assert out.shape == (N, C, T, V)
    assert float(jnp.max(jnp.abs(out - ref))) < 5e-3, "Pallas kernel mismatch vs reference"
    print("KERNEL_OK")
</pallas_src>

<mosaic_0001>
module attributes {stable_mosaic.version = 11 : i64} {
  func.func @hga_kernel(%arg0: i32, %arg1: memref<2x16x8x768xf32, #tpu.memory_space<vmem>>, %arg2: memref<40x768xf32, #tpu.memory_space<vmem>>, %arg3: memref<2x16x8x128xf32, #tpu.memory_space<vmem>>) attributes {dimension_semantics = [#tpu.dimension_semantics<parallel>], iteration_bounds = array<i64: 1>, scalar_prefetch = 0 : i64, scratch_operands = 0 : i64, tpu.core_type = #tpu.core_type<tc>, window_params = [{transform_indices = @transform_0, window_bounds = array<i64: 2, 16, 8, 768>}, {pipeline_mode = #tpu.pipeline_mode<synchronous>, transform_indices = @transform_1, window_bounds = array<i64: 40, 768>}, {transform_indices = @transform_2, window_bounds = array<i64: 2, 16, 8, 128>}]} {
    %c0 = arith.constant 0 : index
    %c0_0 = arith.constant 0 : index
    %0 = vector.load %arg2[%c0, %c0_0] : memref<40x768xf32, #tpu.memory_space<vmem>>, vector<4x16xf32>
    %c0_1 = arith.constant 0 : index
    %c16 = arith.constant 16 : index
    %1 = vector.load %arg2[%c0_1, %c16] : memref<40x768xf32, #tpu.memory_space<vmem>>, vector<4x1xf32>
    %c8 = arith.constant 8 : index
    %c0_2 = arith.constant 0 : index
    %2 = vector.load %arg2[%c8, %c0_2] : memref<40x768xf32, #tpu.memory_space<vmem>>, vector<8x4xf32>
    %c16_3 = arith.constant 16 : index
    %c0_4 = arith.constant 0 : index
    %3 = vector.load %arg2[%c16_3, %c0_4] : memref<40x768xf32, #tpu.memory_space<vmem>>, vector<16x4xf32>
    %c16_5 = arith.constant 16 : index
    %c4 = arith.constant 4 : index
    %4 = vector.load %arg2[%c16_5, %c4] : memref<40x768xf32, #tpu.memory_space<vmem>>, vector<16x1xf32>
    %c32 = arith.constant 32 : index
    %c0_6 = arith.constant 0 : index
    %5 = vector.load %arg2[%c32, %c0_6] : memref<40x768xf32, #tpu.memory_space<vmem>>, vector<6x768xf32>
    %c0_7 = arith.constant 0 : index
    %c0_8 = arith.constant 0 : index
    %c0_9 = arith.constant 0 : index
    %c0_10 = arith.constant 0 : index
    %6 = vector.load %arg1[%c0_7, %c0_8, %c0_9, %c0_10] : memref<2x16x8x768xf32, #tpu.memory_space<vmem>>, vector<1x16x8x768xf32>
    %7 = vector.shape_cast %6 : vector<1x16x8x768xf32> to vector<16x8x768xf32>
    %cst = arith.constant dense<0xFF800000> : vector<16x768xf32>
    %8 = vector.multi_reduction <maximumf>, %7, %cst [1] : vector<16x8x768xf32> to vector<16x768xf32>
    %cst_11 = arith.constant dense<0.000000e+00> : vector<4x768xf32>
    %9 = tpu.matmul %0, %8, %cst_11 {dimension_numbers = #tpu.dot_dimension_numbers<[1], [0], [0], [1], [0, 0, 1, 1], [], []>} : vector<4x16xf32>, vector<16x768xf32>, vector<4x768xf32> -> vector<4x768xf32>
    %10 = vector.broadcast %1 : vector<4x1xf32> to vector<4x768xf32>
    %11 = arith.addf %9, %10 : vector<4x768xf32>
    %cst_12 = arith.constant 0.000000e+00 : f32
    %12 = vector.broadcast %cst_12 : f32 to vector<4x768xf32>
    %13 = arith.maximumf %11, %12 : vector<4x768xf32>
    %cst_13 = arith.constant dense<0.000000e+00> : vector<4x6xf32>
    %14 = tpu.matmul %13, %5, %cst_13 {dimension_numbers = #tpu.dot_dimension_numbers<[1], [1], [0], [0], [0, 0, 1, 0], [], []>} : vector<4x768xf32>, vector<6x768xf32>, vector<4x6xf32> -> vector<4x6xf32>
    %cst_14 = arith.constant dense<0.000000e+00> : vector<6x6xf32>
    %15 = tpu.matmul %14, %14, %cst_14 {dimension_numbers = #tpu.dot_dimension_numbers<[0], [0], [1], [1], [0, 1, 1, 1], [], []>} : vector<4x6xf32>, vector<4x6xf32>, vector<6x6xf32> -> vector<6x6xf32>
    %16 = arith.mulf %14, %14 : vector<4x6xf32>
    %cst_15 = arith.constant dense<0.000000e+00> : vector<6xf32>
    %17 = vector.multi_reduction <add>, %16, %cst_15 [0] : vector<4x6xf32> to vector<6xf32>
    %18 = vector.shape_cast %17 : vector<6xf32> to vector<1x6xf32>
    %cst_16 = arith.constant 2.000000e+00 : f32
    %19 = vector.broadcast %cst_16 : f32 to vector<6x6xf32>
    %20 = arith.mulf %19, %15 : vector<6x6xf32>
    %21 = vector.broadcast %18 : vector<1x6xf32> to vector<6x6xf32>
    %22 = arith.subf %20, %21 : vector<6x6xf32>
    %23 = tpu.iota {dimensions = array<i32: 1>} : vector<6x6x6xi32>
    %24 = tpu.iota {dimensions = array<i32: 2>} : vector<6x6x6xi32>
    %25 = vector.shape_cast %22 : vector<6x6xf32> to vector<6x6x1xf32>
    %26 = vector.shape_cast %22 : vector<6x6xf32> to vector<6x1x6xf32>
    %27 = vector.broadcast %25 : vector<6x6x1xf32> to vector<6x6x6xf32>
    %28 = vector.broadcast %26 : vector<6x1x6xf32> to vector<6x6x6xf32>
    %29 = arith.cmpf ogt, %27, %28 : vector<6x6x6xf32>
    %30 = vector.broadcast %25 : vector<6x6x1xf32> to vector<6x6x6xf32>
    %31 = vector.broadcast %26 : vector<6x1x6xf32> to vector<6x6x6xf32>
    %32 = arith.cmpf oeq, %30, %31 : vector<6x6x6xf32>
    %33 = arith.cmpi slt, %23, %24 : vector<6x6x6xi32>
    %34 = arith.andi %32, %33 : vector<6x6x6xi1>
    %35 = arith.ori %29, %34 : vector<6x6x6xi1>
    %cst_17 = arith.constant 1.000000e+00 : f32
    %cst_18 = arith.constant 0.000000e+00 : f32
    %36 = vector.broadcast %cst_17 : f32 to vector<6x6x6xf32>
    %37 = vector.broadcast %cst_18 : f32 to vector<6x6x6xf32>
    %38 = arith.select %35, %36, %37 : vector<6x6x6xi1>, vector<6x6x6xf32>
    %cst_19 = arith.constant dense<0.000000e+00> : vector<6x6xf32>
    %39 = vector.multi_reduction <add>, %38, %cst_19 [1] : vector<6x6x6xf32> to vector<6x6xf32>
    %cst_20 = arith.constant 3.000000e+00 : f32
    %40 = vector.broadcast %cst_20 : f32 to vector<6x6xf32>
    %41 = arith.cmpf olt, %39, %40 : vector<6x6xf32>
    %cst_21 = arith.constant 0.000000e+00 : f32
    %cst_22 = arith.constant -1.000000e+30 : f32
    %42 = vector.broadcast %cst_21 : f32 to vector<6x6xf32>
    %43 = vector.broadcast %cst_22 : f32 to vector<6x6xf32>
    %44 = arith.select %41, %42, %43 : vector<6x6xi1>, vector<6x6xf32>
    %cst_23 = arith.constant dense<0.000000e+00> : vector<8x6xf32>
    %45 = tpu.matmul %2, %14, %cst_23 {dimension_numbers = #tpu.dot_dimension_numbers<[1], [0], [0], [1], [0, 0, 1, 1], [], []>} : vector<8x4xf32>, vector<4x6xf32>, vector<8x6xf32> -> vector<8x6xf32>
    %46 = vector.extract_strided_slice %45 {offsets = [0, 0], sizes = [4, 6], strides = [1, 1]} : vector<8x6xf32> to vector<4x6xf32>
    %47 = vector.extract_strided_slice %45 {offsets = [4, 0], sizes = [4, 6], strides = [1, 1]} : vector<8x6xf32> to vector<4x6xf32>
    %48 = vector.shape_cast %46 : vector<4x6xf32> to vector<4x1x6xf32>
    %49 = vector.shape_cast %44 : vector<6x6xf32> to vector<1x6x6xf32>
    %50 = vector.broadcast %48 : vector<4x1x6xf32> to vector<4x6x6xf32>
    %51 = vector.broadcast %49 : vector<1x6x6xf32> to vector<4x6x6xf32>
    %52 = arith.addf %50, %51 : vector<4x6x6xf32>
    %cst_24 = arith.constant dense<0xFF800000> : vector<4x6xf32>
    %53 = vector.multi_reduction <maximumf>, %52, %cst_24 [2] : vector<4x6x6xf32> to vector<4x6xf32>
    %54 = arith.subf %47, %46 : vector<4x6xf32>
    %55 = arith.addf %54, %53 : vector<4x6xf32>
    %cst_25 = arith.constant 0.000000e+00 : f32
    %56 = vector.broadcast %cst_25 : f32 to vector<4x6xf32>
    %57 = arith.cmpf oge, %55, %56 : vector<4x6xf32>
    %cst_26 = arith.constant 2.000000e-01 : f32
    %58 = vector.broadcast %cst_26 : f32 to vector<4x6xf32>
    %59 = arith.mulf %58, %55 : vector<4x6xf32>
    %60 = arith.select %57, %55, %59 : vector<4x6xi1>, vector<4x6xf32>
    %cst_27 = arith.constant dense<0.000000e+00> : vector<16x6xf32>
    %61 = tpu.matmul %3, %60, %cst_27 {dimension_numbers = #tpu.dot_dimension_numbers<[1], [0], [0], [1], [0, 0, 1, 1], [], []>} : vector<16x4xf32>, vector<4x6xf32>, vector<16x6xf32> -> vector<16x6xf32>
    %62 = vector.broadcast %4 : vector<16x1xf32> to vector<16x6xf32>
    %63 = arith.addf %61, %62 : vector<16x6xf32>
    %cst_28 = arith.constant 0.000000e+00 : f32
    %64 = vector.broadcast %cst_28 : f32 to vector<16x6xf32>
    %65 = arith.subf %64, %63 : vector<16x6xf32>
    %66 = math.exp %65 : vector<16x6xf32>
    %cst_29 = arith.constant 1.000000e+00 : f32
    %67 = vector.broadcast %cst_29 : f32 to vector<16x6xf32>
    %68 = arith.addf %67, %66 : vector<16x6xf32>
    %cst_30 = arith.constant 1.000000e+00 : f32
    %69 = vector.broadcast %cst_30 : f32 to vector<16x6xf32>
    %70 = arith.divf %69, %68 : vector<16x6xf32>
    %c0_31 = arith.constant 0 : index
    %c0_32 = arith.constant 0 : index
    %c0_33 = arith.constant 0 : index
    %c0_34 = arith.constant 0 : index
    %71 = vector.load %arg1[%c0_31, %c0_32, %c0_33, %c0_34] : memref<2x16x8x768xf32, #tpu.memory_space<vmem>>, vector<1x16x8x128xf32>
    %72 = vector.shape_cast %71 : vector<1x16x8x128xf32> to vector<16x8x128xf32>
    %73 = vector.extract_strided_slice %70 {offsets = [0, 0], sizes = [16, 1], strides = [1, 1]} : vector<16x6xf32> to vector<16x1xf32>
    %74 = vector.shape_cast %73 : vector<16x1xf32> to vector<16x1x1xf32>
    %75 = vector.broadcast %74 : vector<16x1x1xf32> to vector<16x8x128xf32>
    %76 = arith.mulf %72, %75 : vector<16x8x128xf32>
    %c0_35 = arith.constant 0 : index
    %c0_36 = arith.constant 0 : index
    %c0_37 = arith.constant 0 : index
    %c128 = arith.constant 128 : index
    %77 = vector.load %arg1[%c0_35, %c0_36, %c0_37, %c128] : memref<2x16x8x768xf32, #tpu.memory_space<vmem>>, vector<1x16x8x128xf32>
    %78 = vector.shape_cast %77 : vector<1x16x8x128xf32> to vector<16x8x128xf32>
    %79 = vector.extract_strided_slice %70 {offsets = [0, 1], sizes = [16, 1], strides = [1, 1]} : vector<16x6xf32> to vector<16x1xf32>
    %80 = vector.shape_cast %79 : vector<16x1xf32> to vector<16x1x1xf32>
    %81 = vector.broadcast %80 : vector<16x1x1xf32> to vector<16x8x128xf32>
    %82 = arith.mulf %78, %81 : vector<16x8x128xf32>
    %83 = arith.addf %76, %82 : vector<16x8x128xf32>
    %c0_38 = arith.constant 0 : index
    %c0_39 = arith.constant 0 : index
    %c0_40 = arith.constant 0 : index
    %c256 = arith.constant 256 : index
    %84 = vector.load %arg1[%c0_38, %c0_39, %c0_40, %c256] : memref<2x16x8x768xf32, #tpu.memory_space<vmem>>, vector<1x16x8x128xf32>
    %85 = vector.shape_cast %84 : vector<1x16x8x128xf32> to vector<16x8x128xf32>
    %86 = vector.extract_strided_slice %70 {offsets = [0, 2], sizes = [16, 1], strides = [1, 1]} : vector<16x6xf32> to vector<16x1xf32>
    %87 = vector.shape_cast %86 : vector<16x1xf32> to vector<16x1x1xf32>
    %88 = vector.broadcast %87 : vector<16x1x1xf32> to vector<16x8x128xf32>
    %89 = arith.mulf %85, %88 : vector<16x8x128xf32>
    %90 = arith.addf %83, %89 : vector<16x8x128xf32>
    %c0_41 = arith.constant 0 : index
    %c0_42 = arith.constant 0 : index
    %c0_43 = arith.constant 0 : index
    %c384 = arith.constant 384 : index
    %91 = vector.load %arg1[%c0_41, %c0_42, %c0_43, %c384] : memref<2x16x8x768xf32, #tpu.memory_space<vmem>>, vector<1x16x8x128xf32>
    %92 = vector.shape_cast %91 : vector<1x16x8x128xf32> to vector<16x8x128xf32>
    %93 = vector.extract_strided_slice %70 {offsets = [0, 3], sizes = [16, 1], strides = [1, 1]} : vector<16x6xf32> to vector<16x1xf32>
    %94 = vector.shape_cast %93 : vector<16x1xf32> to vector<16x1x1xf32>
    %95 = vector.broadcast %94 : vector<16x1x1xf32> to vector<16x8x128xf32>
    %96 = arith.mulf %92, %95 : vector<16x8x128xf32>
    %97 = arith.addf %90, %96 : vector<16x8x128xf32>
    %c0_44 = arith.constant 0 : index
    %c0_45 = arith.constant 0 : index
    %c0_46 = arith.constant 0 : index
    %c512 = arith.constant 512 : index
    %98 = vector.load %arg1[%c0_44, %c0_45, %c0_46, %c512] : memref<2x16x8x768xf32, #tpu.memory_space<vmem>>, vector<1x16x8x128xf32>
    %99 = vector.shape_cast %98 : vector<1x16x8x128xf32> to vector<16x8x128xf32>
    %100 = vector.extract_strided_slice %70 {offsets = [0, 4], sizes = [16, 1], strides = [1, 1]} : vector<16x6xf32> to vector<16x1xf32>
    %101 = vector.shape_cast %100 : vector<16x1xf32> to vector<16x1x1xf32>
    %102 = vector.broadcast %101 : vector<16x1x1xf32> to vector<16x8x128xf32>
    %103 = arith.mulf %99, %102 : vector<16x8x128xf32>
    %104 = arith.addf %97, %103 : vector<16x8x128xf32>
    %c0_47 = arith.constant 0 : index
    %c0_48 = arith.constant 0 : index
    %c0_49 = arith.constant 0 : index
    %c640 = arith.constant 640 : index
    %105 = vector.load %arg1[%c0_47, %c0_48, %c0_49, %c640] : memref<2x16x8x768xf32, #tpu.memory_space<vmem>>, vector<1x16x8x128xf32>
    %106 = vector.shape_cast %105 : vector<1x16x8x128xf32> to vector<16x8x128xf32>
    %107 = vector.extract_strided_slice %70 {offsets = [0, 5], sizes = [16, 1], strides = [1, 1]} : vector<16x6xf32> to vector<16x1xf32>
    %108 = vector.shape_cast %107 : vector<16x1xf32> to vector<16x1x1xf32>
    %109 = vector.broadcast %108 : vector<16x1x1xf32> to vector<16x8x128xf32>
    %110 = arith.mulf %106, %109 : vector<16x8x128xf32>
    %111 = arith.addf %104, %110 : vector<16x8x128xf32>
    %c0_50 = arith.constant 0 : index
    %c0_51 = arith.constant 0 : index
    %c0_52 = arith.constant 0 : index
    %c0_53 = arith.constant 0 : index
    %112 = vector.load %arg3[%c0_50, %c0_51, %c0_52, %c0_53] : memref<2x16x8x128xf32, #tpu.memory_space<vmem>>, vector<1x16x8x128xf32>
    %113 = vector.shape_cast %112 : vector<1x16x8x128xf32> to vector<16x8x128xf32>
    %114 = vector.shape_cast %111 : vector<16x8x128xf32> to vector<1x16x8x128xf32>
    tpu.vector_store %arg3[%c0_50, %c0_51, %c0_52, %c0_53], %114 {strides = array<i32>} : memref<2x16x8x128xf32, #tpu.memory_space<vmem>>, vector<1x16x8x128xf32>,
    %c1 = arith.constant 1 : index
    %c0_54 = arith.constant 0 : index
    %c0_55 = arith.constant 0 : index
    %c0_56 = arith.constant 0 : index
    %115 = vector.load %arg1[%c1, %c0_54, %c0_55, %c0_56] : memref<2x16x8x768xf32, #tpu.memory_space<vmem>>, vector<1x16x8x768xf32>
    %116 = vector.shape_cast %115 : vector<1x16x8x768xf32> to vector<16x8x768xf32>
    %cst_57 = arith.constant dense<0xFF800000> : vector<16x768xf32>
    %117 = vector.multi_reduction <maximumf>, %116, %cst_57 [1] : vector<16x8x768xf32> to vector<16x768xf32>
    %cst_58 = arith.constant dense<0.000000e+00> : vector<4x768xf32>
    %118 = tpu.matmul %0, %117, %cst_58 {dimension_numbers = #tpu.dot_dimension_numbers<[1], [0], [0], [1], [0, 0, 1, 1], [], []>} : vector<4x16xf32>, vector<16x768xf32>, vector<4x768xf32> -> vector<4x768xf32>
    %119 = vector.broadcast %1 : vector<4x1xf32> to vector<4x768xf32>
    %120 = arith.addf %118, %119 : vector<4x768xf32>
    %cst_59 = arith.constant 0.000000e+00 : f32
    %121 = vector.broadcast %cst_59 : f32 to vector<4x768xf32>
    %122 = arith.maximumf %120, %121 : vector<4x768xf32>
    %cst_60 = arith.constant dense<0.000000e+00> : vector<4x6xf32>
    %123 = tpu.matmul %122, %5, %cst_60 {dimension_numbers = #tpu.dot_dimension_numbers<[1], [1], [0], [0], [0, 0, 1, 0], [], []>} : vector<4x768xf32>, vector<6x768xf32>, vector<4x6xf32> -> vector<4x6xf32>
    %cst_61 = arith.constant dense<0.000000e+00> : vector<6x6xf32>
    %124 = tpu.matmul %123, %123, %cst_61 {dimension_numbers = #tpu.dot_dimension_numbers<[0], [0], [1], [1], [0, 1, 1, 1], [], []>} : vector<4x6xf32>, vector<4x6xf32>, vector<6x6xf32> -> vector<6x6xf32>
    %125 = arith.mulf %123, %123 : vector<4x6xf32>
    %cst_62 = arith.constant dense<0.000000e+00> : vector<6xf32>
    %126 = vector.multi_reduction <add>, %125, %cst_62 [0] : vector<4x6xf32> to vector<6xf32>
    %127 = vector.shape_cast %126 : vector<6xf32> to vector<1x6xf32>
    %cst_63 = arith.constant 2.000000e+00 : f32
    %128 = vector.broadcast %cst_63 : f32 to vector<6x6xf32>
    %129 = arith.mulf %128, %124 : vector<6x6xf32>
    %130 = vector.broadcast %127 : vector<1x6xf32> to vector<6x6xf32>
    %131 = arith.subf %129, %130 : vector<6x6xf32>
    %132 = tpu.iota {dimensions = array<i32: 1>} : vector<6x6x6xi32>
    %133 = tpu.iota {dimensions = array<i32: 2>} : vector<6x6x6xi32>
    %134 = vector.shape_cast %131 : vector<6x6xf32> to vector<6x6x1xf32>
    %135 = vector.shape_cast %131 : vector<6x6xf32> to vector<6x1x6xf32>
    %136 = vector.broadcast %134 : vector<6x6x1xf32> to vector<6x6x6xf32>
    %137 = vector.broadcast %135 : vector<6x1x6xf32> to vector<6x6x6xf32>
    %138 = arith.cmpf ogt, %136, %137 : vector<6x6x6xf32>
    %139 = vector.broadcast %134 : vector<6x6x1xf32> to vector<6x6x6xf32>
    %140 = vector.broadcast %135 : vector<6x1x6xf32> to vector<6x6x6xf32>
    %141 = arith.cmpf oeq, %139, %140 : vector<6x6x6xf32>
    %142 = arith.cmpi slt, %132, %133 : vector<6x6x6xi32>
    %143 = arith.andi %141, %142 : vector<6x6x6xi1>
    %144 = arith.ori %138, %143 : vector<6x6x6xi1>
    %cst_64 = arith.constant 1.000000e+00 : f32
    %cst_65 = arith.constant 0.000000e+00 : f32
    %145 = vector.broadcast %cst_64 : f32 to vector<6x6x6xf32>
    %146 = vector.broadcast %cst_65 : f32 to vector<6x6x6xf32>
    %147 = arith.select %144, %145, %146 : vector<6x6x6xi1>, vector<6x6x6xf32>
    %cst_66 = arith.constant dense<0.000000e+00> : vector<6x6xf32>
    %148 = vector.multi_reduction <add>, %147, %cst_66 [1] : vector<6x6x6xf32> to vector<6x6xf32>
    %cst_67 = arith.constant 3.000000e+00 : f32
    %149 = vector.broadcast %cst_67 : f32 to vector<6x6xf32>
    %150 = arith.cmpf olt, %148, %149 : vector<6x6xf32>
    %cst_68 = arith.constant 0.000000e+00 : f32
    %cst_69 = arith.constant -1.000000e+30 : f32
    %151 = vector.broadcast %cst_68 : f32 to vector<6x6xf32>
    %152 = vector.broadcast %cst_69 : f32 to vector<6x6xf32>
    %153 = arith.select %150, %151, %152 : vector<6x6xi1>, vector<6x6xf32>
    %cst_70 = arith.constant dense<0.000000e+00> : vector<8x6xf32>
    %154 = tpu.matmul %2, %123, %cst_70 {dimension_numbers = #tpu.dot_dimension_numbers<[1], [0], [0], [1], [0, 0, 1, 1], [], []>} : vector<8x4xf32>, vector<4x6xf32>, vector<8x6xf32> -> vector<8x6xf32>
    %155 = vector.extract_strided_slice %154 {offsets = [0, 0], sizes = [4, 6], strides = [1, 1]} : vector<8x6xf32> to vector<4x6xf32>
    %156 = vector.extract_strided_slice %154 {offsets = [4, 0], sizes = [4, 6], strides = [1, 1]} : vector<8x6xf32> to vector<4x6xf32>
    %157 = vector.shape_cast %155 : vector<4x6xf32> to vector<4x1x6xf32>
    %158 = vector.shape_cast %153 : vector<6x6xf32> to vector<1x6x6xf32>
    %159 = vector.broadcast %157 : vector<4x1x6xf32> to vector<4x6x6xf32>
    %160 = vector.broadcast %158 : vector<1x6x6xf32> to vector<4x6x6xf32>
    %161 = arith.addf %159, %160 : vector<4x6x6xf32>
    %cst_71 = arith.constant dense<0xFF800000> : vector<4x6xf32>
    %162 = vector.multi_reduction <maximumf>, %161, %cst_71 [2] : vector<4x6x6xf32> to vector<4x6xf32>
    %163 = arith.subf %156, %155 : vector<4x6xf32>
    %164 = arith.addf %163, %162 : vector<4x6xf32>
    %cst_72 = arith.constant 0.000000e+00 : f32
    %165 = vector.broadcast %cst_72 : f32 to vector<4x6xf32>
    %166 = arith.cmpf oge, %164, %165 : vector<4x6xf32>
    %cst_73 = arith.constant 2.000000e-01 : f32
    %167 = vector.broadcast %cst_73 : f32 to vector<4x6xf32>
    %168 = arith.mulf %167, %164 : vector<4x6xf32>
    %169 = arith.select %166, %164, %168 : vector<4x6xi1>, vector<4x6xf32>
    %cst_74 = arith.constant dense<0.000000e+00> : vector<16x6xf32>
    %170 = tpu.matmul %3, %169, %cst_74 {dimension_numbers = #tpu.dot_dimension_numbers<[1], [0], [0], [1], [0, 0, 1, 1], [], []>} : vector<16x4xf32>, vector<4x6xf32>, vector<16x6xf32> -> vector<16x6xf32>
    %171 = vector.broadcast %4 : vector<16x1xf32> to vector<16x6xf32>
    %172 = arith.addf %170, %171 : vector<16x6xf32>
    %cst_75 = arith.constant 0.000000e+00 : f32
    %173 = vector.broadcast %cst_75 : f32 to vector<16x6xf32>
    %174 = arith.subf %173, %172 : vector<16x6xf32>
    %175 = math.exp %174 : vector<16x6xf32>
    %cst_76 = arith.constant 1.000000e+00 : f32
    %176 = vector.broadcast %cst_76 : f32 to vector<16x6xf32>
    %177 = arith.addf %176, %175 : vector<16x6xf32>
    %cst_77 = arith.constant 1.000000e+00 : f32
    %178 = vector.broadcast %cst_77 : f32 to vector<16x6xf32>
    %179 = arith.divf %178, %177 : vector<16x6xf32>
    %c1_78 = arith.constant 1 : index
    %c0_79 = arith.constant 0 : index
    %c0_80 = arith.constant 0 : index
    %c0_81 = arith.constant 0 : index
    %180 = vector.load %arg1[%c1_78, %c0_79, %c0_80, %c0_81] : memref<2x16x8x768xf32, #tpu.memory_space<vmem>>, vector<1x16x8x128xf32>
    %181 = vector.shape_cast %180 : vector<1x16x8x128xf32> to vector<16x8x128xf32>
    %182 = vector.extract_strided_slice %179 {offsets = [0, 0], sizes = [16, 1], strides = [1, 1]} : vector<16x6xf32> to vector<16x1xf32>
    %183 = vector.shape_cast %182 : vector<16x1xf32> to vector<16x1x1xf32>
    %184 = vector.broadcast %183 : vector<16x1x1xf32> to vector<16x8x128xf32>
    %185 = arith.mulf %181, %184 : vector<16x8x128xf32>
    %c1_82 = arith.constant 1 : index
    %c0_83 = arith.constant 0 : index
    %c0_84 = arith.constant 0 : index
    %c128_85 = arith.constant 128 : index
    %186 = vector.load %arg1[%c1_82, %c0_83, %c0_84, %c128_85] : memref<2x16x8x768xf32, #tpu.memory_space<vmem>>, vector<1x16x8x128xf32>
    %187 = vector.shape_cast %186 : vector<1x16x8x128xf32> to vector<16x8x128xf32>
    %188 = vector.extract_strided_slice %179 {offsets = [0, 1], sizes = [16, 1], strides = [1, 1]} : vector<16x6xf32> to vector<16x1xf32>
    %189 = vector.shape_cast %188 : vector<16x1xf32> to vector<16x1x1xf32>
    %190 = vector.broadcast %189 : vector<16x1x1xf32> to vector<16x8x128xf32>
    %191 = arith.mulf %187, %190 : vector<16x8x128xf32>
    %192 = arith.addf %185, %191 : vector<16x8x128xf32>
    %c1_86 = arith.constant 1 : index
    %c0_87 = arith.constant 0 : index
    %c0_88 = arith.constant 0 : index
    %c256_89 = arith.constant 256 : index
    %193 = vector.load %arg1[%c1_86, %c0_87, %c0_88, %c256_89] : memref<2x16x8x768xf32, #tpu.memory_space<vmem>>, vector<1x16x8x128xf32>
    %194 = vector.shape_cast %193 : vector<1x16x8x128xf32> to vector<16x8x128xf32>
    %195 = vector.extract_strided_slice %179 {offsets = [0, 2], sizes = [16, 1], strides = [1, 1]} : vector<16x6xf32> to vector<16x1xf32>
    %196 = vector.shape_cast %195 : vector<16x1xf32> to vector<16x1x1xf32>
    %197 = vector.broadcast %196 : vector<16x1x1xf32> to vector<16x8x128xf32>
    %198 = arith.mulf %194, %197 : vector<16x8x128xf32>
    %199 = arith.addf %192, %198 : vector<16x8x128xf32>
    %c1_90 = arith.constant 1 : index
    %c0_91 = arith.constant 0 : index
    %c0_92 = arith.constant 0 : index
    %c384_93 = arith.constant 384 : index
    %200 = vector.load %arg1[%c1_90, %c0_91, %c0_92, %c384_93] : memref<2x16x8x768xf32, #tpu.memory_space<vmem>>, vector<1x16x8x128xf32>
    %201 = vector.shape_cast %200 : vector<1x16x8x128xf32> to vector<16x8x128xf32>
    %202 = vector.extract_strided_slice %179 {offsets = [0, 3], sizes = [16, 1], strides = [1, 1]} : vector<16x6xf32> to vector<16x1xf32>
    %203 = vector.shape_cast %202 : vector<16x1xf32> to vector<16x1x1xf32>
    %204 = vector.broadcast %203 : vector<16x1x1xf32> to vector<16x8x128xf32>
    %205 = arith.mulf %201, %204 : vector<16x8x128xf32>
    %206 = arith.addf %199, %205 : vector<16x8x128xf32>
    %c1_94 = arith.constant 1 : index
    %c0_95 = arith.constant 0 : index
    %c0_96 = arith.constant 0 : index
    %c512_97 = arith.constant 512 : index
    %207 = vector.load %arg1[%c1_94, %c0_95, %c0_96, %c512_97] : memref<2x16x8x768xf32, #tpu.memory_space<vmem>>, vector<1x16x8x128xf32>
    %208 = vector.shape_cast %207 : vector<1x16x8x128xf32> to vector<16x8x128xf32>
    %209 = vector.extract_strided_slice %179 {offsets = [0, 4], sizes = [16, 1], strides = [1, 1]} : vector<16x6xf32> to vector<16x1xf32>
    %210 = vector.shape_cast %209 : vector<16x1xf32> to vector<16x1x1xf32>
    %211 = vector.broadcast %210 : vector<16x1x1xf32> to vector<16x8x128xf32>
    %212 = arith.mulf %208, %211 : vector<16x8x128xf32>
    %213 = arith.addf %206, %212 : vector<16x8x128xf32>
    %c1_98 = arith.constant 1 : index
    %c0_99 = arith.constant 0 : index
    %c0_100 = arith.constant 0 : index
    %c640_101 = arith.constant 640 : index
    %214 = vector.load %arg1[%c1_98, %c0_99, %c0_100, %c640_101] : memref<2x16x8x768xf32, #tpu.memory_space<vmem>>, vector<1x16x8x128xf32>
    %215 = vector.shape_cast %214 : vector<1x16x8x128xf32> to vector<16x8x128xf32>
    %216 = vector.extract_strided_slice %179 {offsets = [0, 5], sizes = [16, 1], strides = [1, 1]} : vector<16x6xf32> to vector<16x1xf32>
    %217 = vector.shape_cast %216 : vector<16x1xf32> to vector<16x1x1xf32>
    %218 = vector.broadcast %217 : vector<16x1x1xf32> to vector<16x8x128xf32>
    %219 = arith.mulf %215, %218 : vector<16x8x128xf32>
    %220 = arith.addf %213, %219 : vector<16x8x128xf32>
    %c1_102 = arith.constant 1 : index
    %c0_103 = arith.constant 0 : index
    %c0_104 = arith.constant 0 : index
    %c0_105 = arith.constant 0 : index
    %221 = vector.load %arg3[%c1_102, %c0_103, %c0_104, %c0_105] : memref<2x16x8x128xf32, #tpu.memory_space<vmem>>, vector<1x16x8x128xf32>
    %222 = vector.shape_cast %221 : vector<1x16x8x128xf32> to vector<16x8x128xf32>
    %223 = vector.shape_cast %220 : vector<16x8x128xf32> to vector<1x16x8x128xf32>
    tpu.vector_store %arg3[%c1_102, %c0_103, %c0_104, %c0_105], %223 {strides = array<i32>} : memref<2x16x8x128xf32, #tpu.memory_space<vmem>>, vector<1x16x8x128xf32>,
    return
  }
  func.func @transform_0(%arg0: i32) -> (i32, i32, i32, i32) {
    %c0_i32 = arith.constant 0 : i32
    %c0_i32_0 = arith.constant 0 : i32
    %c0_i32_1 = arith.constant 0 : i32
    %c0_i32_2 = arith.constant 0 : i32
    return %arg0, %c0_i32, %c0_i32_0, %c0_i32_1 : i32, i32, i32, i32
  }
  func.func @transform_1(%arg0: i32) -> (i32, i32) {
    %c0_i32 = arith.constant 0 : i32
    %c0_i32_0 = arith.constant 0 : i32
    %c0_i32_1 = arith.constant 0 : i32
    return %c0_i32, %c0_i32_0 : i32, i32
  }
  func.func @transform_2(%arg0: i32) -> (i32, i32, i32, i32) {
    %c0_i32 = arith.constant 0 : i32
    %c0_i32_0 = arith.constant 0 : i32
    %c0_i32_1 = arith.constant 0 : i32
    %c0_i32_2 = arith.constant 0 : i32
    return %arg0, %c0_i32, %c0_i32_0, %c0_i32_1 : i32, i32, i32, i32
  }
}

</mosaic_0001>

<bundles_post_ra>
// kernel: hga_forward.1
= control target key start
LH: loop header
LB: loop body
LE: loop exit
PB: predicated region body
PF: predicated region fallthrough
CT: control target
= control target key end

     0   :  { %vm795_vm0 = vcmask 1041409   ;;  %vm797_vm1 = vcmask 1042434   ;;  %vm7174_vm2 = vcmask 1043459   ;;  %vm7173_vm3 = vcmask 1044484   ;;  %s7164_s0 = inlined_call_operand.vmem [shape: f32[2,16,8,768], index: 0, kind: input, shape index: {}]   ;;  %s7165_s1 = inlined_call_operand.vmem [shape: f32[40,768], index: 1, kind: input, shape index: {}]   ;;  %s7166_s2 = inlined_call_operand.hbm [shape: f32[2,16,8,128], index: 2, kind: output, shape index: {}]  }
   0x1   :  { %v70_v0 = vld [vmem:[%s7164_s0 + $0x180] sm:$0xff]  ;;  %v76_v1 = vld [vmem:[%s7164_s0 + $0x1b0] sm:$0xff]  ;;  %v71_v50 = vld [vmem:[%s7164_s0 + $0x188] sm:$0xff] }
   0x2   :  { %v82_v2 = vld [vmem:[%s7164_s0 + $0x1e0] sm:$0xff]  ;;  %v88_v3 = vld [vmem:[%s7164_s0 + $0x210] sm:$0xff]  ;;  %v406_v6 = vrot.slane %v70_v0, 4  ;;  %v442_v7 = vrot.slane %v76_v1, 4  ;;  %v77_v51 = vld [vmem:[%s7164_s0 + $0x1b8] sm:$0xff] }
   0x3   :  { %v94_v4 = vld [vmem:[%s7164_s0 + $0x240] sm:$0xff]  ;;  %v100_v5 = vld [vmem:[%s7164_s0 + $0x270] sm:$0xff]  ;;  %v478_v8 = vrot.slane %v82_v2, 4  ;;  %v514_v11 = vrot.slane %v88_v3, 4 }
   0x4   :  { %v106_v9 = vld [vmem:[%s7164_s0 + $0x2a0] sm:$0xff]  ;;  %v112_v10 = vld [vmem:[%s7164_s0 + $0x2d0] sm:$0xff]  ;;  %v550_v12 = vrot.slane %v94_v4, 4  ;;  %v586_v13 = vrot.slane %v100_v5, 4  ;;  %v407_v14 = vmax.f32 %v70_v0, %v406_v6  ;;  %v443_v15 = vmax.f32 %v76_v1, %v442_v7 }
   0x5   :  { %v479_v16 = vmax.f32 %v82_v2, %v478_v8  ;;  %v622_v17 = vrot.slane %v106_v9, 4  ;;  %v515_v18 = vmax.f32 %v88_v3, %v514_v11  ;;  %v658_v21 = vrot.slane %v112_v10, 4 }
   0x6   :  { %v551_v19 = vmax.f32 %v94_v4, %v550_v12  ;;  %v587_v20 = vmax.f32 %v100_v5, %v586_v13  ;;  %v408_v22 = vrot.slane %v407_v14, 2  ;;  %v444_v23 = vrot.slane %v443_v15, 2 }
   0x7   :  { %v480_v24 = vrot.slane %v479_v16, 2  ;;  %v623_v25 = vmax.f32 %v106_v9, %v622_v17  ;;  %v516_v26 = vrot.slane %v515_v18, 2  ;;  %v659_v29 = vmax.f32 %v112_v10, %v658_v21 }
   0x8   :  { %v552_v27 = vrot.slane %v551_v19, 2  ;;  %v588_v28 = vrot.slane %v587_v20, 2  ;;  %v409_v30 = vmax.f32 %v407_v14, %v408_v22  ;;  %v445_v31 = vmax.f32 %v443_v15, %v444_v23 }
   0x9   :  { %v481_v32 = vmax.f32 %v479_v16, %v480_v24  ;;  %v624_v33 = vrot.slane %v623_v25, 2  ;;  %v517_v34 = vmax.f32 %v515_v18, %v516_v26  ;;  %v660_v37 = vrot.slane %v659_v29, 2 }
   0xa   :  { %v553_v35 = vmax.f32 %v551_v19, %v552_v27  ;;  %v589_v36 = vmax.f32 %v587_v20, %v588_v28  ;;  %v410_v38 = vrot.slane %v409_v30, 1  ;;  %v446_v39 = vrot.slane %v445_v31, 1 }
   0xb   :  { %v482_v40 = vrot.slane %v481_v32, 1  ;;  %v625_v41 = vmax.f32 %v623_v25, %v624_v33  ;;  %v518_v42 = vrot.slane %v517_v34, 1  ;;  %v661_v45 = vmax.f32 %v659_v29, %v660_v37 }
   0xc   :  { %v554_v43 = vrot.slane %v553_v35, 1  ;;  %v590_v44 = vrot.slane %v589_v36, 1  ;;  %v411_v46 = vmax.f32 %v409_v30, %v410_v38  ;;  %v447_v47 = vmax.f32 %v445_v31, %v446_v39 }
   0xd   :  { %v483_v48 = vmax.f32 %v481_v32, %v482_v40  ;;  %v626_v49 = vrot.slane %v625_v41, 1 }
   0xe   :  { %7 = vsyncpa [#allocation3], 0  ;;  %v519_v52 = vmax.f32 %v517_v34, %v518_v42  ;;  %v555_v53 = vmax.f32 %v553_v35, %v554_v43  ;;  %v591_v54 = vmax.f32 %v589_v36, %v590_v44  ;;  %v662_v55 = vrot.slane %v661_v45, 1  ;;  %v83_v56 = vld [vmem:[%s7164_s0 + $0x1e8] sm:$0xff]  ;;  %v89_v57 = vld [vmem:[%s7164_s0 + $0x218] sm:$0xff]  ;;  %s4795_s20 = smov [#allocation2]  }
   0xf   :  { %v95_v58 = vld [vmem:[%s7164_s0 + $0x248] sm:$0xff]  ;;  %v627_v59 = vmax.f32 %v625_v41, %v626_v49  ;;  %vm7172_vm4 = vcmask 1045509   ;;  %vm7171_vm5 = vcmask 1046534   ;;  %vm7170_vm6 = vcmask 1047559   ;;  %v101_v60 = vld [vmem:[%s7164_s0 + $0x278] sm:$0xff]  ;;  %v72_v39 = vld [vmem:[%s7164_s0 + $0x190] sm:$0xff] }
  0x10   :  { %v663_v61 = vmax.f32 %v661_v45, %v662_v55  ;;  %v844_v62 = vsel %vm795_vm0, %v447_v47, %v411_v46  ;;  %v412_v63 = vrot.slane %v71_v50, 4  ;;  %v448_v0 = vrot.slane %v77_v51, 4  ;;  %v107_v14 = vld [vmem:[%s7164_s0 + $0x2a8] sm:$0xff]  ;;  %v113_v19 = vld [vmem:[%s7164_s0 + $0x2d8] sm:$0xff]  ;;  %v78_v44 = vld [vmem:[%s7164_s0 + $0x1c0] sm:$0xff]  ;;  %s4377_s21 = sshll.u32 %s4795_s20, 4  ;;  %s4378_s21 = int_to_ptr.vmem [resolvable:$true] %s4377_s21 }
  0x11   :  { %v845_v1 = vsel %vm797_vm1, %v483_v48, %v844_v62  ;;  %v484_v2 = vrot.slane %v83_v56, 4  ;;  %v520_v3 = vrot.slane %v89_v57, 4  ;;  %v556_v4 = vrot.slane %v95_v58, 4  ;;  %v84_v45 = vld [vmem:[%s7164_s0 + $0x1f0] sm:$0xff]  ;;  %s4379_s24 = sshll.u32 %s7166_s2, 4  ;;  %s4796_s27 = smov 128   ;;  %s4380_s24 = int_to_ptr.hbm [resolvable:$true] %s4379_s24 }
  0x12   :  { %v846_v5 = vsel %vm7174_vm2, %v519_v52, %v845_v1  ;;  %v413_v6 = vmax.f32 %v71_v50, %v412_v63  ;;  %v449_v7 = vmax.f32 %v77_v51, %v448_v0  ;;  %v592_v8 = vrot.slane %v101_v60, 4  ;;  %v90_v50 = vld [vmem:[%s7164_s0 + $0x220] sm:$0xff]  ;;  %s4797_s28 = smov 8  }
  0x13   :  { %v847_v9 = vsel %vm7173_vm3, %v555_v53, %v846_v5  ;;  %v485_v10 = vmax.f32 %v83_v56, %v484_v2  ;;  %v521_v11 = vmax.f32 %v89_v57, %v520_v3  ;;  %v557_v12 = vmax.f32 %v95_v58, %v556_v4  ;;  %v102_v2 = vld [vmem:[%s7164_s0 + $0x280] sm:$0xff] }
  0x14   :  { %v848_v13 = vsel %vm7172_vm4, %v591_v54, %v847_v9  ;;  %v414_v15 = vrot.slane %v413_v6, 2  ;;  %v450_v16 = vrot.slane %v449_v7, 2  ;;  %v593_v17 = vmax.f32 %v101_v60, %v592_v8 }
  0x15   :  { %v849_v18 = vsel %vm7171_vm5, %v627_v59, %v848_v13  ;;  %v486_v20 = vrot.slane %v485_v10, 2  ;;  %v522_v21 = vrot.slane %v521_v11, 2  ;;  %v558_v22 = vrot.slane %v557_v12, 2 }
  0x16   :  { %v850_v23 = vsel %vm7170_vm6, %v663_v61, %v849_v18  ;;  %v415_v24 = vmax.f32 %v413_v6, %v414_v15  ;;  %v451_v25 = vmax.f32 %v449_v7, %v450_v16  ;;  %v594_v26 = vrot.slane %v593_v17, 2  ;;  %v96_v61 = vld [vmem:[%s7164_s0 + $0x250] sm:$0xff] }
  0x17   :  { %915 = vmatpush.msra.mxu0 %v850_v23  ;;  %v487_v27 = vmax.f32 %v485_v10, %v486_v20  ;;  %v523_v28 = vmax.f32 %v521_v11, %v522_v21  ;;  %v559_v29 = vmax.f32 %v557_v12, %v558_v22  ;;  %v628_v30 = vrot.slane %v107_v14, 4 }
  0x18   :  { %v416_v31 = vrot.slane %v415_v24, 1  ;;  %v452_v32 = vrot.slane %v451_v25, 1  ;;  %v595_v33 = vmax.f32 %v593_v17, %v594_v26  ;;  %v664_v34 = vrot.slane %v113_v19, 4 }
  0x19   :  { %v488_v35 = vrot.slane %v487_v27, 1  ;;  %v524_v36 = vrot.slane %v523_v28, 1  ;;  %v560_v37 = vrot.slane %v559_v29, 1  ;;  %v629_v38 = vmax.f32 %v107_v14, %v628_v30  ;;  %v108_v14 = vld [vmem:[%s7164_s0 + $0x2b0] sm:$0xff] }
  0x1a   :  { %v417_v40 = vmax.f32 %v415_v24, %v416_v31  ;;  %v453_v41 = vmax.f32 %v451_v25, %v452_v32  ;;  %v596_v42 = vrot.slane %v595_v33, 1  ;;  %v665_v43 = vmax.f32 %v113_v19, %v664_v34  ;;  %v114_v19 = vld [vmem:[%s7164_s0 + $0x2e0] sm:$0xff] }
  0x1b   :  { %v489_v46 = vmax.f32 %v487_v27, %v488_v35  ;;  %v525_v47 = vmax.f32 %v523_v28, %v524_v36  ;;  %v561_v48 = vmax.f32 %v559_v29, %v560_v37  ;;  %v630_v49 = vrot.slane %v629_v38, 2  ;;  %v22_v31 = vld [vmem:[%s7164_s0] sm:$0xff]  ;;  %v28_v36 = vld [vmem:[%s7164_s0 + $0x30] sm:$0xff] }
  0x1c   :  { %v597_v51 = vmax.f32 %v595_v33, %v596_v42  ;;  %v666_v52 = vrot.slane %v665_v43, 2  ;;  %v851_v53 = vsel %vm795_vm0, %v453_v41, %v417_v40  ;;  %v418_v54 = vrot.slane %v72_v39, 4 }
  0x1d   :  { %v631_v55 = vmax.f32 %v629_v38, %v630_v49  ;;  %v852_v56 = vsel %vm797_vm1, %v489_v46, %v851_v53  ;;  %v454_v57 = vrot.slane %v78_v44, 4  ;;  %v490_v58 = vrot.slane %v84_v45, 4  ;;  %v40_v53 = vld [vmem:[%s7164_s0 + $0x90] sm:$0xff] }
  0x1e   :  { %v667_v59 = vmax.f32 %v665_v43, %v666_v52  ;;  %v853_v60 = vsel %vm7174_vm2, %v525_v47, %v852_v56  ;;  %v419_v62 = vmax.f32 %v72_v39, %v418_v54  ;;  %v526_v63 = vrot.slane %v90_v50, 4 }
  0x1f   :  { %v632_v0 = vrot.slane %v631_v55, 1  ;;  %v854_v1 = vsel %vm7173_vm3, %v561_v48, %v853_v60  ;;  %v455_v3 = vmax.f32 %v78_v44, %v454_v57  ;;  %v491_v4 = vmax.f32 %v84_v45, %v490_v58  ;;  %v34_v48 = vld [vmem:[%s7164_s0 + $0x60] sm:$0xff] }
  0x20   :  { %v668_v5 = vrot.slane %v667_v59, 1  ;;  %v855_v6 = vsel %vm7172_vm4, %v597_v51, %v854_v1  ;;  %v420_v7 = vrot.slane %v419_v62, 2  ;;  %v527_v8 = vmax.f32 %v90_v50, %v526_v63 }
  0x21   :  { %v633_v9 = vmax.f32 %v631_v55, %v632_v0  ;;  %v456_v10 = vrot.slane %v455_v3, 2  ;;  %v492_v11 = vrot.slane %v491_v4, 2  ;;  %v562_v12 = vrot.slane %v96_v61, 4 }
  0x22   :  { %v669_v13 = vmax.f32 %v667_v59, %v668_v5  ;;  %v421_v15 = vmax.f32 %v419_v62, %v420_v7  ;;  %v528_v16 = vrot.slane %v527_v8, 2  ;;  %v598_v17 = vrot.slane %v102_v2, 4 }
  0x23   :  { %v856_v18 = vsel %vm7171_vm5, %v633_v9, %v855_v6  ;;  %v457_v20 = vmax.f32 %v455_v3, %v456_v10  ;;  %v493_v21 = vmax.f32 %v491_v4, %v492_v11  ;;  %v563_v22 = vmax.f32 %v96_v61, %v562_v12  ;;  %v46_v61 = vld [vmem:[%s7164_s0 + $0xc0] sm:$0xff] }
  0x24   :  { %v857_v23 = vsel %vm7170_vm6, %v669_v13, %v856_v18  ;;  %v422_v24 = vrot.slane %v421_v15, 1  ;;  %v529_v25 = vmax.f32 %v527_v8, %v528_v16  ;;  %v599_v26 = vmax.f32 %v102_v2, %v598_v17  ;;  %v52_v2 = vld [vmem:[%s7164_s0 + $0xf0] sm:$0xff] }
  0x25   :  { %935 = vmatpush.msra.mxu1 %v857_v23  ;;  %v458_v27 = vrot.slane %v457_v20, 1  ;;  %v494_v28 = vrot.slane %v493_v21, 1  ;;  %v564_v29 = vrot.slane %v563_v22, 2  ;;  %v634_v30 = vrot.slane %v108_v14, 4  ;;  %v23_v23 = vld [vmem:[%s7164_s0 + $0x8] sm:$0xff] }
  0x26   :  { %v423_v32 = vmax.f32 %v421_v15, %v422_v24  ;;  %v530_v33 = vrot.slane %v529_v25, 1  ;;  %v600_v34 = vrot.slane %v599_v26, 2  ;;  %v670_v35 = vrot.slane %v114_v19, 4 }
  0x27   :  { %v459_v37 = vmax.f32 %v457_v20, %v458_v27  ;;  %v495_v38 = vmax.f32 %v493_v21, %v494_v28  ;;  %v565_v39 = vmax.f32 %v563_v22, %v564_v29  ;;  %v635_v40 = vmax.f32 %v108_v14, %v634_v30  ;;  %v58_v14 = vld [vmem:[%s7164_s0 + $0x120] sm:$0xff] }
  0x28   :  { %v531_v41 = vmax.f32 %v529_v25, %v530_v33  ;;  %v601_v42 = vmax.f32 %v599_v26, %v600_v34  ;;  %v671_v43 = vmax.f32 %v114_v19, %v670_v35  ;;  %v118_v44 = vrot.slane %v22_v31, 4  ;;  %v64_v19 = vld [vmem:[%s7164_s0 + $0x150] sm:$0xff]  ;;  %v29_v35 = vld [vmem:[%s7164_s0 + $0x38] sm:$0xff] }
  0x29   :  { %v566_v45 = vrot.slane %v565_v39, 1  ;;  %v636_v46 = vrot.slane %v635_v40, 2  ;;  %v858_v47 = vsel %vm795_vm0, %v459_v37, %v423_v32  ;;  %v154_v49 = vrot.slane %v28_v36, 4 }
  0x2a   :  { %v602_v50 = vrot.slane %v601_v42, 1  ;;  %v672_v51 = vrot.slane %v671_v43, 2  ;;  %v859_v52 = vsel %vm797_vm1, %v495_v38, %v858_v47  ;;  %v119_v54 = vmax.f32 %v22_v31, %v118_v44 }
  0x2b   :  { %v567_v55 = vmax.f32 %v565_v39, %v566_v45  ;;  %v637_v56 = vmax.f32 %v635_v40, %v636_v46  ;;  %v860_v57 = vsel %vm7174_vm2, %v531_v41, %v859_v52  ;;  %v155_v58 = vmax.f32 %v28_v36, %v154_v49 }
  0x2c   :  { %v603_v59 = vmax.f32 %v601_v42, %v602_v50  ;;  %v673_v60 = vmax.f32 %v671_v43, %v672_v51  ;;  %v120_v62 = vrot.slane %v119_v54, 2  ;;  %v190_v63 = vrot.slane %v34_v48, 4 }
  0x2d   :  { %v638_v0 = vrot.slane %v637_v56, 1  ;;  %v861_v1 = vsel %vm7173_vm3, %v567_v55, %v860_v57  ;;  %v156_v3 = vrot.slane %v155_v58, 2  ;;  %v226_v4 = vrot.slane %v40_v53, 4 }
  0x2e   :  { %v674_v5 = vrot.slane %v673_v60, 1  ;;  %v862_v6 = vsel %vm7172_vm4, %v603_v59, %v861_v1  ;;  %v121_v7 = vmax.f32 %v119_v54, %v120_v62  ;;  %v191_v8 = vmax.f32 %v34_v48, %v190_v63  ;;  %v35_v48 = vld [vmem:[%s7164_s0 + $0x68] sm:$0xff] }
  0x2f   :  { %v639_v9 = vmax.f32 %v637_v56, %v638_v0  ;;  %v157_v10 = vmax.f32 %v155_v58, %v156_v3  ;;  %v227_v11 = vmax.f32 %v40_v53, %v226_v4  ;;  %v262_v12 = vrot.slane %v46_v61, 4  ;;  %v41_v53 = vld [vmem:[%s7164_s0 + $0x98] sm:$0xff] }
  0x30   :  { %v675_v13 = vmax.f32 %v673_v60, %v674_v5  ;;  %v122_v15 = vrot.slane %v121_v7, 1  ;;  %v192_v16 = vrot.slane %v191_v8, 2  ;;  %v298_v17 = vrot.slane %v52_v2, 4 }
  0x31   :  { %v863_v18 = vsel %vm7171_vm5, %v639_v9, %v862_v6  ;;  %v158_v20 = vrot.slane %v157_v10, 1  ;;  %v228_v21 = vrot.slane %v227_v11, 2  ;;  %v263_v22 = vmax.f32 %v46_v61, %v262_v12  ;;  %v47_v61 = vld [vmem:[%s7164_s0 + $0xc8] sm:$0xff] }
  0x32   :  { %v864_v24 = vsel %vm7170_vm6, %v675_v13, %v863_v18  ;;  %v123_v25 = vmax.f32 %v121_v7, %v122_v15  ;;  %v193_v26 = vmax.f32 %v191_v8, %v192_v16  ;;  %v299_v27 = vmax.f32 %v52_v2, %v298_v17  ;;  %v53_v2 = vld [vmem:[%s7164_s0 + $0xf8] sm:$0xff] }
  0x33   :  { %955 = vmatpush.msra.mxu3 %v864_v24  ;;  %v159_v28 = vmax.f32 %v157_v10, %v158_v20  ;;  %v229_v29 = vmax.f32 %v227_v11, %v228_v21  ;;  %v264_v30 = vrot.slane %v263_v22, 2  ;;  %v334_v31 = vrot.slane %v58_v14, 4  ;;  %v59_v10 = vld [vmem:[%s7164_s0 + $0x128] sm:$0xff]  ;;  %v65_v15 = vld [vmem:[%s7164_s0 + $0x158] sm:$0xff] }
  0x34   :  { %v194_v32 = vrot.slane %v193_v26, 1  ;;  %v300_v33 = vrot.slane %v299_v27, 2  ;;  %v370_v34 = vrot.slane %v64_v19, 4  ;;  %v124_v36 = vrot.slane %v23_v23, 4 }
  0x35   :  { %v230_v37 = vrot.slane %v229_v29, 1  ;;  %v265_v38 = vmax.f32 %v263_v22, %v264_v30  ;;  %v335_v39 = vmax.f32 %v58_v14, %v334_v31  ;;  %v796_v40 = vsel %vm795_vm0, %v159_v28, %v123_v25 }
  0x36   :  { %v195_v41 = vmax.f32 %v193_v26, %v194_v32  ;;  %v301_v42 = vmax.f32 %v299_v27, %v300_v33  ;;  %v371_v43 = vmax.f32 %v64_v19, %v370_v34  ;;  %v125_v44 = vmax.f32 %v23_v23, %v124_v36  ;;  %v24_v23 = vld [vmem:[%s7164_s0 + $0x10] sm:$0xff] }
  0x37   :  { %v231_v45 = vmax.f32 %v229_v29, %v230_v37  ;;  %v266_v46 = vrot.slane %v265_v38, 1  ;;  %v336_v47 = vrot.slane %v335_v39, 2  ;;  %v160_v49 = vrot.slane %v29_v35, 4 }
  0x38   :  { %v302_v50 = vrot.slane %v301_v42, 1  ;;  %v372_v51 = vrot.slane %v371_v43, 2  ;;  %v798_v52 = vsel %vm797_vm1, %v195_v41, %v796_v40  ;;  %v126_v54 = vrot.slane %v125_v44, 2 }
  0x39   :  { %v267_v55 = vmax.f32 %v265_v38, %v266_v46  ;;  %v337_v56 = vmax.f32 %v335_v39, %v336_v47  ;;  %v800_v57 = vsel %vm7174_vm2, %v231_v45, %v798_v52  ;;  %v161_v58 = vmax.f32 %v29_v35, %v160_v49  ;;  %v30_v35 = vld [vmem:[%s7164_s0 + $0x40] sm:$0xff] }
  0x3a   :  { %v303_v59 = vmax.f32 %v301_v42, %v302_v50  ;;  %v373_v60 = vmax.f32 %v371_v43, %v372_v51  ;;  %v127_v62 = vmax.f32 %v125_v44, %v126_v54  ;;  %v196_v63 = vrot.slane %v35_v48, 4 }
  0x3b   :  { %v338_v0 = vrot.slane %v337_v56, 1  ;;  %v802_v1 = vsel %vm7173_vm3, %v267_v55, %v800_v57  ;;  %v162_v3 = vrot.slane %v161_v58, 2  ;;  %v232_v4 = vrot.slane %v41_v53, 4 }
  0x3c   :  { %v374_v5 = vrot.slane %v373_v60, 1  ;;  %v804_v6 = vsel %vm7172_vm4, %v303_v59, %v802_v1  ;;  %v128_v7 = vrot.slane %v127_v62, 1  ;;  %v197_v8 = vmax.f32 %v35_v48, %v196_v63  ;;  %v36_v48 = vld [vmem:[%s7164_s0 + $0x70] sm:$0xff] }
  0x3d   :  { %v339_v9 = vmax.f32 %v337_v56, %v338_v0  ;;  %v163_v11 = vmax.f32 %v161_v58, %v162_v3  ;;  %v233_v12 = vmax.f32 %v41_v53, %v232_v4  ;;  %v268_v13 = vrot.slane %v47_v61, 4  ;;  %v42_v53 = vld [vmem:[%s7164_s0 + $0xa0] sm:$0xff] }
  0x3e   :  { %v375_v14 = vmax.f32 %v373_v60, %v374_v5  ;;  %v129_v16 = vmax.f32 %v127_v62, %v128_v7  ;;  %v198_v17 = vrot.slane %v197_v8, 2  ;;  %v304_v18 = vrot.slane %v53_v2, 4 }
  0x3f   :  { %v806_v19 = vsel %vm7171_vm5, %v339_v9, %v804_v6  ;;  %v164_v20 = vrot.slane %v163_v11, 1  ;;  %v234_v21 = vrot.slane %v233_v12, 2  ;;  %v269_v22 = vmax.f32 %v47_v61, %v268_v13  ;;  %v48_v61 = vld [vmem:[%s7164_s0 + $0xd0] sm:$0xff] }
  0x40   :  { %v808_v24 = vsel %vm7170_vm6, %v375_v14, %v806_v19  ;;  %v199_v25 = vmax.f32 %v197_v8, %v198_v17  ;;  %v305_v26 = vmax.f32 %v53_v2, %v304_v18  ;;  %v340_v27 = vrot.slane %v59_v10, 4  ;;  %v54_v2 = vld [vmem:[%s7164_s0 + $0x100] sm:$0xff] }
  0x41   :  { %916 = vmatpush.msra.mxu0 %v808_v24  ;;  %v165_v28 = vmax.f32 %v163_v11, %v164_v20  ;;  %v235_v29 = vmax.f32 %v233_v12, %v234_v21  ;;  %v270_v30 = vrot.slane %v269_v22, 2  ;;  %v376_v31 = vrot.slane %v65_v15, 4  ;;  %v66_v11 = vld [vmem:[%s7164_s0 + $0x160] sm:$0xff] }
  0x42   :  { %v200_v32 = vrot.slane %v199_v25, 1  ;;  %v306_v33 = vrot.slane %v305_v26, 2  ;;  %v341_v34 = vmax.f32 %v59_v10, %v340_v27  ;;  %v130_v36 = vrot.slane %v24_v23, 4  ;;  %v60_v10 = vld [vmem:[%s7164_s0 + $0x130] sm:$0xff] }
  0x43   :  { %v236_v37 = vrot.slane %v235_v29, 1  ;;  %v271_v38 = vmax.f32 %v269_v22, %v270_v30  ;;  %v377_v39 = vmax.f32 %v65_v15, %v376_v31  ;;  %v809_v40 = vsel %vm795_vm0, %v165_v28, %v129_v16  ;;  %v73_v28 = vld [vmem:[%s7164_s0 + $0x198] sm:$0xff] }
  0x44   :  { %v201_v41 = vmax.f32 %v199_v25, %v200_v32  ;;  %v307_v42 = vmax.f32 %v305_v26, %v306_v33  ;;  %v342_v43 = vrot.slane %v341_v34, 2  ;;  %v131_v44 = vmax.f32 %v24_v23, %v130_v36  ;;  %v4995_v23 = vld [vmem:[%s7165_s1] sm:$0xf]  ;;  %v79_v36 = vld [vmem:[%s7164_s0 + $0x1c8] sm:$0xff] }
  0x45   :  { %v237_v45 = vmax.f32 %v235_v29, %v236_v37  ;;  %v272_v46 = vrot.slane %v271_v38, 1  ;;  %v378_v47 = vrot.slane %v377_v39, 2  ;;  %v166_v49 = vrot.slane %v30_v35, 4 }
  0x46   :  { %v308_v50 = vrot.slane %v307_v42, 1  ;;  %v343_v51 = vmax.f32 %v341_v34, %v342_v43  ;;  %v810_v52 = vsel %vm797_vm1, %v201_v41, %v809_v40  ;;  %v132_v54 = vrot.slane %v131_v44, 2 }
  0x47   :  { %v273_v55 = vmax.f32 %v271_v38, %v272_v46  ;;  %v379_v56 = vmax.f32 %v377_v39, %v378_v47  ;;  %v811_v57 = vsel %vm7174_vm2, %v237_v45, %v810_v52  ;;  %v167_v58 = vmax.f32 %v30_v35, %v166_v49  ;;  %v85_v47 = vld [vmem:[%s7164_s0 + $0x1f8] sm:$0xff] }
  0x48   :  { %v309_v59 = vmax.f32 %v307_v42, %v308_v50  ;;  %v344_v60 = vrot.slane %v343_v51, 1  ;;  %v133_v62 = vmax.f32 %v131_v44, %v132_v54  ;;  %v202_v63 = vrot.slane %v36_v48, 4  ;;  %v91_v54 = vld [vmem:[%s7164_s0 + $0x228] sm:$0xff] }
  0x49   :  { %v380_v0 = vrot.slane %v379_v56, 1  ;;  %v812_v1 = vsel %vm7173_vm3, %v273_v55, %v811_v57  ;;  %v168_v3 = vrot.slane %v167_v58, 2  ;;  %v238_v4 = vrot.slane %v42_v53, 4 }
  0x4a   :  { %v345_v5 = vmax.f32 %v343_v51, %v344_v60  ;;  %v813_v6 = vsel %vm7172_vm4, %v309_v59, %v812_v1  ;;  %v134_v7 = vrot.slane %v133_v62, 1  ;;  %v203_v8 = vmax.f32 %v36_v48, %v202_v63  ;;  %v103_v1 = vld [vmem:[%s7164_s0 + $0x288] sm:$0xff] }
  0x4b   :  { %v381_v9 = vmax.f32 %v379_v56, %v380_v0  ;;  %v169_v12 = vmax.f32 %v167_v58, %v168_v3  ;;  %v239_v13 = vmax.f32 %v42_v53, %v238_v4  ;;  %v274_v14 = vrot.slane %v48_v61, 4 }
  0x4c   :  { %v814_v15 = vsel %vm7171_vm5, %v345_v5, %v813_v6  ;;  %v135_v16 = vmax.f32 %v133_v62, %v134_v7  ;;  %v204_v17 = vrot.slane %v203_v8, 2  ;;  %v310_v18 = vrot.slane %v54_v2, 4  ;;  %v97_v62 = vld [vmem:[%s7164_s0 + $0x258] sm:$0xff] }
  0x4d   :  { %v815_v19 = vsel %vm7170_vm6, %v381_v9, %v814_v15  ;;  %v170_v20 = vrot.slane %v169_v12, 1  ;;  %v240_v21 = vrot.slane %v239_v13, 2  ;;  %v275_v22 = vmax.f32 %v48_v61, %v274_v14  ;;  %v115_v15 = vld [vmem:[%s7164_s0 + $0x2e8] sm:$0xff] }
  0x4e   :  { %936 = vmatpush.msra.mxu1 %v815_v19  ;;  %v205_v24 = vmax.f32 %v203_v8, %v204_v17  ;;  %v311_v25 = vmax.f32 %v54_v2, %v310_v18  ;;  %v346_v26 = vrot.slane %v60_v10, 4  ;;  %v382_v27 = vrot.slane %v66_v11, 4  ;;  %v109_v2 = vld [vmem:[%s7164_s0 + $0x2b8] sm:$0xff]  ;;  %v74_v19 = vld [vmem:[%s7164_s0 + $0x1a0] sm:$0xff] }
  0x4f   :  { %v171_v29 = vmax.f32 %v169_v12, %v170_v20  ;;  %v241_v30 = vmax.f32 %v239_v13, %v240_v21  ;;  %v276_v31 = vrot.slane %v275_v22, 2  ;;  %vm898_vm7 = vcmask 130048  }
  0x50   :  { %v206_v32 = vrot.slane %v205_v24, 1  ;;  %v312_v33 = vrot.slane %v311_v25, 2  ;;  %v347_v34 = vmax.f32 %v60_v10, %v346_v26  ;;  %v383_v35 = vmax.f32 %v66_v11, %v382_v27  ;;  %4391 = vmatmul.msk.f32.vlgmr.msra.gmra.mxu0 %vm898_vm7, %v4995_v23  ;;  %4392 = vmatmul.msk.f32.vlgmr.msra.gmra.mxu1 %vm898_vm7, %v4995_v23 }
  0x51   :  { %v242_v37 = vrot.slane %v241_v30, 1  ;;  %v277_v38 = vmax.f32 %v275_v22, %v276_v31  ;;  %v816_v39 = vsel %vm795_vm0, %v171_v29, %v135_v16  ;;  %v424_v40 = vrot.slane %v73_v28, 4 }
  0x52   :  { %v207_v41 = vmax.f32 %v205_v24, %v206_v32  ;;  %v313_v42 = vmax.f32 %v311_v25, %v312_v33  ;;  %v348_v43 = vrot.slane %v347_v34, 2  ;;  %v384_v44 = vrot.slane %v383_v35, 2 }
  0x53   :  { %v243_v45 = vmax.f32 %v241_v30, %v242_v37  ;;  %v278_v46 = vrot.slane %v277_v38, 1  ;;  %v425_v48 = vmax.f32 %v73_v28, %v424_v40  ;;  %v460_v49 = vrot.slane %v79_v36, 4  ;;  %v80_v37 = vld [vmem:[%s7164_s0 + $0x1d0] sm:$0xff] }
  0x54   :  { %v314_v50 = vrot.slane %v313_v42, 1  ;;  %v349_v51 = vmax.f32 %v347_v34, %v348_v43  ;;  %v385_v52 = vmax.f32 %v383_v35, %v384_v44  ;;  %v817_v53 = vsel %vm797_vm1, %v207_v41, %v816_v39 }
  0x55   :  { %v279_v55 = vmax.f32 %v277_v38, %v278_v46  ;;  %v818_v56 = vsel %vm7174_vm2, %v243_v45, %v817_v53  ;;  %v426_v57 = vrot.slane %v425_v48, 2  ;;  %v461_v58 = vmax.f32 %v79_v36, %v460_v49 }
  0x56   :  { %v315_v59 = vmax.f32 %v313_v42, %v314_v50  ;;  %v350_v60 = vrot.slane %v349_v51, 1  ;;  %v386_v61 = vrot.slane %v385_v52, 1  ;;  %v496_v63 = vrot.slane %v85_v47, 4 }
  0x57   :  { %v819_v0 = vsel %vm7173_vm3, %v279_v55, %v818_v56  ;;  %v427_v3 = vmax.f32 %v425_v48, %v426_v57  ;;  %v462_v4 = vrot.slane %v461_v58, 2  ;;  %v532_v5 = vrot.slane %v91_v54, 4  ;;  %v86_v48 = vld [vmem:[%s7164_s0 + $0x200] sm:$0xff]  ;;  %v92_v55 = vld [vmem:[%s7164_s0 + $0x230] sm:$0xff] }
  0x58   :  { %v351_v6 = vmax.f32 %v349_v51, %v350_v60  ;;  %v387_v7 = vmax.f32 %v385_v52, %v386_v61  ;;  %v820_v8 = vsel %vm7172_vm4, %v315_v59, %v819_v0  ;;  %v497_v9 = vmax.f32 %v85_v47, %v496_v63  ;;  %v104_v59 = vld [vmem:[%s7164_s0 + $0x290] sm:$0xff] }
  0x59   :  { %v428_v10 = vrot.slane %v427_v3, 1  ;;  %v463_v11 = vmax.f32 %v461_v58, %v462_v4  ;;  %v533_v12 = vmax.f32 %v91_v54, %v532_v5  ;;  %v568_v13 = vrot.slane %v97_v62, 4  ;;  %v98_v58 = vld [vmem:[%s7164_s0 + $0x260] sm:$0xff] }
  0x5a   :  { %v821_v14 = vsel %vm7171_vm5, %v351_v6, %v820_v8  ;;  %v498_v16 = vrot.slane %v497_v9, 2  ;;  %v604_v17 = vrot.slane %v103_v1, 4  ;;  %v640_v18 = vrot.slane %v109_v2, 4 }
  0x5b   :  { %v822_v20 = vsel %vm7170_vm6, %v387_v7, %v821_v14  ;;  %v429_v21 = vmax.f32 %v427_v3, %v428_v10  ;;  %v464_v22 = vrot.slane %v463_v11, 1  ;;  %v534_v24 = vrot.slane %v533_v12, 2  ;;  %v110_v7 = vld [vmem:[%s7164_s0 + $0x2c0] sm:$0xff] }
  0x5c   :  { %956 = vmatpush.msra.mxu3 %v822_v20  ;;  %v499_v25 = vmax.f32 %v497_v9, %v498_v16  ;;  %v569_v26 = vmax.f32 %v97_v62, %v568_v13  ;;  %v605_v27 = vmax.f32 %v103_v1, %v604_v17  ;;  %v641_v28 = vmax.f32 %v109_v2, %v640_v18  ;;  %v116_v13 = vld [vmem:[%s7164_s0 + $0x2f0] sm:$0xff]  ;;  %v75_v20 = vld [vmem:[%s7164_s0 + $0x1a8] sm:$0xff] }
  0x5d   :  { %4393 = vmatmul.msk.f32.vlgmr.msra.gmra.mxu3 %vm898_vm7, %v4995_v23  ;;  %v465_v29 = vmax.f32 %v463_v11, %v464_v22  ;;  %v535_v30 = vmax.f32 %v533_v12, %v534_v24  ;;  %v676_v31 = vrot.slane %v115_v15, 4  ;;  %v430_v32 = vrot.slane %v74_v19, 4 }
  0x5e   :  { %v500_v33 = vrot.slane %v499_v25, 1  ;;  %v570_v34 = vrot.slane %v569_v26, 2  ;;  %v606_v35 = vrot.slane %v605_v27, 2  ;;  %v642_v36 = vrot.slane %v641_v28, 2 }
  0x5f   :  { %v536_v38 = vrot.slane %v535_v30, 1  ;;  %v677_v39 = vmax.f32 %v115_v15, %v676_v31  ;;  %v865_v40 = vsel %vm795_vm0, %v465_v29, %v429_v21  ;;  %v431_v41 = vmax.f32 %v74_v19, %v430_v32 }
  0x60   :  { %v501_v42 = vmax.f32 %v499_v25, %v500_v33  ;;  %v571_v43 = vmax.f32 %v569_v26, %v570_v34  ;;  %v607_v44 = vmax.f32 %v605_v27, %v606_v35  ;;  %v643_v45 = vmax.f32 %v641_v28, %v642_v36 }
  0x61   :  { %v537_v46 = vmax.f32 %v535_v30, %v536_v38  ;;  %v678_v47 = vrot.slane %v677_v39, 2  ;;  %v432_v49 = vrot.slane %v431_v41, 2  ;;  %v466_v50 = vrot.slane %v80_v37, 4  ;;  %v81_v38 = vld [vmem:[%s7164_s0 + $0x1d8] sm:$0xff] }
  0x62   :  { %v572_v51 = vrot.slane %v571_v43, 1  ;;  %v608_v52 = vrot.slane %v607_v44, 1  ;;  %v644_v53 = vrot.slane %v643_v45, 1  ;;  %v866_v54 = vsel %vm797_vm1, %v501_v42, %v865_v40 }
  0x63   :  { %v679_v56 = vmax.f32 %v677_v39, %v678_v47  ;;  %v867_v57 = vsel %vm7174_vm2, %v537_v46, %v866_v54  ;;  %v433_v60 = vmax.f32 %v431_v41, %v432_v49  ;;  %v467_v61 = vmax.f32 %v80_v37, %v466_v50  ;;  %v87_v49 = vld [vmem:[%s7164_s0 + $0x208] sm:$0xff]  ;;  %v93_v50 = vld [vmem:[%s7164_s0 + $0x238] sm:$0xff] }
  0x64   :  { %v573_v62 = vmax.f32 %v571_v43, %v572_v51  ;;  %v609_v63 = vmax.f32 %v607_v44, %v608_v52  ;;  %v645_v0 = vmax.f32 %v643_v45, %v644_v53  ;;  %v502_v1 = vrot.slane %v86_v48, 4 }
  0x65   :  { %v680_v2 = vrot.slane %v679_v56, 1  ;;  %v434_v3 = vrot.slane %v433_v60, 1  ;;  %v468_v4 = vrot.slane %v467_v61, 2  ;;  %v538_v5 = vrot.slane %v92_v55, 4 }
  0x66   :  { %v868_v6 = vsel %vm7173_vm3, %v573_v62, %v867_v57  ;;  %v503_v8 = vmax.f32 %v86_v48, %v502_v1  ;;  %v574_v9 = vrot.slane %v98_v58, 4  ;;  %v610_v10 = vrot.slane %v104_v59, 4 }
  0x67   :  { %v681_v11 = vmax.f32 %v679_v56, %v680_v2  ;;  %v869_v12 = vsel %vm7172_vm4, %v609_v63, %v868_v6  ;;  %v435_v14 = vmax.f32 %v433_v60, %v434_v3  ;;  %v469_v15 = vmax.f32 %v467_v61, %v468_v4  ;;  %v99_v63 = vld [vmem:[%s7164_s0 + $0x268] sm:$0xff]  ;;  %v105_v4 = vld [vmem:[%s7164_s0 + $0x298] sm:$0xff] }
  0x68   :  { %v870_v16 = vsel %vm7171_vm5, %v645_v0, %v869_v12  ;;  %v504_v17 = vrot.slane %v503_v8, 2  ;;  %v539_v18 = vmax.f32 %v92_v55, %v538_v5  ;;  %v575_v19 = vmax.f32 %v98_v58, %v574_v9  ;;  %v111_v9 = vld [vmem:[%s7164_s0 + $0x2c8] sm:$0xff] }
  0x69   :  { %v871_v21 = vsel %vm7170_vm6, %v681_v11, %v870_v16  ;;  %v470_v22 = vrot.slane %v469_v15, 1  ;;  %v611_v24 = vmax.f32 %v104_v59, %v610_v10  ;;  %v646_v25 = vrot.slane %v110_v7, 4  ;;  %v117_v10 = vld [vmem:[%s7164_s0 + $0x2f8] sm:$0xff] }
  0x6a   :  { %975 = vmatpush.msrb.mxu3 %v871_v21  ;;  %v505_v26 = vmax.f32 %v503_v8, %v504_v17  ;;  %v540_v27 = vrot.slane %v539_v18, 2  ;;  %v576_v28 = vrot.slane %v575_v19, 2  ;;  %v682_v29 = vrot.slane %v116_v13, 4  ;;  %v25_v17 = vld [vmem:[%s7164_s0 + $0x18] sm:$0xff] }
  0x6b   :  { %v471_v30 = vmax.f32 %v469_v15, %v470_v22  ;;  %v612_v31 = vrot.slane %v611_v24, 2  ;;  %v647_v32 = vmax.f32 %v110_v7, %v646_v25  ;;  %v436_v33 = vrot.slane %v75_v20, 4 }
  0x6c   :  { %v506_v34 = vrot.slane %v505_v26, 1  ;;  %v541_v35 = vmax.f32 %v539_v18, %v540_v27  ;;  %v577_v36 = vmax.f32 %v575_v19, %v576_v28  ;;  %v683_v37 = vmax.f32 %v116_v13, %v682_v29 }
  0x6d   :  { %v613_v39 = vmax.f32 %v611_v24, %v612_v31  ;;  %v648_v40 = vrot.slane %v647_v32, 2  ;;  %v872_v41 = vsel %vm795_vm0, %v471_v30, %v435_v14  ;;  %v437_v42 = vmax.f32 %v75_v20, %v436_v33 }
  0x6e   :  { %v507_v43 = vmax.f32 %v505_v26, %v506_v34  ;;  %v542_v44 = vrot.slane %v541_v35, 1  ;;  %v578_v45 = vrot.slane %v577_v36, 1  ;;  %v684_v46 = vrot.slane %v683_v37, 2 }
  0x6f   :  { %v614_v47 = vrot.slane %v613_v39, 1  ;;  %v649_v48 = vmax.f32 %v647_v32, %v648_v40  ;;  %v438_v51 = vrot.slane %v437_v42, 2  ;;  %v472_v52 = vrot.slane %v81_v38, 4 }
  0x70   :  { %v543_v53 = vmax.f32 %v541_v35, %v542_v44  ;;  %v579_v54 = vmax.f32 %v577_v36, %v578_v45  ;;  %v685_v55 = vmax.f32 %v683_v37, %v684_v46  ;;  %v873_v56 = vsel %vm797_vm1, %v507_v43, %v872_v41  ;;  %v37_v44 = vld [vmem:[%s7164_s0 + $0x78] sm:$0xff] }
  0x71   :  { %v615_v57 = vmax.f32 %v613_v39, %v614_v47  ;;  %v650_v58 = vrot.slane %v649_v48, 1  ;;  %v439_v59 = vmax.f32 %v437_v42, %v438_v51  ;;  %v473_v60 = vmax.f32 %v81_v38, %v472_v52  ;;  %v31_v38 = vld [vmem:[%s7164_s0 + $0x48] sm:$0xff] }
  0x72   :  { %v686_v61 = vrot.slane %v685_v55, 1  ;;  %v874_v62 = vsel %vm7174_vm2, %v543_v53, %v873_v56  ;;  %v508_v0 = vrot.slane %v87_v49, 4  ;;  %v544_v1 = vrot.slane %v93_v50, 4 }
  0x73   :  { %v651_v2 = vmax.f32 %v649_v48, %v650_v58  ;;  %v875_v3 = vsel %vm7173_vm3, %v579_v54, %v874_v62  ;;  %v440_v5 = vrot.slane %v439_v59, 1  ;;  %v474_v6 = vrot.slane %v473_v60, 2 }
  0x74   :  { %v687_v7 = vmax.f32 %v685_v55, %v686_v61  ;;  %v876_v8 = vsel %vm7172_vm4, %v615_v57, %v875_v3  ;;  %v509_v11 = vmax.f32 %v87_v49, %v508_v0  ;;  %v545_v12 = vmax.f32 %v93_v50, %v544_v1  ;;  %v43_v55 = vld [vmem:[%s7164_s0 + $0xa8] sm:$0xff] }
  0x75   :  { %v877_v13 = vsel %vm7171_vm5, %v651_v2, %v876_v8  ;;  %v441_v14 = vmax.f32 %v439_v59, %v440_v5  ;;  %v475_v15 = vmax.f32 %v473_v60, %v474_v6  ;;  %v580_v16 = vrot.slane %v99_v63, 4  ;;  %v55_v0 = vld [vmem:[%s7164_s0 + $0x108] sm:$0xff] }
  0x76   :  { %v878_v18 = vsel %vm7170_vm6, %v687_v7, %v877_v13  ;;  %v510_v19 = vrot.slane %v509_v11, 2  ;;  %v546_v20 = vrot.slane %v545_v12, 2  ;;  %v616_v21 = vrot.slane %v105_v4, 4  ;;  %v61_v7 = vld [vmem:[%s7164_s0 + $0x138] sm:$0xff] }
  0x77   :  { %995 = vmatpush.msrb.mxu0 %v878_v18  ;;  %v476_v22 = vrot.slane %v475_v15, 1  ;;  %v581_v24 = vmax.f32 %v99_v63, %v580_v16  ;;  %v652_v25 = vrot.slane %v111_v9, 4  ;;  %v688_v26 = vrot.slane %v117_v10, 4  ;;  %v49_v63 = vld [vmem:[%s7164_s0 + $0xd8] sm:$0xff]  ;;  %v26_v18 = vld [vmem:[%s7164_s0 + $0x20] sm:$0xff] }
  0x78   :  { %v511_v27 = vmax.f32 %v509_v11, %v510_v19  ;;  %v547_v28 = vmax.f32 %v545_v12, %v546_v20  ;;  %v617_v29 = vmax.f32 %v105_v4, %v616_v21  ;;  %v136_v30 = vrot.slane %v25_v17, 4 }
  0x79   :  { %v477_v31 = vmax.f32 %v475_v15, %v476_v22  ;;  %v582_v32 = vrot.slane %v581_v24, 2  ;;  %v653_v33 = vmax.f32 %v111_v9, %v652_v25  ;;  %v689_v34 = vmax.f32 %v117_v10, %v688_v26  ;;  %v67_v10 = vld [vmem:[%s7164_s0 + $0x168] sm:$0xff] }
  0x7a   :  { %v512_v35 = vrot.slane %v511_v27, 1  ;;  %v548_v36 = vrot.slane %v547_v28, 1  ;;  %v618_v37 = vrot.slane %v617_v29, 2  ;;  %v137_v39 = vmax.f32 %v25_v17, %v136_v30 }
  0x7b   :  { %v583_v40 = vmax.f32 %v581_v24, %v582_v32  ;;  %v654_v41 = vrot.slane %v653_v33, 2  ;;  %v690_v42 = vrot.slane %v689_v34, 2  ;;  %v879_v43 = vsel %vm795_vm0, %v477_v31, %v441_v14 }
  0x7c   :  { %v513_v45 = vmax.f32 %v511_v27, %v512_v35  ;;  %v549_v46 = vmax.f32 %v547_v28, %v548_v36  ;;  %v619_v47 = vmax.f32 %v617_v29, %v618_v37  ;;  %v138_v48 = vrot.slane %v137_v39, 2  ;;  %v32_v36 = vld [vmem:[%s7164_s0 + $0x50] sm:$0xff] }
  0x7d   :  { %v584_v49 = vrot.slane %v583_v40, 1  ;;  %v655_v50 = vmax.f32 %v653_v33, %v654_v41  ;;  %v691_v51 = vmax.f32 %v689_v34, %v690_v42  ;;  %v172_v52 = vrot.slane %v31_v38, 4 }
  0x7e   :  { %v620_v53 = vrot.slane %v619_v47, 1  ;;  %v880_v54 = vsel %vm797_vm1, %v513_v45, %v879_v43  ;;  %v139_v56 = vmax.f32 %v137_v39, %v138_v48  ;;  %v208_v57 = vrot.slane %v37_v44, 4 }
  0x7f   :  { %v585_v58 = vmax.f32 %v583_v40, %v584_v49  ;;  %v656_v59 = vrot.slane %v655_v50, 1  ;;  %v692_v60 = vrot.slane %v691_v51, 1  ;;  %v881_v61 = vsel %vm7174_vm2, %v549_v46, %v880_v54 }
  0x80   :  { %v621_v62 = vmax.f32 %v619_v47, %v620_v53  ;;  %v140_v1 = vrot.slane %v139_v56, 1  ;;  %v173_v2 = vmax.f32 %v31_v38, %v172_v52  ;;  %v209_v3 = vmax.f32 %v37_v44, %v208_v57  ;;  %v38_v53 = vld [vmem:[%s7164_s0 + $0x80] sm:$0xff] }
  0x81   :  { %v657_v4 = vmax.f32 %v655_v50, %v656_v59  ;;  %v693_v5 = vmax.f32 %v691_v51, %v692_v60  ;;  %v882_v6 = vsel %vm7173_vm3, %v585_v58, %v881_v61  ;;  %v244_v8 = vrot.slane %v43_v55, 4  ;;  %v50_v57 = vld [vmem:[%s7164_s0 + $0xe0] sm:$0xff] }
  0x82   :  { %v883_v9 = vsel %vm7172_vm4, %v621_v62, %v882_v6  ;;  %v141_v11 = vmax.f32 %v139_v56, %v140_v1  ;;  %v174_v12 = vrot.slane %v173_v2, 2  ;;  %v210_v13 = vrot.slane %v209_v3, 2  ;;  %v44_v56 = vld [vmem:[%s7164_s0 + $0xb0] sm:$0xff] }
  0x83   :  { %v884_v14 = vsel %vm7171_vm5, %v657_v4, %v883_v9  ;;  %v245_v15 = vmax.f32 %v43_v55, %v244_v8  ;;  %v280_v16 = vrot.slane %v49_v63, 4  ;;  %v316_v17 = vrot.slane %v55_v0, 4  ;;  %v56_v1 = vld [vmem:[%s7164_s0 + $0x110] sm:$0xff] }
  0x84   :  { %v885_v19 = vsel %vm7170_vm6, %v693_v5, %v884_v14  ;;  %v175_v20 = vmax.f32 %v173_v2, %v174_v12  ;;  %v211_v21 = vmax.f32 %v209_v3, %v210_v13  ;;  %v352_v22 = vrot.slane %v61_v7, 4 }
  0x85   :  { %1015 = vmatpush.msrb.mxu1 %v885_v19  ;;  %v246_v24 = vrot.slane %v245_v15, 2  ;;  %v281_v25 = vmax.f32 %v49_v63, %v280_v16  ;;  %v317_v26 = vmax.f32 %v55_v0, %v316_v17  ;;  %v388_v27 = vrot.slane %v67_v10, 4  ;;  %v27_v19 = vld [vmem:[%s7164_s0 + $0x28] sm:$0xff] }
  0x86   :  { %v176_v28 = vrot.slane %v175_v20, 1  ;;  %v212_v29 = vrot.slane %v211_v21, 1  ;;  %v353_v30 = vmax.f32 %v61_v7, %v352_v22  ;;  %v142_v31 = vrot.slane %v26_v18, 4  ;;  %v62_v7 = vld [vmem:[%s7164_s0 + $0x140] sm:$0xff] }
  0x87   :  { %v247_v32 = vmax.f32 %v245_v15, %v246_v24  ;;  %v282_v33 = vrot.slane %v281_v25, 2  ;;  %v318_v34 = vrot.slane %v317_v26, 2  ;;  %v389_v35 = vmax.f32 %v67_v10, %v388_v27 }
  0x88   :  { %v177_v37 = vmax.f32 %v175_v20, %v176_v28  ;;  %v213_v38 = vmax.f32 %v211_v21, %v212_v29  ;;  %v354_v39 = vrot.slane %v353_v30, 2  ;;  %v143_v40 = vmax.f32 %v26_v18, %v142_v31 }
  0x89   :  { %v248_v41 = vrot.slane %v247_v32, 1  ;;  %v283_v42 = vmax.f32 %v281_v25, %v282_v33  ;;  %v319_v43 = vmax.f32 %v317_v26, %v318_v34  ;;  %v390_v44 = vrot.slane %v389_v35, 2 }
  0x8a   :  { %v355_v45 = vmax.f32 %v353_v30, %v354_v39  ;;  %v823_v46 = vsel %vm795_vm0, %v177_v37, %v141_v11  ;;  %v144_v47 = vrot.slane %v143_v40, 2  ;;  %v178_v48 = vrot.slane %v32_v36, 4  ;;  %v68_v11 = vld [vmem:[%s7164_s0 + $0x170] sm:$0xff]  ;;  %v33_v37 = vld [vmem:[%s7164_s0 + $0x58] sm:$0xff] }
  0x8b   :  { %v249_v49 = vmax.f32 %v247_v32, %v248_v41  ;;  %v284_v50 = vrot.slane %v283_v42, 1  ;;  %v320_v51 = vrot.slane %v319_v43, 1  ;;  %v391_v52 = vmax.f32 %v389_v35, %v390_v44 }
  0x8c   :  { %v356_v54 = vrot.slane %v355_v45, 1  ;;  %v824_v55 = vsel %vm797_vm1, %v213_v38, %v823_v46  ;;  %v145_v58 = vmax.f32 %v143_v40, %v144_v47  ;;  %v179_v59 = vmax.f32 %v32_v36, %v178_v48  ;;  %v39_v48 = vld [vmem:[%s7164_s0 + $0x88] sm:$0xff] }
  0x8d   :  { %v285_v60 = vmax.f32 %v283_v42, %v284_v50  ;;  %v321_v61 = vmax.f32 %v319_v43, %v320_v51  ;;  %v392_v62 = vrot.slane %v391_v52, 1  ;;  %v825_v63 = vsel %vm7174_vm2, %v249_v49, %v824_v55 }
  0x8e   :  { %v357_v0 = vmax.f32 %v355_v45, %v356_v54  ;;  %v146_v2 = vrot.slane %v145_v58, 1  ;;  %v180_v3 = vrot.slane %v179_v59, 2  ;;  %v214_v4 = vrot.slane %v38_v53, 4 }
  0x8f   :  { %v393_v5 = vmax.f32 %v391_v52, %v392_v62  ;;  %v826_v6 = vsel %vm7173_vm3, %v285_v60, %v825_v63  ;;  %v250_v8 = vrot.slane %v44_v56, 4  ;;  %v286_v9 = vrot.slane %v50_v57, 4  ;;  %v51_v63 = vld [vmem:[%s7164_s0 + $0xe8] sm:$0xff] }
  0x90   :  { %v827_v10 = vsel %vm7172_vm4, %v321_v61, %v826_v6  ;;  %v147_v12 = vmax.f32 %v145_v58, %v146_v2  ;;  %v181_v13 = vmax.f32 %v179_v59, %v180_v3  ;;  %v215_v14 = vmax.f32 %v38_v53, %v214_v4  ;;  %v57_v3 = vld [vmem:[%s7164_s0 + $0x118] sm:$0xff] }
  0x91   :  { %v828_v15 = vsel %vm7171_vm5, %v357_v0, %v827_v10  ;;  %v251_v16 = vmax.f32 %v44_v56, %v250_v8  ;;  %v287_v17 = vmax.f32 %v50_v57, %v286_v9  ;;  %v322_v18 = vrot.slane %v56_v1, 4  ;;  %v45_v57 = vld [vmem:[%s7164_s0 + $0xb8] sm:$0xff]  ;;  %v63_v8 = vld [vmem:[%s7164_s0 + $0x148] sm:$0xff] }
  0x92   :  { %v829_v20 = vsel %vm7170_vm6, %v393_v5, %v828_v15  ;;  %v182_v21 = vrot.slane %v181_v13, 1  ;;  %v216_v22 = vrot.slane %v215_v14, 2  ;;  %v358_v24 = vrot.slane %v62_v7, 4  ;;  %v69_v9 = vld [vmem:[%s7164_s0 + $0x178] sm:$0xff] }
  0x93   :  { %976 = vmatpush.msrb.mxu3 %v829_v20  ;;  %v252_v25 = vrot.slane %v251_v16, 2  ;;  %v288_v26 = vrot.slane %v287_v17, 2  ;;  %v323_v27 = vmax.f32 %v56_v1, %v322_v18  ;;  %v394_v28 = vrot.slane %v68_v11, 4 }
  0x94   :  { %v183_v29 = vmax.f32 %v181_v13, %v182_v21  ;;  %v217_v30 = vmax.f32 %v215_v14, %v216_v22  ;;  %v359_v31 = vmax.f32 %v62_v7, %v358_v24  ;;  %v148_v32 = vrot.slane %v27_v19, 4  ;;  %4394 = vmatmul.msk.f32.vlgmr.msrb.gmra.mxu3 %vm898_vm7, %v4995_v23 }
  0x95   :  { %v253_v33 = vmax.f32 %v251_v16, %v252_v25  ;;  %v289_v34 = vmax.f32 %v287_v17, %v288_v26  ;;  %v324_v35 = vrot.slane %v323_v27, 2  ;;  %v395_v36 = vmax.f32 %v68_v11, %v394_v28 }
  0x96   :  { %v218_v38 = vrot.slane %v217_v30, 1  ;;  %v360_v39 = vrot.slane %v359_v31, 2  ;;  %v830_v40 = vsel %vm795_vm0, %v183_v29, %v147_v12  ;;  %v149_v41 = vmax.f32 %v27_v19, %v148_v32 }
  0x97   :  { %v254_v42 = vrot.slane %v253_v33, 1  ;;  %v290_v43 = vrot.slane %v289_v34, 1  ;;  %v325_v44 = vmax.f32 %v323_v27, %v324_v35  ;;  %v396_v45 = vrot.slane %v395_v36, 2 }
  0x98   :  { %v219_v46 = vmax.f32 %v217_v30, %v218_v38  ;;  %v361_v47 = vmax.f32 %v359_v31, %v360_v39  ;;  %v150_v49 = vrot.slane %v149_v41, 2  ;;  %v184_v50 = vrot.slane %v33_v37, 4 }
  0x99   :  { %v255_v51 = vmax.f32 %v253_v33, %v254_v42  ;;  %v291_v52 = vmax.f32 %v289_v34, %v290_v43  ;;  %v326_v53 = vrot.slane %v325_v44, 1  ;;  %v397_v54 = vmax.f32 %v395_v36, %v396_v45 }
  0x9a   :  { %v362_v55 = vrot.slane %v361_v47, 1  ;;  %v831_v56 = vsel %vm797_vm1, %v219_v46, %v830_v40  ;;  %v151_v58 = vmax.f32 %v149_v41, %v150_v49  ;;  %v185_v59 = vmax.f32 %v33_v37, %v184_v50 }
  0x9b   :  { %v327_v60 = vmax.f32 %v325_v44, %v326_v53  ;;  %v398_v61 = vrot.slane %v397_v54, 1  ;;  %v832_v62 = vsel %vm7174_vm2, %v255_v51, %v831_v56  ;;  %v220_v0 = vrot.slane %v39_v48, 4 }
  0x9c   :  { %v363_v1 = vmax.f32 %v361_v47, %v362_v55  ;;  %v833_v2 = vsel %vm7173_vm3, %v291_v52, %v832_v62  ;;  %v152_v4 = vrot.slane %v151_v58, 1  ;;  %v186_v5 = vrot.slane %v185_v59, 2  ;;  %v4452_v62 = vld [vmem:[%s7164_s0 + $0x480] sm:$0xff] }
  0x9d   :  { %v399_v6 = vmax.f32 %v397_v54, %v398_v61  ;;  %v834_v7 = vsel %vm7172_vm4, %v327_v60, %v833_v2  ;;  %v221_v10 = vmax.f32 %v39_v48, %v220_v0  ;;  %v256_v11 = vrot.slane %v45_v57, 4  ;;  %v16_v60 = vld [vmem:[%s7165_s1 + $0xc0] sm:$0x3f]  ;;  %v5209_v61 = vld [vmem:[%s7165_s1 + $0xc8] sm:$0x3f]  ;;  %v4470_v2 = vld [vmem:[%s7164_s0 + $0x510] sm:$0xff] }
  0x9e   :  { %v835_v12 = vsel %vm7171_vm5, %v363_v1, %v834_v7  ;;  %v153_v13 = vmax.f32 %v151_v58, %v152_v4  ;;  %v187_v14 = vmax.f32 %v185_v59, %v186_v5  ;;  %v292_v15 = vrot.slane %v51_v63, 4  ;;  %1042 = vmatpush.xpose.msra.mxu2 %v16_v60  ;;  %1062 = vmatpush.xpose.msra.mxu3 %v5209_v61  ;;  %v4404_v4 = vld [vmem:[%s7164_s0 + $0x300] sm:$0xff]  ;;  %v5230_v5 = vld [vmem:[%s7164_s0 + $0x330] sm:$0xff] }
  0x9f   :  { %v836_v16 = vsel %vm7170_vm6, %v399_v6, %v835_v12  ;;  %v222_v17 = vrot.slane %v221_v10, 2  ;;  %v257_v18 = vmax.f32 %v45_v57, %v256_v11  ;;  %v328_v19 = vrot.slane %v57_v3, 4  ;;  %v4476_v6 = vld [vmem:[%s7164_s0 + $0x540] sm:$0xff]  ;;  %v4482_v12 = vld [vmem:[%s7164_s0 + $0x570] sm:$0xff] }
  0xa0   :  { %996 = vmatpush.msrb.mxu0 %v836_v16  ;;  %v188_v20 = vrot.slane %v187_v14, 1  ;;  %v293_v21 = vmax.f32 %v51_v63, %v292_v15  ;;  %v364_v22 = vrot.slane %v63_v8, 4  ;;  %v400_v24 = vrot.slane %v69_v9, 4  ;;  %v4464_v63 = vld [vmem:[%s7164_s0 + $0x4e0] sm:$0xff] }
  0xa1   :  { %v223_v25 = vmax.f32 %v221_v10, %v222_v17  ;;  %v258_v26 = vrot.slane %v257_v18, 2  ;;  %v329_v27 = vmax.f32 %v57_v3, %v328_v19  ;;  %4395 = vmatmul.msk.f32.vlgmr.msrb.gmra.mxu0 %vm898_vm7, %v4995_v23  ;;  %v4786_v32 = vmov 16   ;;  %v5238_v10 = vld [vmem:[%s7164_s0 + $0x360] sm:$0xff] }
  0xa2   :  { %v189_v28 = vmax.f32 %v187_v14, %v188_v20  ;;  %v294_v29 = vrot.slane %v293_v21, 2  ;;  %v365_v30 = vmax.f32 %v63_v8, %v364_v22  ;;  %v401_v31 = vmax.f32 %v69_v9, %v400_v24  ;;  %4605 = vset.pattern.permute.xlu0 %v4786_v32  ;;  %v4488_v17 = vld [vmem:[%s7164_s0 + $0x5a0] sm:$0xff]  ;;  %v4494_v22 = vld [vmem:[%s7164_s0 + $0x5d0] sm:$0xff] }
  0xa3   :  { %v224_v33 = vrot.slane %v223_v25, 1  ;;  %v259_v34 = vmax.f32 %v257_v18, %v258_v26  ;;  %v330_v35 = vrot.slane %v329_v27, 2  ;;  %696 = vperm.xlu0 %4605, %v4995_v23   ;;  %v2602_v0 = vrot.slane %v4452_v62, 4 }
  0xa4   :  { %v295_v36 = vmax.f32 %v293_v21, %v294_v29  ;;  %v366_v37 = vrot.slane %v365_v30, 2  ;;  %v402_v38 = vrot.slane %v401_v31, 2  ;;  %v837_v39 = vsel %vm795_vm0, %v189_v28, %v153_v13 }
  0xa5   :  { %v225_v40 = vmax.f32 %v223_v25, %v224_v33  ;;  %v260_v41 = vrot.slane %v259_v34, 1  ;;  %v331_v42 = vmax.f32 %v329_v27, %v330_v35  ;;  %v2674_v3 = vrot.slane %v4464_v63, 4 }
  0xa6   :  { %v296_v43 = vrot.slane %v295_v36, 1  ;;  %v367_v44 = vmax.f32 %v365_v30, %v366_v37  ;;  %v403_v45 = vmax.f32 %v401_v31, %v402_v38  ;;  %v2603_v7 = vmax.f32 %v4452_v62, %v2602_v0  ;;  %v4422_v0 = vld [vmem:[%s7164_s0 + $0x390] sm:$0xff] }
  0xa7   :  { %v261_v46 = vmax.f32 %v259_v34, %v260_v41  ;;  %v332_v47 = vrot.slane %v331_v42, 1  ;;  %v838_v48 = vsel %vm797_vm1, %v225_v40, %v837_v39  ;;  %v2710_v9 = vrot.slane %v4470_v2, 4 }
  0xa8   :  { %v297_v49 = vmax.f32 %v295_v36, %v296_v43  ;;  %v368_v50 = vrot.slane %v367_v44, 1  ;;  %v404_v51 = vrot.slane %v403_v45, 1  ;;  %v2314_v11 = vrot.slane %v4404_v4, 4  ;;  %v18_v36 = vld [vmem:[%s7165_s1 + $0xd0] sm:$0x3f] }
  0xa9   :  { %v333_v52 = vmax.f32 %v331_v42, %v332_v47  ;;  %v839_v53 = vsel %vm7174_vm2, %v261_v46, %v838_v48  ;;  %v2675_v13 = vmax.f32 %v4464_v63, %v2674_v3  ;;  %v2746_v14 = vrot.slane %v4476_v6, 4  ;;  %1082 = vmatpush.xpose.msra.mxu0 %v18_v36  ;;  %v20_v46 = vld [vmem:[%s7165_s1 + $0xe0] sm:$0x3f]  ;;  %v5260_v47 = vld [vmem:[%s7165_s1 + $0xe8] sm:$0x3f] }
  0xaa   :  { %v369_v54 = vmax.f32 %v367_v44, %v368_v50  ;;  %v405_v55 = vmax.f32 %v403_v45, %v404_v51  ;;  %v840_v56 = vsel %vm7173_vm3, %v297_v49, %v839_v53  ;;  %v2350_v15 = vrot.slane %v5230_v5, 4  ;;  %1122 = vmatpush.xpose.msrb.mxu2 %v20_v46  ;;  %1142 = vmatpush.xpose.msrb.mxu3 %v5260_v47 }
  0xab   :  { %v841_v57 = vsel %vm7172_vm4, %v333_v52, %v840_v56  ;;  %v2386_v16 = vrot.slane %v5238_v10, 4  ;;  %v2604_v18 = vrot.slane %v2603_v7, 2  ;;  %v2711_v20 = vmax.f32 %v4470_v2, %v2710_v9 }
  0xac   :  { %v842_v58 = vsel %vm7171_vm5, %v369_v54, %v841_v57  ;;  %v2782_v21 = vrot.slane %v4482_v12, 4  ;;  %v2676_v24 = vrot.slane %v2675_v13, 2  ;;  %v2747_v25 = vmax.f32 %v4476_v6, %v2746_v14 }
  0xad   :  { %v843_v59 = vsel %vm7170_vm6, %v405_v55, %v842_v58  ;;  %v2818_v26 = vrot.slane %v4488_v17, 4  ;;  %v2315_v27 = vmax.f32 %v4404_v4, %v2314_v11  ;;  %v2605_v28 = vmax.f32 %v2603_v7, %v2604_v18  ;;  %v4428_v4 = vld [vmem:[%s7164_s0 + $0x3c0] sm:$0xff] }
  0xae   :  { %1016 = vmatpush.msrb.mxu1 %v843_v59  ;;  %v2712_v30 = vrot.slane %v2711_v20, 2  ;;  %v2783_v31 = vmax.f32 %v4482_v12, %v2782_v21  ;;  %v2677_v32 = vmax.f32 %v2675_v13, %v2676_v24  ;;  %v2748_v33 = vrot.slane %v2747_v25, 2  ;;  %v4434_v12 = vld [vmem:[%s7164_s0 + $0x3f0] sm:$0xff] }
  0xaf   :  { %4396 = vmatmul.msk.f32.vlgmr.msrb.gmra.mxu1 %vm898_vm7, %v4995_v23  ;;  %v4458_v23 = vld [vmem:[%s7164_s0 + $0x4b0] sm:$0xff]  ;;  %v2819_v34 = vmax.f32 %v4488_v17, %v2818_v26  ;;  %v2854_v35 = vrot.slane %v4494_v22, 4  ;;  %v2606_v37 = vrot.slane %v2605_v28, 1  ;;  %v2316_v59 = vrot.slane %v2315_v27, 2 }
  0xb0   :  { %v2638_v1 = vrot.slane %v4458_v23, 4  ;;  %v2713_v39 = vmax.f32 %v2711_v20, %v2712_v30  ;;  %v2784_v40 = vrot.slane %v2783_v31, 2  ;;  %v2678_v41 = vrot.slane %v2677_v32, 1 }
  0xb1   :  { %v2749_v42 = vmax.f32 %v2747_v25, %v2748_v33  ;;  %v2820_v43 = vrot.slane %v2819_v34, 2  ;;  %v2855_v44 = vmax.f32 %v4494_v22, %v2854_v35  ;;  %v2607_v48 = vmax.f32 %v2605_v28, %v2606_v37  ;;  %v4440_v33 = vld [vmem:[%s7164_s0 + $0x420] sm:$0xff] }
  0xb2   :  { %v2639_v8 = vmax.f32 %v4458_v23, %v2638_v1  ;;  %v2714_v50 = vrot.slane %v2713_v39, 1  ;;  %v2785_v51 = vmax.f32 %v2783_v31, %v2784_v40  ;;  %v2679_v52 = vmax.f32 %v2677_v32, %v2678_v41  ;;  %v5271_v1 = vld [vmem:[%s7165_s1 + $0xd8] sm:$0x3f] }
  0xb3   :  { %v2750_v53 = vrot.slane %v2749_v42, 1  ;;  %v2821_v54 = vmax.f32 %v2819_v34, %v2820_v43  ;;  %v2856_v55 = vrot.slane %v2855_v44, 2  ;;  %v2317_v6 = vmax.f32 %v2315_v27, %v2316_v59  ;;  %1102 = vmatpush.xpose.msra.mxu1 %v5271_v1  ;;  %v4446_v34 = vld [vmem:[%s7164_s0 + $0x450] sm:$0xff] }
  0xb4   :  { %v2640_v19 = vrot.slane %v2639_v8, 2  ;;  %v2715_v56 = vmax.f32 %v2713_v39, %v2714_v50  ;;  %v2786_v57 = vrot.slane %v2785_v51, 1  ;;  %v2351_v7 = vmax.f32 %v5230_v5, %v2350_v15 }
  0xb5   :  { %v2751_v60 = vmax.f32 %v2749_v42, %v2750_v53  ;;  %v2822_v62 = vrot.slane %v2821_v54, 1  ;;  %v2857_v23 = vmax.f32 %v2855_v44, %v2856_v55  ;;  %v2387_v13 = vmax.f32 %v5238_v10, %v2386_v16  ;;  %v4461_v53 = vld [vmem:[%s7164_s0 + $0x4c8] sm:$0xff] }
  0xb6   :  { %v2641_v29 = vmax.f32 %v2639_v8, %v2640_v19  ;;  %v2787_v2 = vmax.f32 %v2785_v51, %v2786_v57  ;;  %v2318_v19 = vrot.slane %v2317_v6, 1  ;;  %v2352_v20 = vrot.slane %v2351_v7, 2 }
  0xb7   :  { %v2823_v8 = vmax.f32 %v2821_v54, %v2822_v62  ;;  %v2858_v9 = vrot.slane %v2857_v23, 1  ;;  %v2422_v21 = vrot.slane %v4422_v0, 4  ;;  %v2388_v22 = vrot.slane %v2387_v13, 2 }
  0xb8   :  { %v2642_v38 = vrot.slane %v2641_v29, 1  ;;  %v2458_v24 = vrot.slane %v4428_v4, 4  ;;  %v2319_v26 = vmax.f32 %v2317_v6, %v2318_v19  ;;  %v2353_v27 = vmax.f32 %v2351_v7, %v2352_v20  ;;  %v4473_v20 = vld [vmem:[%s7164_s0 + $0x528] sm:$0xff] }
  0xb9   :  { %v2859_v5 = vmax.f32 %v2857_v23, %v2858_v9  ;;  %v2423_v28 = vmax.f32 %v4422_v0, %v2422_v21  ;;  %v2389_v36 = vmax.f32 %v2387_v13, %v2388_v22  ;;  %v2530_v51 = vrot.slane %v4440_v33, 4  ;;  %v4479_v21 = vld [vmem:[%s7164_s0 + $0x558] sm:$0xff] }
  0xba   :  { %v2643_v49 = vmax.f32 %v2641_v29, %v2642_v38  ;;  %v2494_v29 = vrot.slane %v4434_v12, 4  ;;  %v2354_v35 = vrot.slane %v2353_v27, 1  ;;  %v2459_v38 = vmax.f32 %v4428_v4, %v2458_v24 }
  0xbb   :  { %v2424_v37 = vrot.slane %v2423_v28, 2  ;;  %v2390_v44 = vrot.slane %v2389_v36, 1  ;;  %v2531_v59 = vmax.f32 %v4440_v33, %v2530_v51  ;;  %v2728_v33 = vrot.slane %v4473_v20, 4 }
  0xbc   :  { %v3028_v58 = vsel %vm795_vm0, %v2643_v49, %v2607_v48  ;;  %v2355_v43 = vmax.f32 %v2353_v27, %v2354_v35  ;;  %v2460_v46 = vrot.slane %v2459_v38, 2  ;;  %v4455_v48 = vld [vmem:[%s7164_s0 + $0x498] sm:$0xff]  ;;  %v2495_v50 = vmax.f32 %v4434_v12, %v2494_v29 }
  0xbd   :  { %v3029_v63 = vsel %vm797_vm1, %v2679_v52, %v3028_v58  ;;  %v2566_v52 = vrot.slane %v4446_v34, 4  ;;  %v2391_v54 = vmax.f32 %v2389_v36, %v2390_v44  ;;  %v2620_v62 = vrot.slane %v4455_v48, 4 }
  0xbe   :  { %v3030_v3 = vsel %vm7174_vm2, %v2715_v56, %v3029_v63  ;;  %v2461_v56 = vmax.f32 %v2459_v38, %v2460_v46  ;;  %v2986_v57 = vsel %vm795_vm0, %v2355_v43, %v2319_v26  ;;  %v2496_v58 = vrot.slane %v2495_v50, 2 }
  0xbf   :  { %v3031_v11 = vsel %vm7173_vm3, %v2751_v60, %v3030_v3  ;;  %v2567_v60 = vmax.f32 %v4446_v34, %v2566_v52  ;;  %v2987_v0 = vsel %vm797_vm1, %v2391_v54, %v2986_v57  ;;  %v2532_v6 = vrot.slane %v2531_v59, 2 }
  0xc0   :  { %v3032_v18 = vsel %vm7172_vm4, %v2787_v2, %v3031_v11  ;;  %v2462_v63 = vrot.slane %v2461_v56, 1  ;;  %v2656_v2 = vrot.slane %v4461_v53, 4  ;;  %v2497_v4 = vmax.f32 %v2495_v50, %v2496_v58  ;;  %v4413_v58 = vld [vmem:[%s7164_s0 + $0x348] sm:$0xff] }
  0xc1   :  { %v3033_v15 = vsel %vm7171_vm5, %v2823_v8, %v3032_v18  ;;  %v2568_v7 = vrot.slane %v2567_v60, 2  ;;  %v4467_v8 = vld [vmem:[%s7164_s0 + $0x4f8] sm:$0xff]  ;;  %v2621_v9 = vmax.f32 %v4455_v48, %v2620_v62  ;;  %v2533_v18 = vmax.f32 %v2531_v59, %v2532_v6 }
  0xc2   :  { %v3034_v31 = vsel %vm7170_vm6, %v2859_v5, %v3033_v15  ;;  %v2463_v12 = vmax.f32 %v2461_v56, %v2462_v63  ;;  %v2692_v26 = vrot.slane %v4467_v8, 4  ;;  %v2764_v34 = vrot.slane %v4479_v21, 4 }
  0xc3   :  { %v2569_v19 = vmax.f32 %v2567_v60, %v2568_v7  ;;  %v2622_v5 = vrot.slane %v2621_v9, 2  ;;  %vm7169_vm8 = vcmask 1043456   ;;  %vm7168_vm9 = vcmask 31744  }
  0xc4   :  { %v2765_v43 = vmax.f32 %v4479_v21, %v2764_v34  ;;  %vm7167_vm10 = vcmask 44032  }
  0xc5   :  { %v2570_v29 = vrot.slane %v2569_v19, 1 }
  0xc6   :  { %v2766_v54 = vrot.slane %v2765_v43, 2 }
  0xc7   :  { %v2571_v36 = vmax.f32 %v2569_v19, %v2570_v29  ;;  %v4431_v29 = vld [vmem:[%s7164_s0 + $0x3d8] sm:$0xff] }
  0xc8   :  { %v2767_v63 = vmax.f32 %v2765_v43, %v2766_v54  ;;  %v2476_v43 = vrot.slane %v4431_v29, 4 }
  0xcd   :  { %v918_v14 = vpop.f32.mrf.mxu0  ;;  %v938_v17 = vpop.f32.mrf.mxu1 }
  0xe0   :  { %v958_v45 = vpop.f32.mrf.mxu3 }
 0x115   :  { %v5286_v25 = vpop.permute.xlu0 %696 }
 0x116   :  { %v919_v10 = vadd.f32 %v918_v14, %v5286_v25  ;;  %v939_v16 = vadd.f32 %v938_v17, %v5286_v25  ;;  %v959_v30 = vadd.f32 %v958_v45, %v5286_v25  ;;  %v2425_v45 = vmax.f32 %v2423_v28, %v2424_v37 }
 0x117   :  { %v978_v32 = vpop.f32.mrf.mxu3  ;;  %v2657_v14 = vmax.f32 %v4461_v53, %v2656_v2  ;;  %v2498_v17 = vrot.slane %v2497_v4, 1  ;;  %v2534_v28 = vrot.slane %v2533_v18, 1 }
 0x118   :  { %v1021_v39 = vmax.f32 %v919_v10, 0.0  ;;  %v1022_v40 = vmax.f32 %v939_v16, 0.0  ;;  %v1023_v41 = vmax.f32 %v959_v30, 0.0  ;;  %v979_v42 = vadd.f32 %v978_v32, %v5286_v25  ;;  %v4485_v16 = vld [vmem:[%s7164_s0 + $0x588] sm:$0xff]  ;;  %v4491_v30 = vld [vmem:[%s7164_s0 + $0x5b8] sm:$0xff] }
 0x119   :  { %v2426_v55 = vrot.slane %v2425_v45, 1  ;;  %v2658_v24 = vrot.slane %v2657_v14, 2  ;;  %v2499_v27 = vmax.f32 %v2497_v4, %v2498_v17  ;;  %v2623_v10 = vmax.f32 %v2621_v9, %v2622_v5 }
 0x11a   :  { %1043 = vmatmul.f32.vlgmr.msra.gmra.mxu2 %v1021_v39  ;;  %1063 = vmatmul.f32.vlgmr.msra.gmra.mxu3 %v1022_v40  ;;  %v1024_v49 = vmax.f32 %v979_v42, 0.0  ;;  %v2693_v32 = vmax.f32 %v4467_v8, %v2692_v26  ;;  %v2535_v35 = vmax.f32 %v2533_v18, %v2534_v28  ;;  %v4497_v39 = vld [vmem:[%s7164_s0 + $0x5e8] sm:$0xff]  ;;  %v2729_v42 = vmax.f32 %v4473_v20, %v2728_v33 }
 0x11b   :  { %1083 = vmatmul.f32.vlgmr.msra.gmra.mxu0 %v1023_v41  ;;  %3096 = vmatpush.msra.mxu3 %v3034_v31  ;;  %v2427_v23 = vmax.f32 %v2425_v45, %v2426_v55  ;;  %v2659_v31 = vmax.f32 %v2657_v14, %v2658_v24  ;;  %v2624_v38 = vrot.slane %v2623_v10, 1  ;;  %v2800_v46 = vrot.slane %v4485_v16, 4  ;;  %v4419_v24 = vld [vmem:[%s7164_s0 + $0x378] sm:$0xff]  ;;  %v4425_v26 = vld [vmem:[%s7164_s0 + $0x3a8] sm:$0xff] }
 0x11c   :  { %1103 = vmatmul.f32.vlgmr.msra.gmra.mxu1 %v1024_v49  ;;  %v2694_v41 = vrot.slane %v2693_v32, 2  ;;  %v2836_v48 = vrot.slane %v4491_v30, 4  ;;  %v4407_v49 = vld [vmem:[%s7164_s0 + $0x318] sm:$0xff]  ;;  %v2730_v53 = vrot.slane %v2729_v42, 2  ;;  %v2872_v57 = vrot.slane %v4497_v39, 4 }
 0x11d   :  { %v2988_v13 = vsel %vm7174_vm2, %v2427_v23, %v2987_v0  ;;  %v2660_v40 = vrot.slane %v2659_v31, 1  ;;  %v2625_v45 = vmax.f32 %v2623_v10, %v2624_v38  ;;  %v2801_v55 = vmax.f32 %v4485_v16, %v2800_v46  ;;  %v4437_v10 = vld [vmem:[%s7164_s0 + $0x408] sm:$0xff] }
 0x11e   :  { %v998_v3 = vpop.f32.mrf.mxu0  ;;  %v2989_v22 = vsel %vm7173_vm3, %v2463_v12, %v2988_v13  ;;  %v2695_v52 = vmax.f32 %v2693_v32, %v2694_v41  ;;  %v2837_v56 = vmax.f32 %v4491_v30, %v2836_v48  ;;  %v2731_v60 = vmax.f32 %v2729_v42, %v2730_v53  ;;  %v4443_v41 = vld [vmem:[%s7164_s0 + $0x438] sm:$0xff]  ;;  %v4449_v42 = vld [vmem:[%s7164_s0 + $0x468] sm:$0xff] }
 0x11f   :  { %v999_v11 = vadd.f32 %v998_v3, %v5286_v25  ;;  %v2990_v37 = vsel %vm7172_vm4, %v2499_v27, %v2989_v22  ;;  %v2661_v51 = vmax.f32 %v2659_v31, %v2660_v40  ;;  %v2332_v23 = vrot.slane %v4407_v49, 4 }
 0x120   :  { %v2991_v44 = vsel %vm7171_vm5, %v2535_v35, %v2990_v37  ;;  %v2696_v59 = vrot.slane %v2695_v52, 1  ;;  %v2802_v0 = vrot.slane %v2801_v55, 2  ;;  %v2838_v2 = vrot.slane %v2837_v56, 2 }
 0x121   :  { %v1025_v15 = vmax.f32 %v999_v11, 0.0  ;;  %v2992_v50 = vsel %vm7170_vm6, %v2571_v36, %v2991_v44  ;;  %v3049_v62 = vsel %vm795_vm0, %v2661_v51, %v2625_v45  ;;  %v2873_v3 = vmax.f32 %v4497_v39, %v2872_v57 }
 0x122   :  { %3097 = vmatpush.msra.mxu3 %v2992_v50  ;;  %v2697_v4 = vmax.f32 %v2695_v52, %v2696_v59  ;;  %v2732_v6 = vrot.slane %v2731_v60, 1  ;;  %v2333_v7 = vmax.f32 %v4407_v49, %v2332_v23  ;;  %v2368_v8 = vrot.slane %v4413_v58, 4 }
 0x123   :  { %1123 = vmatmul.f32.vlgmr.msrb.gmra.mxu2 %v1025_v15  ;;  %v2768_v11 = vrot.slane %v2767_v63, 1  ;;  %v2803_v12 = vmax.f32 %v2801_v55, %v2802_v0  ;;  %v2839_v13 = vmax.f32 %v2837_v56, %v2838_v2  ;;  %v2874_v14 = vrot.slane %v2873_v3, 2 }
 0x124   :  { %v2733_v18 = vmax.f32 %v2731_v60, %v2732_v6  ;;  %v3050_v19 = vsel %vm797_vm1, %v2697_v4, %v3049_v62  ;;  %v2334_v20 = vrot.slane %v2333_v7, 2  ;;  %v2369_v30 = vmax.f32 %v4413_v58, %v2368_v8  ;;  %v5366_v6 = vld [vmem:[%s7165_s1] sm:$0xf] }
 0x125   :  { %v2769_v21 = vmax.f32 %v2767_v63, %v2768_v11  ;;  %v2804_v5 = vrot.slane %v2803_v12, 1  ;;  %v2840_v15 = vrot.slane %v2839_v13, 1  ;;  %v2875_v22 = vmax.f32 %v2873_v3, %v2874_v14 }
 0x126   :  { %v3051_v28 = vsel %vm7174_vm2, %v2733_v18, %v3050_v19  ;;  %v2335_v16 = vmax.f32 %v2333_v7, %v2334_v20  ;;  %v2370_v36 = vrot.slane %v2369_v30, 2  ;;  %v2404_v37 = vrot.slane %v4419_v24, 4 }
 0x127   :  { %v2805_v31 = vmax.f32 %v2803_v12, %v2804_v5  ;;  %v2841_v32 = vmax.f32 %v2839_v13, %v2840_v15  ;;  %v2876_v33 = vrot.slane %v2875_v22, 1  ;;  %v3052_v34 = vsel %vm7173_vm3, %v2769_v21, %v3051_v28 }
 0x128   :  { %v2336_v35 = vrot.slane %v2335_v16, 1  ;;  %v2440_v38 = vrot.slane %v4425_v26, 4  ;;  %v2512_v44 = vrot.slane %v4437_v10, 4  ;;  %v2371_v46 = vmax.f32 %v2369_v30, %v2370_v36 }
 0x129   :  { %v2877_v39 = vmax.f32 %v2875_v22, %v2876_v33  ;;  %v3053_v40 = vsel %vm7172_vm4, %v2805_v31, %v3052_v34  ;;  %v2405_v48 = vmax.f32 %v4419_v24, %v2404_v37  ;;  %v2477_v51 = vmax.f32 %v4431_v29, %v2476_v43  ;;  %v4454_v31 = vld [vmem:[%s7164_s0 + $0x490] sm:$0xff] }
 0x12a   :  { %v3054_v45 = vsel %vm7171_vm5, %v2841_v32, %v3053_v40  ;;  %v2441_v50 = vmax.f32 %v4425_v26, %v2440_v38  ;;  %v2513_v52 = vmax.f32 %v4437_v10, %v2512_v44  ;;  %v2372_v53 = vrot.slane %v2371_v46, 1  ;;  %v4460_v32 = vld [vmem:[%s7164_s0 + $0x4c0] sm:$0xff]  ;;  %v4466_v33 = vld [vmem:[%s7164_s0 + $0x4f0] sm:$0xff] }
 0x12b   :  { %v3055_v49 = vsel %vm7170_vm6, %v2877_v39, %v3054_v45  ;;  %v2406_v54 = vrot.slane %v2405_v48, 2  ;;  %v2548_v55 = vrot.slane %v4443_v41, 4  ;;  %v2584_v56 = vrot.slane %v4449_v42, 4  ;;  %v4478_v37 = vld [vmem:[%s7164_s0 + $0x550] sm:$0xff] }
 0x12c   :  { %v1018_v9 = vpop.f32.mrf.mxu1  ;;  %v2337_v57 = vmax.f32 %v2335_v16, %v2336_v35  ;;  %v2442_v58 = vrot.slane %v2441_v50, 2  ;;  %v2478_v59 = vrot.slane %v2477_v51, 2  ;;  %v2514_v60 = vrot.slane %v2513_v52, 2  ;;  %v5408_v45 = vld [vmem:[%s7164_s0 + $0x370] sm:$0xff] }
 0x12d   :  { %v1019_v17 = vadd.f32 %v1018_v9, %v5286_v25  ;;  %v2373_v62 = vmax.f32 %v2371_v46, %v2372_v53  ;;  %v2407_v23 = vmax.f32 %v2405_v48, %v2406_v54  ;;  %v2549_v63 = vmax.f32 %v4443_v41, %v2548_v55  ;;  %v4412_v41 = vld [vmem:[%s7164_s0 + $0x340] sm:$0xff]  ;;  %v4490_v48 = vld [vmem:[%s7164_s0 + $0x5b0] sm:$0xff] }
 0x12e   :  { %v2585_v0 = vmax.f32 %v4449_v42, %v2584_v56  ;;  %v2443_v2 = vmax.f32 %v2441_v50, %v2442_v58  ;;  %v2479_v3 = vmax.f32 %v2477_v51, %v2478_v59  ;;  %v2515_v4 = vmax.f32 %v2513_v52, %v2514_v60  ;;  %v4484_v42 = vld [vmem:[%s7164_s0 + $0x580] sm:$0xff] }
 0x12f   :  { %v1026_v27 = vmax.f32 %v1019_v17, 0.0  ;;  %v2408_v7 = vrot.slane %v2407_v23, 1  ;;  %v2550_v8 = vrot.slane %v2549_v63, 2  ;;  %v3007_v14 = vsel %vm795_vm0, %v2373_v62, %v2337_v57  ;;  %v4496_v57 = vld [vmem:[%s7164_s0 + $0x5e0] sm:$0xff] }
 0x130   :  { %v2586_v9 = vrot.slane %v2585_v0, 2  ;;  %v2444_v11 = vrot.slane %v2443_v2, 1  ;;  %v2480_v12 = vrot.slane %v2479_v3, 1  ;;  %v2516_v13 = vrot.slane %v2515_v4, 1 }
 0x131   :  { %1143 = vmatmul.f32.vlgmr.msrb.gmra.mxu3 %v1026_v27  ;;  %v2409_v17 = vmax.f32 %v2407_v23, %v2408_v7  ;;  %v2551_v18 = vmax.f32 %v2549_v63, %v2550_v8  ;;  %v2614_v34 = vrot.slane %v4454_v31, 4  ;;  %v2650_v35 = vrot.slane %v4460_v32, 4 }
 0x132   :  { %3156 = vmatpush.msrb.mxu3 %v3055_v49  ;;  %v2587_v19 = vmax.f32 %v2585_v0, %v2586_v9  ;;  %v2445_v20 = vmax.f32 %v2443_v2, %v2444_v11  ;;  %v2481_v21 = vmax.f32 %v2479_v3, %v2480_v12  ;;  %v2517_v5 = vmax.f32 %v2515_v4, %v2516_v13 }
 0x133   :  { %v2552_v15 = vrot.slane %v2551_v18, 1  ;;  %v3008_v24 = vsel %vm797_vm1, %v2409_v17, %v3007_v14  ;;  %v2686_v36 = vrot.slane %v4466_v33, 4  ;;  %v2615_v38 = vmax.f32 %v4454_v31, %v2614_v34 }
 0x134   :  { %v2588_v22 = vrot.slane %v2587_v19, 1  ;;  %v3009_v26 = vsel %vm7174_vm2, %v2445_v20, %v3008_v24  ;;  %v2651_v39 = vmax.f32 %v4460_v32, %v2650_v35  ;;  %v2758_v44 = vrot.slane %v4478_v37, 4 }
 0x135   :  { %v2553_v27 = vmax.f32 %v2551_v18, %v2552_v15  ;;  %v3010_v29 = vsel %vm7173_vm3, %v2481_v21, %v3009_v26  ;;  %v2687_v43 = vmax.f32 %v4466_v33, %v2686_v36  ;;  %v2616_v49 = vrot.slane %v2615_v38, 2 }
 0x136   :  { %v2589_v28 = vmax.f32 %v2587_v19, %v2588_v22  ;;  %v3011_v10 = vsel %vm7172_vm4, %v2517_v5, %v3010_v29  ;;  %v2652_v50 = vrot.slane %v2651_v39, 2  ;;  %v2794_v52 = vrot.slane %v4484_v42, 4 }
 0x137   :  { %v3012_v16 = vsel %vm7171_vm5, %v2553_v27, %v3011_v10  ;;  %v2688_v53 = vrot.slane %v2687_v43, 2  ;;  %v2759_v54 = vmax.f32 %v4478_v37, %v2758_v44  ;;  %v2830_v55 = vrot.slane %v4490_v48, 4  ;;  %v4424_v37 = vld [vmem:[%s7164_s0 + $0x3a0] sm:$0xff] }
 0x138   :  { %v3013_v30 = vsel %vm7170_vm6, %v2589_v28, %v3012_v16  ;;  %v2362_v56 = vrot.slane %v4412_v41, 4  ;;  %v2617_v58 = vmax.f32 %v2615_v38, %v2616_v49  ;;  %v2653_v59 = vmax.f32 %v2651_v39, %v2652_v50  ;;  %v4442_v50 = vld [vmem:[%s7164_s0 + $0x430] sm:$0xff] }
 0x139   :  { %4500 = vmatmul.msk.f32.vlgmr.msra.gmra.mxu3 %vm898_vm7, %v5366_v6  ;;  %v2398_v62 = vrot.slane %v5408_v45, 4  ;;  %v2689_v23 = vmax.f32 %v2687_v43, %v2688_v53  ;;  %v2760_v63 = vrot.slane %v2759_v54, 2  ;;  %v2795_v0 = vmax.f32 %v4484_v42, %v2794_v52  ;;  %v4430_v42 = vld [vmem:[%s7164_s0 + $0x3d0] sm:$0xff] }
 0x13a   :  { %3157 = vmatpush.msrb.mxu3 %v3013_v30  ;;  %v2618_v3 = vrot.slane %v2617_v58, 1  ;;  %v2654_v4 = vrot.slane %v2653_v59, 1  ;;  %v2831_v8 = vmax.f32 %v4490_v48, %v2830_v55  ;;  %v2866_v13 = vrot.slane %v4496_v57, 4 }
 0x13b   :  { %v2690_v9 = vrot.slane %v2689_v23, 1  ;;  %v2761_v11 = vmax.f32 %v2759_v54, %v2760_v63  ;;  %v2796_v12 = vrot.slane %v2795_v0, 2  ;;  %v2363_v35 = vmax.f32 %v4412_v41, %v2362_v56  ;;  %v4436_v41 = vld [vmem:[%s7164_s0 + $0x400] sm:$0xff] }
 0x13c   :  { %3243 = vmatpush.xpose.msra.mxu3 %v5209_v61  ;;  %v4472_v61 = vld [vmem:[%s7164_s0 + $0x520] sm:$0xff]  ;;  %v2619_v14 = vmax.f32 %v2617_v58, %v2618_v3  ;;  %v2655_v17 = vmax.f32 %v2653_v59, %v2654_v4  ;;  %v2832_v19 = vrot.slane %v2831_v8, 2  ;;  %v2867_v15 = vmax.f32 %v4496_v57, %v2866_v13 }
 0x13d   :  { %v2722_v40 = vrot.slane %v4472_v61, 4  ;;  %v2691_v20 = vmax.f32 %v2689_v23, %v2690_v9  ;;  %v2762_v21 = vrot.slane %v2761_v11, 1  ;;  %v2797_v5 = vmax.f32 %v2795_v0, %v2796_v12 }
 0x13e   :  { %v2833_v27 = vmax.f32 %v2831_v8, %v2832_v19  ;;  %v3042_v28 = vsel %vm795_vm0, %v2655_v17, %v2619_v14  ;;  %v2868_v31 = vrot.slane %v2867_v15, 2  ;;  %v2364_v44 = vrot.slane %v2363_v35, 2 }
 0x13f   :  { %v2723_v51 = vmax.f32 %v4472_v61, %v2722_v40  ;;  %v2763_v16 = vmax.f32 %v2761_v11, %v2762_v21  ;;  %v2798_v30 = vrot.slane %v2797_v5, 1  ;;  %v3043_v33 = vsel %vm797_vm1, %v2691_v20, %v3042_v28  ;;  %v4463_v20 = vld [vmem:[%s7164_s0 + $0x4d8] sm:$0xff] }
 0x140   :  { %v2834_v32 = vrot.slane %v2833_v27, 1  ;;  %v2869_v36 = vmax.f32 %v2867_v15, %v2868_v31  ;;  %v2399_v52 = vmax.f32 %v5408_v45, %v2398_v62  ;;  %v2365_v56 = vmax.f32 %v2363_v35, %v2364_v44  ;;  %v4457_v45 = vld [vmem:[%s7164_s0 + $0x4a8] sm:$0xff] }
 0x141   :  { %4503 = vmatmul.msk.f32.vlgmr.msrb.gmra.mxu3 %vm898_vm7, %v5366_v6  ;;  %v2724_v60 = vrot.slane %v2723_v51, 2  ;;  %v2799_v61 = vmax.f32 %v2797_v5, %v2798_v30  ;;  %v2434_v57 = vrot.slane %v4424_v37, 4  ;;  %v2506_v23 = vrot.slane %v4436_v41, 4 }
 0x142   :  { %3323 = vmatpush.xpose.msrb.mxu3 %v5260_v47  ;;  %v4406_v47 = vld [vmem:[%s7164_s0 + $0x310] sm:$0xff]  ;;  %v2835_v39 = vmax.f32 %v2833_v27, %v2834_v32  ;;  %v2870_v48 = vrot.slane %v2869_v36, 1  ;;  %v2400_v59 = vrot.slane %v2399_v52, 2  ;;  %v2366_v63 = vrot.slane %v2365_v56, 1 }
 0x143   :  { %v2326_v46 = vrot.slane %v4406_v47, 4  ;;  %v2725_v7 = vmax.f32 %v2723_v51, %v2724_v60  ;;  %v4448_v51 = vld [vmem:[%s7164_s0 + $0x460] sm:$0xff]  ;;  %v2470_v60 = vrot.slane %v4430_v42, 4  ;;  %v2435_v0 = vmax.f32 %v4424_v37, %v2434_v57  ;;  %v4493_v57 = vld [vmem:[%s7164_s0 + $0x5c8] sm:$0xff] }
 0x144   :  { %v2871_v58 = vmax.f32 %v2869_v36, %v2870_v48  ;;  %v2578_v3 = vrot.slane %v4448_v51, 4  ;;  %v2507_v9 = vmax.f32 %v4436_v41, %v2506_v23  ;;  %v2367_v11 = vmax.f32 %v2365_v56, %v2366_v63  ;;  %v4481_v41 = vld [vmem:[%s7164_s0 + $0x568] sm:$0xff]  ;;  %v4499_v63 = vld [vmem:[%s7164_s0 + $0x5f8] sm:$0xff] }
 0x145   :  { %v2327_v2 = vmax.f32 %v4406_v47, %v2326_v46  ;;  %v2726_v18 = vrot.slane %v2725_v7, 1  ;;  %v2471_v8 = vmax.f32 %v4430_v42, %v2470_v60  ;;  %v2436_v12 = vrot.slane %v2435_v0, 2 }
 0x146   :  { %v2579_v19 = vmax.f32 %v4448_v51, %v2578_v3  ;;  %v2668_v31 = vrot.slane %v4463_v20, 4  ;;  %v2776_v60 = vrot.slane %v4481_v41, 4 }
 0x147   :  { %v2727_v26 = vmax.f32 %v2725_v7, %v2726_v18  ;;  %v2328_v29 = vrot.slane %v2327_v2, 2  ;;  %v2401_v7 = vmax.f32 %v2399_v52, %v2400_v59  ;;  %v2472_v17 = vrot.slane %v2471_v8, 2 }
 0x148   :  { %v2508_v18 = vrot.slane %v2507_v9, 2  ;;  %v2437_v21 = vmax.f32 %v2435_v0, %v2436_v12  ;;  %v2580_v28 = vrot.slane %v2579_v19, 2 }
 0x149   :  { %v2329_v34 = vmax.f32 %v2327_v2, %v2328_v29  ;;  %v3044_v47 = vsel %vm7174_vm2, %v2727_v26, %v3043_v33  ;;  %v2542_v2 = vrot.slane %v4442_v50, 4  ;;  %v2402_v14 = vrot.slane %v2401_v7, 1 }
 0x14a   :  { %v3045_v40 = vsel %vm7173_vm3, %v2763_v16, %v3044_v47  ;;  %v2473_v26 = vmax.f32 %v2471_v8, %v2472_v17  ;;  %v2509_v27 = vmax.f32 %v2507_v9, %v2508_v18  ;;  %v2438_v29 = vrot.slane %v2437_v21, 1  ;;  %v4469_v16 = vld [vmem:[%s7164_s0 + $0x508] sm:$0xff]  ;;  %v4475_v47 = vld [vmem:[%s7164_s0 + $0x538] sm:$0xff] }
 0x14b   :  { %v2330_v43 = vrot.slane %v2329_v34, 1  ;;  %v3046_v49 = vsel %vm7172_vm4, %v2799_v61, %v3045_v40  ;;  %v2543_v13 = vmax.f32 %v4442_v50, %v2542_v2  ;;  %v2777_v9 = vmax.f32 %v4481_v41, %v2776_v60  ;;  %v4409_v17 = vld [vmem:[%s7164_s0 + $0x328] sm:$0xff] }
 0x14c   :  { %v3047_v54 = vsel %vm7171_vm5, %v2835_v39, %v3046_v49  ;;  %v2474_v32 = vrot.slane %v2473_v26, 1  ;;  %v2510_v33 = vrot.slane %v2509_v27, 1  ;;  %v2439_v61 = vmax.f32 %v2437_v21, %v2438_v29  ;;  %v4487_v49 = vld [vmem:[%s7164_s0 + $0x598] sm:$0xff] }
 0x14d   :  { %v2331_v55 = vmax.f32 %v2329_v34, %v2330_v43  ;;  %v5443_v62 = vsel %vm7170_vm6, %v2871_v58, %v3047_v54  ;;  %v2544_v5 = vrot.slane %v2543_v13, 2  ;;  %v2581_v34 = vmax.f32 %v2579_v19, %v2580_v28 }
 0x14e   :  { %v2475_v39 = vmax.f32 %v2473_v26, %v2474_v32  ;;  %v2511_v40 = vmax.f32 %v2509_v27, %v2510_v33  ;;  %v2704_v43 = vrot.slane %v4469_v16, 4  ;;  %v2812_v3 = vrot.slane %v4487_v49, 4  ;;  %v4415_v33 = vld [vmem:[%s7164_s0 + $0x358] sm:$0xff] }
 0x14f   :  { %v3000_v15 = vsel %vm795_vm0, %v2367_v11, %v2331_v55  ;;  %v2582_v42 = vrot.slane %v2581_v34, 1  ;;  %v2740_v55 = vrot.slane %v4475_v47, 4  ;;  %v2884_v21 = vrot.slane %v4499_v63, 4 }
 0x150   :  { %v2705_v54 = vmax.f32 %v4469_v16, %v2704_v43 }
 0x151   :  { %v2583_v23 = vmax.f32 %v2581_v34, %v2582_v42  ;;  %v2741_v2 = vmax.f32 %v4475_v47, %v2740_v55  ;;  %v2885_v29 = vmax.f32 %v4499_v63, %v2884_v21 }
 0x152   :  { %v2706_v0 = vrot.slane %v2705_v54, 2 }
 0x153   :  { %v2742_v12 = vrot.slane %v2741_v2, 2 }
 0x154   :  { %v2707_v11 = vmax.f32 %v2705_v54, %v2706_v0 }
 0x198   :  { %v1084_v38 = vpop.f32.mrf.mxu0 }
 0x199   :  { %v1104_v53 = vpop.f32.mrf.mxu1 }
 0x19d   :  { %v1044_v22 = vpop.f32.mrf.mxu2  ;;  %v1064_v24 = vpop.f32.mrf.mxu3 }
 0x19e   :  { %v1065_v10 = vadd.f32 %v1064_v24, %v1044_v22  ;;  %v2632_v22 = vrot.slane %v4457_v45, 4  ;;  %v2403_v24 = vmax.f32 %v2401_v7, %v2402_v14  ;;  %v2848_v14 = vrot.slane %v4493_v57, 4 }
 0x1a0   :  { %v1085_v46 = vadd.f32 %v1084_v38, %v1065_v10  ;;  %v2545_v10 = vmax.f32 %v2543_v13, %v2544_v5  ;;  %v2633_v30 = vmax.f32 %v4457_v45, %v2632_v22  ;;  %v3001_v35 = vsel %vm797_vm1, %v2403_v24, %v3000_v15  ;;  %v13_v5 = vld [vmem:[%s7165_s1 + $0x30] sm:$0xff] }
 0x1a1   :  { %v2669_v38 = vmax.f32 %v4463_v20, %v2668_v31  ;;  %v3002_v48 = vsel %vm7174_vm2, %v2439_v61, %v3001_v35  ;;  %v2813_v13 = vmax.f32 %v4487_v49, %v2812_v3  ;;  %v2778_v20 = vrot.slane %v2777_v9, 2  ;;  %v4451_v3 = vld [vmem:[%s7164_s0 + $0x478] sm:$0xff] }
 0x1a2   :  { %v1105_v4 = vadd.f32 %v1104_v53, %v1085_v46  ;;  %v2546_v36 = vrot.slane %v2545_v10, 1  ;;  %v2634_v37 = vrot.slane %v2633_v30, 2  ;;  %v3003_v53 = vsel %vm7173_vm3, %v2475_v39, %v3002_v48 }
 0x1a3   :  { %v2670_v51 = vrot.slane %v2669_v38, 2  ;;  %v3004_v56 = vsel %vm7172_vm4, %v2511_v40, %v3003_v53  ;;  %v2708_v15 = vrot.slane %v2707_v11, 1  ;;  %v2743_v22 = vmax.f32 %v2741_v2, %v2742_v12  ;;  %v4433_v53 = vld [vmem:[%s7164_s0 + $0x3e8] sm:$0xff] }
 0x1a4   :  { %v2547_v46 = vmax.f32 %v2545_v10, %v2546_v36  ;;  %v2635_v50 = vmax.f32 %v2633_v30, %v2634_v37  ;;  %v2814_v24 = vrot.slane %v2813_v13, 2  ;;  %v2849_v26 = vmax.f32 %v4493_v57, %v2848_v14  ;;  %v4421_v36 = vld [vmem:[%s7164_s0 + $0x388] sm:$0xff]  ;;  %v4439_v57 = vld [vmem:[%s7164_s0 + $0x418] sm:$0xff] }
 0x1a5   :  { %v2671_v59 = vmax.f32 %v2669_v38, %v2670_v51  ;;  %v2779_v28 = vmax.f32 %v2777_v9, %v2778_v20  ;;  %v2344_v10 = vrot.slane %v4409_v17, 4  ;;  %v2709_v16 = vmax.f32 %v2707_v11, %v2708_v15 }
 0x1a6   :  { %v1124_v44 = vpop.f32.mrf.mxu2  ;;  %v2636_v58 = vrot.slane %v2635_v50, 1  ;;  %v2744_v30 = vrot.slane %v2743_v22, 1  ;;  %v2815_v31 = vmax.f32 %v2813_v13, %v2814_v24  ;;  %v2850_v32 = vrot.slane %v2849_v26, 2 }
 0x1a7   :  { %v1125_v52 = vadd.f32 %v1124_v44, %v1105_v4  ;;  %v3005_v4 = vsel %vm7171_vm5, %v2547_v46, %v3004_v56  ;;  %v2672_v8 = vrot.slane %v2671_v59, 1  ;;  %v2780_v34 = vrot.slane %v2779_v28, 1 }
 0x1a8   :  { %v2637_v7 = vmax.f32 %v2635_v50, %v2636_v58  ;;  %v3006_v27 = vsel %vm7170_vm6, %v2583_v23, %v3005_v4  ;;  %v2886_v35 = vrot.slane %v2885_v29, 2  ;;  %v2345_v47 = vmax.f32 %v4409_v17, %v2344_v10  ;;  %v4427_v50 = vld [vmem:[%s7164_s0 + $0x3b8] sm:$0xff]  ;;  %v4445_v23 = vld [vmem:[%s7164_s0 + $0x448] sm:$0xff] }
 0x1a9   :  { %v2673_v19 = vmax.f32 %v2671_v59, %v2672_v8  ;;  %v2745_v37 = vmax.f32 %v2743_v22, %v2744_v30  ;;  %v2816_v38 = vrot.slane %v2815_v31, 1  ;;  %v2851_v39 = vmax.f32 %v2849_v26, %v2850_v32 }
 0x1aa   :  { %v2781_v42 = vmax.f32 %v2779_v28, %v2780_v34  ;;  %v2887_v41 = vmax.f32 %v2885_v29, %v2886_v35  ;;  %v2346_v43 = vrot.slane %v2345_v47, 2  ;;  %v2380_v44 = vrot.slane %v4415_v33, 4 }
 0x1ab   :  { %v3063_v61 = vsel %vm795_vm0, %v2673_v19, %v2637_v7  ;;  %v2817_v46 = vmax.f32 %v2815_v31, %v2816_v38  ;;  %v2852_v48 = vrot.slane %v2851_v39, 1  ;;  %v2416_v51 = vrot.slane %v4421_v36, 4 }
 0x1ac   :  { %v3064_v40 = vsel %vm797_vm1, %v2709_v16, %v3063_v61  ;;  %v2347_v54 = vmax.f32 %v2345_v47, %v2346_v43  ;;  %v2381_v58 = vmax.f32 %v4415_v33, %v2380_v44  ;;  %v2452_v0 = vrot.slane %v4427_v50, 4 }
 0x1ad   :  { %v3065_v49 = vsel %vm7174_vm2, %v2745_v37, %v3064_v40  ;;  %v2853_v55 = vmax.f32 %v2851_v39, %v2852_v48  ;;  %v2417_v59 = vmax.f32 %v4421_v36, %v2416_v51  ;;  %v2488_v8 = vrot.slane %v4433_v53, 4 }
 0x1ae   :  { %v2348_v63 = vrot.slane %v2347_v54, 1  ;;  %v2382_v4 = vrot.slane %v2381_v58, 2  ;;  %v2524_v11 = vrot.slane %v4439_v57, 4  ;;  %v2560_v17 = vrot.slane %v4445_v23, 4 }
 0x1af   :  { %v2418_v7 = vrot.slane %v2417_v59, 2  ;;  %v2489_v14 = vmax.f32 %v4433_v53, %v2488_v8 }
 0x1b0   :  { %v2383_v12 = vmax.f32 %v2381_v58, %v2382_v4  ;;  %v2349_v19 = vmax.f32 %v2347_v54, %v2348_v63  ;;  %v2525_v21 = vmax.f32 %v4439_v57, %v2524_v11  ;;  %v2561_v26 = vmax.f32 %v4445_v23, %v2560_v17  ;;  %v4459_v57 = vld [vmem:[%s7164_s0 + $0x4b8] sm:$0xff]  ;;  %v4465_v58 = vld [vmem:[%s7164_s0 + $0x4e8] sm:$0xff] }
 0x1b1   :  { %v2419_v13 = vmax.f32 %v2417_v59, %v2418_v7  ;;  %v2490_v24 = vrot.slane %v2489_v14, 2  ;;  %v4405_v23 = vld [vmem:[%s7164_s0 + $0x308] sm:$0xff]  ;;  %v4411_v4 = vld [vmem:[%s7164_s0 + $0x338] sm:$0xff] }
 0x1b2   :  { %v2384_v15 = vrot.slane %v2383_v12, 1  ;;  %v2526_v28 = vrot.slane %v2525_v21, 2  ;;  %v2562_v32 = vrot.slane %v2561_v26, 2  ;;  %v4477_v63 = vld [vmem:[%s7164_s0 + $0x548] sm:$0xff]  ;;  %v4483_v7 = vld [vmem:[%s7164_s0 + $0x578] sm:$0xff] }
 0x1b3   :  { %v2420_v22 = vrot.slane %v2419_v13, 1  ;;  %v2491_v31 = vmax.f32 %v2489_v14, %v2490_v24  ;;  %v4489_v11 = vld [vmem:[%s7164_s0 + $0x5a8] sm:$0xff]  ;;  %v2788_v17 = vrot.slane %v4483_v7, 4 }
 0x1b4   :  { %v1144_v45 = vpop.f32.mrf.mxu3  ;;  %v2385_v16 = vmax.f32 %v2383_v12, %v2384_v15  ;;  %v2527_v34 = vmax.f32 %v2525_v21, %v2526_v28  ;;  %v2563_v36 = vmax.f32 %v2561_v26, %v2562_v32  ;;  %v2356_v15 = vrot.slane %v4411_v4, 4 }
 0x1b5   :  { %v5475_v18 = vadd.f32 %v1144_v45, %v1125_v52  ;;  %v3066_v52 = vsel %vm7173_vm3, %v2781_v42, %v3065_v49  ;;  %v2453_v45 = vmax.f32 %v4427_v50, %v2452_v0  ;;  %v2421_v30 = vmax.f32 %v2419_v13, %v2420_v22 }
 0x1b6   :  { %v3067_v56 = vsel %vm7172_vm4, %v2817_v46, %v3066_v52  ;;  %v2492_v61 = vrot.slane %v2491_v31, 1  ;;  %v3021_v47 = vsel %vm795_vm0, %v2385_v16, %v2349_v19  ;;  %v2528_v38 = vrot.slane %v2527_v34, 1  ;;  %v4495_v19 = vld [vmem:[%s7164_s0 + $0x5d8] sm:$0xff] }
 0x1b7   :  { %1147 = vxpose.xlu0.b32.start.end [1/1] (short) (narrow) %v5475_v18, 8  ;;  %4397 = vmatpush.msk.msrb.mxu0 %vm7169_vm8, %v5475_v18  ;;  %v3068_v2 = vsel %vm7171_vm5, %v2853_v55, %v3067_v56  ;;  %v2454_v20 = vrot.slane %v2453_v45, 2  ;;  %v3022_v40 = vsel %vm797_vm1, %v2421_v30, %v3021_v47  ;;  %v4453_v56 = vld [vmem:[%s7164_s0 + $0x488] sm:$0xff] }
 0x1b8   :  { %4399 = vmatpush.msk.msrb.mxu1 %vm7169_vm8, %v5475_v18  ;;  %v2493_v42 = vmax.f32 %v2491_v31, %v2492_v61  ;;  %v2529_v43 = vmax.f32 %v2527_v34, %v2528_v38  ;;  %v2608_v59 = vrot.slane %v4453_v56, 4  ;;  %v4417_v30 = vld [vmem:[%s7164_s0 + $0x368] sm:$0xff] }
 0x1b9   :  { %4400 = vmatmul.msk.f32.vlgmr.msrb.gmra.mxu1 %vm7168_vm9, %v13_v5  ;;  %v2596_v5 = vrot.slane %v4451_v3, 4 }
 0x1ba   :  { %3136 = vmatpush.msra.mxu1 %v5443_v62  ;;  %v2888_v62 = vrot.slane %v2887_v41, 1  ;;  %v2609_v0 = vmax.f32 %v4453_v56, %v2608_v59  ;;  %v4435_v59 = vld [vmem:[%s7164_s0 + $0x3f8] sm:$0xff] }
 0x1bb   :  { %v2597_v29 = vmax.f32 %v4451_v3, %v2596_v5  ;;  %v2824_v5 = vrot.slane %v4489_v11, 4 }
 0x1bc   :  { %3137 = vmatpush.msra.mxu1 %v3006_v27  ;;  %v2889_v60 = vmax.f32 %v2887_v41, %v2888_v62  ;;  %v2455_v27 = vmax.f32 %v2453_v45, %v2454_v20  ;;  %v5518_v10 = vpop.f32.mrf.mxu3  ;;  %v2564_v41 = vrot.slane %v2563_v36, 1  ;;  %v2320_v45 = vrot.slane %v4405_v23, 4 }
 0x1bd   :  { %v2598_v35 = vrot.slane %v2597_v29, 2  ;;  %v2610_v12 = vrot.slane %v2609_v0, 2  ;;  %v2825_v16 = vmax.f32 %v4489_v11, %v2824_v5  ;;  %v4447_v11 = vld [vmem:[%s7164_s0 + $0x458] sm:$0xff] }
 0x1be   :  { %v3069_v9 = vsel %vm7170_vm6, %v2889_v60, %v3068_v2  ;;  %v2456_v33 = vrot.slane %v2455_v27, 1  ;;  %v2565_v48 = vmax.f32 %v2563_v36, %v2564_v41  ;;  %v2680_v60 = vrot.slane %v4465_v58, 4 }
 0x1bf   :  { %3196 = vmatpush.msrb.mxu1 %v3069_v9  ;;  %v2599_v39 = vmax.f32 %v2597_v29, %v2598_v35  ;;  %v2752_v9 = vrot.slane %v4477_v63, 4  ;;  %v2611_v22 = vmax.f32 %v2609_v0, %v2610_v12  ;;  %v2321_v31 = vmax.f32 %v4405_v23, %v2320_v45  ;;  %v4441_v45 = vld [vmem:[%s7164_s0 + $0x428] sm:$0xff] }
 0x1c0   :  { %v2457_v37 = vmax.f32 %v2455_v27, %v2456_v33  ;;  %v2681_v8 = vmax.f32 %v4465_v58, %v2680_v60  ;;  %v2789_v27 = vmax.f32 %v4483_v7, %v2788_v17  ;;  %v2860_v35 = vrot.slane %v4495_v19, 4  ;;  %v4429_v58 = vld [vmem:[%s7164_s0 + $0x3c8] sm:$0xff] }
 0x1c1   :  { %4502 = vmatmul.msk.f32.vlgmr.msra.gmra.mxu1 %vm898_vm7, %v5366_v6  ;;  %v2600_v44 = vrot.slane %v2599_v39, 1  ;;  %v2753_v21 = vmax.f32 %v4477_v63, %v2752_v9  ;;  %v2612_v32 = vrot.slane %v2611_v22, 1  ;;  %v2464_v12 = vrot.slane %v4429_v58, 4 }
 0x1c2   :  { %v3023_v46 = vsel %vm7174_vm2, %v2457_v37, %v3022_v40  ;;  %v2682_v20 = vrot.slane %v2681_v8, 2  ;;  %v2790_v47 = vrot.slane %v2789_v27, 2  ;;  %v2826_v37 = vrot.slane %v2825_v16, 2 }
 0x1c3   :  { %v3024_v49 = vsel %vm7173_vm3, %v2493_v42, %v3023_v46  ;;  %v2601_v50 = vmax.f32 %v2599_v39, %v2600_v44  ;;  %v2754_v29 = vrot.slane %v2753_v21, 2  ;;  %v2613_v38 = vmax.f32 %v2611_v22, %v2612_v32 }
 0x1c4   :  { %v3025_v51 = vsel %vm7172_vm4, %v2529_v43, %v3024_v49  ;;  %v3159_v53 = vpop.f32.mrf.mxu3  ;;  %v2683_v28 = vmax.f32 %v2681_v8, %v2682_v20  ;;  %v2392_v42 = vrot.slane %v4417_v30, 4  ;;  %v2791_v44 = vmax.f32 %v2789_v27, %v2790_v47 }
 0x1c5   :  { %v3026_v62 = vsel %vm7171_vm5, %v2565_v48, %v3025_v51  ;;  %v3160_v54 = vadd.f32 %v3159_v53, %v5286_v25  ;;  %v2755_v36 = vmax.f32 %v2753_v21, %v2754_v29  ;;  %v2827_v46 = vmax.f32 %v2825_v16, %v2826_v37 }
 0x1c6   :  { %v3027_v52 = vsel %vm7170_vm6, %v2601_v50, %v3026_v62  ;;  %v2684_v61 = vrot.slane %v2683_v28, 1  ;;  %v2861_v49 = vmax.f32 %v4495_v19, %v2860_v35  ;;  %v2322_v51 = vrot.slane %v2321_v31, 2 }
 0x1c7   :  { %3197 = vmatpush.msrb.mxu1 %v3027_v52  ;;  %v3205_v55 = vmax.f32 %v3160_v54, 0.0  ;;  %v2756_v43 = vrot.slane %v2755_v36, 1  ;;  %v2792_v52 = vrot.slane %v2791_v44, 1  ;;  %v2828_v53 = vrot.slane %v2827_v46, 1 }
 0x1c8   :  { %v2685_v41 = vmax.f32 %v2683_v28, %v2684_v61  ;;  %v2862_v56 = vrot.slane %v2861_v49, 2  ;;  %v2393_v0 = vmax.f32 %v4417_v30, %v2392_v42  ;;  %v2536_v27 = vrot.slane %v4441_v45, 4 }
 0x1c9   :  { %4505 = vmatmul.msk.f32.vlgmr.msrb.gmra.mxu1 %vm898_vm7, %v5366_v6  ;;  %v2644_v6 = vrot.slane %v4459_v57, 4  ;;  %v2757_v62 = vmax.f32 %v2755_v36, %v2756_v43  ;;  %v2793_v60 = vmax.f32 %v2791_v44, %v2792_v52  ;;  %v2829_v23 = vmax.f32 %v2827_v46, %v2828_v53  ;;  %v4480_v52 = vld [vmem:[%s7164_s0 + $0x560] sm:$0xff] }
 0x1ca   :  { %3283 = vmatpush.xpose.msra.mxu1 %v5271_v1  ;;  %v4471_v1 = vld [vmem:[%s7164_s0 + $0x518] sm:$0xff]  ;;  %v2572_v28 = vrot.slane %v4447_v11, 4 }
 0x1cb   :  { %v2645_v2 = vmax.f32 %v4459_v57, %v2644_v6  ;;  %v2716_v3 = vrot.slane %v4471_v1, 4  ;;  %v2323_v6 = vmax.f32 %v2321_v31, %v2322_v51 }
 0x1cc   :  { %v2573_v35 = vmax.f32 %v4447_v11, %v2572_v28  ;;  %v4492_v11 = vld [vmem:[%s7164_s0 + $0x5c0] sm:$0xff] }
 0x1cd   :  { %v2646_v13 = vrot.slane %v2645_v2, 2  ;;  %v2717_v14 = vmax.f32 %v4471_v1, %v2716_v3  ;;  %v2357_v1 = vmax.f32 %v4411_v4, %v2356_v15  ;;  %v2324_v3 = vrot.slane %v2323_v6, 1 }
 0x1ce   :  { %v2394_v4 = vrot.slane %v2393_v0, 2  ;;  %v2465_v15 = vmax.f32 %v4429_v58, %v2464_v12 }
 0x1cf   :  { %v2647_v24 = vmax.f32 %v2645_v2, %v2646_v13  ;;  %v2718_v26 = vrot.slane %v2717_v14, 2  ;;  %v2863_v2 = vmax.f32 %v2861_v49, %v2862_v56  ;;  %v2358_v7 = vrot.slane %v2357_v1, 2 }
 0x1d0   :  { %v2500_v13 = vrot.slane %v4435_v59, 4  ;;  %v2325_v19 = vmax.f32 %v2323_v6, %v2324_v3  ;;  %v2395_v21 = vmax.f32 %v2393_v0, %v2394_v4  ;;  %v2466_v30 = vrot.slane %v2465_v15, 2 }
 0x1d1   :  { %3284 = vmatmul.f32.vlgmr.msra.gmra.mxu1 %v3205_v55  ;;  %v2648_v33 = vrot.slane %v2647_v24, 1  ;;  %v2719_v34 = vmax.f32 %v2717_v14, %v2718_v26  ;;  %v4423_v55 = vld [vmem:[%s7164_s0 + $0x398] sm:$0xff]  ;;  %v2864_v14 = vrot.slane %v2863_v2, 1  ;;  %v2359_v20 = vmax.f32 %v2357_v1, %v2358_v7 }
 0x1d2   :  { %v2428_v8 = vrot.slane %v4423_v55, 4  ;;  %v2501_v22 = vmax.f32 %v4435_v59, %v2500_v13  ;;  %v2396_v29 = vrot.slane %v2395_v21, 1  ;;  %v2467_v47 = vmax.f32 %v2465_v15, %v2466_v30 }
 0x1d3   :  { %v2649_v39 = vmax.f32 %v2647_v24, %v2648_v33  ;;  %v2720_v40 = vrot.slane %v2719_v34, 1  ;;  %v2865_v24 = vmax.f32 %v2863_v2, %v2864_v14  ;;  %v2360_v26 = vrot.slane %v2359_v20, 1 }
 0x1d4   :  { %v2429_v5 = vmax.f32 %v4423_v55, %v2428_v8  ;;  %v2502_v31 = vrot.slane %v2501_v22, 2  ;;  %v2397_v61 = vmax.f32 %v2395_v21, %v2396_v29  ;;  %v2468_v44 = vrot.slane %v2467_v47, 1 }
 0x1d5   :  { %v2721_v48 = vmax.f32 %v2719_v34, %v2720_v40  ;;  %v3035_v50 = vsel %vm795_vm0, %v2649_v39, %v2613_v38  ;;  %v2361_v33 = vmax.f32 %v2359_v20, %v2360_v26  ;;  %v2537_v34 = vmax.f32 %v4441_v45, %v2536_v27  ;;  %v4456_v38 = vld [vmem:[%s7164_s0 + $0x4a0] sm:$0xff] }
 0x1d6   :  { %v3036_v54 = vsel %vm797_vm1, %v2685_v41, %v3035_v50  ;;  %v2430_v16 = vrot.slane %v2429_v5, 2  ;;  %v2503_v37 = vmax.f32 %v2501_v22, %v2502_v31  ;;  %v2574_v40 = vrot.slane %v2573_v35, 2  ;;  %v4462_v41 = vld [vmem:[%s7164_s0 + $0x4d0] sm:$0xff] }
 0x1d7   :  { %v3037_v57 = vsel %vm7174_vm2, %v2721_v48, %v3036_v54  ;;  %v2538_v39 = vrot.slane %v2537_v34, 2  ;;  %v2993_v42 = vsel %vm795_vm0, %v2361_v33, %v2325_v19  ;;  %v4468_v48 = vld [vmem:[%s7164_s0 + $0x500] sm:$0xff]  ;;  %v2626_v53 = vrot.slane %v4456_v38, 4 }
 0x1d8   :  { %v3038_v63 = vsel %vm7173_vm3, %v2757_v62, %v3037_v57  ;;  %v2431_v36 = vmax.f32 %v2429_v5, %v2430_v16  ;;  %v2504_v46 = vrot.slane %v2503_v37, 1  ;;  %v2575_v50 = vmax.f32 %v2573_v35, %v2574_v40  ;;  %v4474_v62 = vld [vmem:[%s7164_s0 + $0x530] sm:$0xff]  ;;  %v4408_v33 = vld [vmem:[%s7164_s0 + $0x320] sm:$0xff] }
 0x1d9   :  { %v3039_v9 = vsel %vm7172_vm4, %v2793_v60, %v3038_v63  ;;  %v2539_v49 = vmax.f32 %v2537_v34, %v2538_v39  ;;  %v2994_v51 = vsel %vm797_vm1, %v2397_v61, %v2993_v42  ;;  %v2469_v55 = vmax.f32 %v2467_v47, %v2468_v44  ;;  %v4414_v44 = vld [vmem:[%s7164_s0 + $0x350] sm:$0xff] }
 0x1da   :  { %v3040_v17 = vsel %vm7171_vm5, %v2829_v23, %v3039_v9  ;;  %v2432_v43 = vrot.slane %v2431_v36, 1  ;;  %v2505_v56 = vmax.f32 %v2503_v37, %v2504_v46  ;;  %v2662_v57 = vrot.slane %v4462_v41, 4  ;;  %v4486_v23 = vld [vmem:[%s7164_s0 + $0x590] sm:$0xff]  ;;  %v4420_v46 = vld [vmem:[%s7164_s0 + $0x380] sm:$0xff] }
 0x1db   :  { %v3041_v32 = vsel %vm7170_vm6, %v2865_v24, %v3040_v17  ;;  %v2540_v58 = vrot.slane %v2539_v49, 1  ;;  %v2576_v59 = vrot.slane %v2575_v50, 1  ;;  %v2627_v6 = vmax.f32 %v4456_v38, %v2626_v53  ;;  %v4498_v17 = vld [vmem:[%s7164_s0 + $0x5f0] sm:$0xff] }
 0x1dc   :  { %3116 = vmatpush.msra.mxu0 %v3041_v32  ;;  %v2433_v54 = vmax.f32 %v2431_v36, %v2432_v43  ;;  %v2698_v1 = vrot.slane %v4468_v48, 4  ;;  %v2663_v63 = vmax.f32 %v4462_v41, %v2662_v57  ;;  %v2734_v0 = vrot.slane %v4474_v62, 4 }
 0x1dd   :  { %v2770_v2 = vrot.slane %v4480_v52, 4  ;;  %v2541_v3 = vmax.f32 %v2539_v49, %v2540_v58  ;;  %v2577_v7 = vmax.f32 %v2575_v50, %v2576_v59  ;;  %v2628_v9 = vrot.slane %v2627_v6, 2  ;;  %v4426_v58 = vld [vmem:[%s7164_s0 + $0x3b0] sm:$0xff] }
 0x1de   :  { %v2995_v60 = vsel %vm7174_vm2, %v2433_v54, %v2994_v51  ;;  %v2664_v4 = vrot.slane %v2663_v63, 2  ;;  %v2699_v12 = vmax.f32 %v4468_v48, %v2698_v1  ;;  %v2735_v13 = vmax.f32 %v4474_v62, %v2734_v0 }
 0x1df   :  { %v2996_v8 = vsel %vm7173_vm3, %v2469_v55, %v2995_v60  ;;  %v2629_v19 = vmax.f32 %v2627_v6, %v2628_v9  ;;  %v2771_v20 = vmax.f32 %v4480_v52, %v2770_v2  ;;  %v2806_v21 = vrot.slane %v4486_v23, 4 }
 0x1e0   :  { %v2997_v45 = vsel %vm7172_vm4, %v2505_v56, %v2996_v8  ;;  %v2665_v15 = vmax.f32 %v2663_v63, %v2664_v4  ;;  %v2700_v22 = vrot.slane %v2699_v12, 2  ;;  %v2736_v24 = vrot.slane %v2735_v13, 2  ;;  %v4432_v63 = vld [vmem:[%s7164_s0 + $0x3e0] sm:$0xff] }
 0x1e1   :  { %v2998_v14 = vsel %vm7171_vm5, %v2541_v3, %v2997_v45  ;;  %v2630_v26 = vrot.slane %v2629_v19, 1  ;;  %v2772_v27 = vrot.slane %v2771_v20, 2  ;;  %v2807_v28 = vmax.f32 %v4486_v23, %v2806_v21 }
 0x1e2   :  { %v2999_v5 = vsel %vm7170_vm6, %v2577_v7, %v2998_v14  ;;  %v2842_v29 = vrot.slane %v4492_v11, 4  ;;  %v2666_v16 = vrot.slane %v2665_v15, 1  ;;  %v2701_v30 = vmax.f32 %v2699_v12, %v2700_v22  ;;  %v4438_v7 = vld [vmem:[%s7164_s0 + $0x410] sm:$0xff] }
 0x1e3   :  { %3117 = vmatpush.msra.mxu0 %v2999_v5  ;;  %v2737_v31 = vmax.f32 %v2735_v13, %v2736_v24  ;;  %v2878_v32 = vrot.slane %v4498_v17, 4  ;;  %v2631_v35 = vmax.f32 %v2629_v19, %v2630_v26  ;;  %v2773_v61 = vmax.f32 %v2771_v20, %v2772_v27  ;;  %v5644_v13 = vld [vmem:[%s7165_s1] sm:$0xf] }
 0x1e4   :  { %v2808_v36 = vrot.slane %v2807_v28, 2  ;;  %v2843_v47 = vmax.f32 %v4492_v11, %v2842_v29  ;;  %v2667_v37 = vmax.f32 %v2665_v15, %v2666_v16  ;;  %v2702_v38 = vrot.slane %v2701_v30, 1  ;;  %v4450_v15 = vld [vmem:[%s7164_s0 + $0x470] sm:$0xff] }
 0x1e5   :  { %v2738_v39 = vrot.slane %v2737_v31, 1  ;;  %v2879_v40 = vmax.f32 %v4498_v17, %v2878_v32  ;;  %v2774_v42 = vrot.slane %v2773_v61, 1  ;;  %v2338_v48 = vrot.slane %v4408_v33, 4  ;;  %v4444_v17 = vld [vmem:[%s7164_s0 + $0x440] sm:$0xff] }
 0x1e6   :  { %v2809_v41 = vmax.f32 %v2807_v28, %v2808_v36  ;;  %v2844_v43 = vrot.slane %v2843_v47, 2  ;;  %v2703_v49 = vmax.f32 %v2701_v30, %v2702_v38  ;;  %v3056_v62 = vsel %vm795_vm0, %v2667_v37, %v2631_v35 }
 0x1e7   :  { %v2739_v50 = vmax.f32 %v2737_v31, %v2738_v39  ;;  %v2880_v51 = vrot.slane %v2879_v40, 2  ;;  %v2775_v52 = vmax.f32 %v2773_v61, %v2774_v42  ;;  %v2339_v55 = vmax.f32 %v4408_v33, %v2338_v48 }
 0x1e8   :  { %v2810_v53 = vrot.slane %v2809_v41, 1  ;;  %v2845_v54 = vmax.f32 %v2843_v47, %v2844_v43  ;;  %v3057_v57 = vsel %vm797_vm1, %v2703_v49, %v3056_v62  ;;  %v2374_v59 = vrot.slane %v4414_v44, 4  ;;  %v5659_v47 = vld [vmem:[%s7165_s1 + $0x90] sm:$0xff] }
 0x1e9   :  { %v2881_v56 = vmax.f32 %v2879_v40, %v2880_v51  ;;  %v2410_v6 = vrot.slane %v4420_v46, 4  ;;  %v3058_v23 = vsel %vm7174_vm2, %v2739_v50, %v3057_v57  ;;  %v2340_v0 = vrot.slane %v2339_v55, 2  ;;  %v5664_v40 = vld [vmem:[%s7165_s1 + $0x60] sm:$0xff] }
 0x1ea   :  { %v2811_v1 = vmax.f32 %v2809_v41, %v2810_v53  ;;  %v2846_v60 = vrot.slane %v2845_v54, 1  ;;  %v3059_v3 = vsel %vm7173_vm3, %v2775_v52, %v3058_v23  ;;  %v2375_v8 = vmax.f32 %v4414_v44, %v2374_v59 }
 0x1eb   :  { %v2882_v2 = vrot.slane %v2881_v56, 1  ;;  %v2411_v9 = vmax.f32 %v4420_v46, %v2410_v6  ;;  %v2341_v4 = vmax.f32 %v2339_v55, %v2340_v0  ;;  %v2446_v12 = vrot.slane %v4426_v58, 4 }
 0x1ec   :  { %v2847_v45 = vmax.f32 %v2845_v54, %v2846_v60  ;;  %v3060_v11 = vsel %vm7172_vm4, %v2811_v1, %v3059_v3  ;;  %v2376_v19 = vrot.slane %v2375_v8, 2  ;;  %v2482_v21 = vrot.slane %v4432_v63, 4 }
 0x1ed   :  { %v2883_v14 = vmax.f32 %v2881_v56, %v2882_v2  ;;  %v2412_v20 = vrot.slane %v2411_v9, 2  ;;  %v2342_v22 = vrot.slane %v2341_v4, 1  ;;  %v2447_v24 = vmax.f32 %v4426_v58, %v2446_v12 }
 0x1ee   :  { %v3061_v5 = vsel %vm7171_vm5, %v2847_v45, %v3060_v11  ;;  %v2518_v26 = vrot.slane %v4438_v7, 4  ;;  %v2377_v28 = vmax.f32 %v2375_v8, %v2376_v19  ;;  %v2483_v16 = vmax.f32 %v4432_v63, %v2482_v21 }
 0x1ef   :  { %v3062_v27 = vsel %vm7170_vm6, %v2883_v14, %v3061_v5  ;;  %v2413_v29 = vmax.f32 %v2411_v9, %v2412_v20  ;;  %v2343_v30 = vmax.f32 %v2341_v4, %v2342_v22  ;;  %v2448_v31 = vrot.slane %v2447_v24, 2  ;;  %v4722_v4 = vld [vmem:[%s7165_s1 + $0xd0] sm:$0x3f] }
 0x1f0   :  { %v2519_v32 = vmax.f32 %v4438_v7, %v2518_v26  ;;  %v2554_v33 = vrot.slane %v4444_v17, 4  ;;  %v2484_v61 = vrot.slane %v2483_v16, 2  ;;  %v2590_v36 = vrot.slane %v4450_v15, 4 }
 0x1f1   :  { %v2414_v35 = vrot.slane %v2413_v29, 1  ;;  %v2449_v37 = vmax.f32 %v2447_v24, %v2448_v31  ;;  %v7181_v46 = vmov 4   ;;  %v1218_v62 = vlaneseq }
 0x1f2   :  { %v2520_v38 = vrot.slane %v2519_v32, 2  ;;  %v2555_v39 = vmax.f32 %v4444_v17, %v2554_v33  ;;  %v2485_v43 = vmax.f32 %v2483_v16, %v2484_v61  ;;  %v2591_v44 = vmax.f32 %v4450_v15, %v2590_v36  ;;  %4607 = vset.pattern.permute.xlu2 %v7181_v46  ;;  %4606 = vset.pattern.permute.xlu1 %v7181_v46 }
 0x1f3   :  { %v2415_v41 = vmax.f32 %v2413_v29, %v2414_v35  ;;  %v2450_v49 = vrot.slane %v2449_v37, 1  ;;  %1457 = vperm.xlu2 %4607, %v5659_v47   ;;  %1452 = vperm.xlu1 %4606, %v5664_v40   ;;  %v5676_v63 = vshrl.u32 %v1218_v62, 7  ;;  %v1207_v17 = vmul.f32 %v5475_v18, %v5475_v18 }
 0x1f4   :  { %v2521_v50 = vmax.f32 %v2519_v32, %v2520_v38  ;;  %v2556_v51 = vrot.slane %v2555_v39, 2  ;;  %v2486_v52 = vrot.slane %v2485_v43, 1  ;;  %v2592_v53 = vrot.slane %v2591_v44, 2 }
 0x1f5   :  { %v2451_v55 = vmax.f32 %v2449_v37, %v2450_v49  ;;  %v1209_v19 = vsel %vm7167_vm10, %v1207_v17, 0.0  ;;  %v1782_v49 = vld [vmem:[%s7164_s0 + $0x280] sm:$0xff] }
 0x1f6   :  { %v2522_v56 = vrot.slane %v2521_v50, 1  ;;  %v2557_v57 = vmax.f32 %v2555_v39, %v2556_v51  ;;  %v2487_v59 = vmax.f32 %v2485_v43, %v2486_v52  ;;  %v2593_v6 = vmax.f32 %v2591_v44, %v2592_v53 }
 0x1f7   :  { %v1210_v20 = vrot.slane %v1209_v19, 4 }
 0x1f8   :  { %v2523_v1 = vmax.f32 %v2521_v50, %v2522_v56  ;;  %v2558_v60 = vrot.slane %v2557_v57, 1  ;;  %v2594_v0 = vrot.slane %v2593_v6, 1 }
 0x1f9   :  { %v1211_v21 = vadd.f32 %v1210_v20, %v1209_v19 }
 0x1fa   :  { %v2559_v3 = vmax.f32 %v2557_v57, %v2558_v60  ;;  %v2595_v8 = vmax.f32 %v2593_v6, %v2594_v0 }
 0x1fb   :  { %4609 = vset.pattern.permute.xlu2 %v5676_v63  ;;  %4608 = vset.pattern.permute.xlu1 %v5676_v63  ;;  %v1212_v5 = vrot.slane %v1211_v21, 2 }
 0x1fd   :  { %v1213_v15 = vadd.f32 %v1212_v5, %v1211_v21 }
 0x236   :  { %v5667_v48 = vpop.f32.mrf.mxu1 }
 0x23e   :  { %v3139_v11 = vpop.f32.mrf.mxu1 }
 0x23f   :  { %v3140_v12 = vadd.f32 %v3139_v11, %v5286_v25 }
 0x241   :  { %v3204_v14 = vmax.f32 %v3140_v12, 0.0 }
 0x246   :  { %v3199_v31 = vpop.f32.mrf.mxu1 }
 0x24d   :  { %v5703_v37 = vpop.permute.xlu2 %1457 }
 0x24e   :  { %7195 = vst [vmem:[#allocation5_spill] sm:$0xff] %v5703_v37 }
 0x25b   :  { %v1163_v34 = vpop.trf.xlu0 }
 0x25c   :  { %4398 = vmatmul.msk.f32.vlgmr.msrb.gmra.mxu0 %vm7168_vm9, %v1163_v34  ;;  %v2378_v34 = vrot.slane %v2377_v28, 1 }
 0x25d   :  { %3176 = vmatpush.msrb.mxu0 %v3062_v27 }
 0x25e   :  { %v2379_v42 = vmax.f32 %v2377_v28, %v2378_v34  ;;  %v3200_v34 = vadd.f32 %v3199_v31, %v5286_v25 }
 0x260   :  { %v3014_v54 = vsel %vm795_vm0, %v2379_v42, %v2343_v30  ;;  %v3207_v35 = vmax.f32 %v3200_v34, 0.0  ;;  %v5707_v42 = vand.u32 127, %v1218_v62 }
 0x261   :  { %v3015_v58 = vsel %vm797_vm1, %v2415_v41, %v3014_v54  ;;  %v7177_v54 = vmov 0.0  }
 0x262   :  { %v3016_v23 = vsel %vm7174_vm2, %v2451_v55, %v3015_v58  ;;  %7196 = vst [vmem:[#allocation6_spill] sm:$0xff] %v5707_v42  ;;  %vm5712_vm11 = vcmp.lt.s32.totalorder %v5676_v63, %v5707_v42 }
 0x263   :  { %v3017_v2 = vsel %vm7173_vm3, %v2487_v59, %v3016_v23 }
 0x264   :  { %4501 = vmatmul.msk.f32.vlgmr.msra.gmra.mxu0 %vm898_vm7, %v5644_v13  ;;  %v3018_v7 = vsel %vm7172_vm4, %v2523_v1, %v3017_v2  ;;  %vm1313_vm4 = vcmask 46080  }
 0x265   :  { %v3019_v9 = vsel %vm7171_vm5, %v2559_v3, %v3018_v7  ;;  %v5719_v62 = vpop.permute.xlu1 %1452 }
 0x266   :  { %v3020_v45 = vsel %vm7170_vm6, %v2595_v8, %v3019_v9  ;;  %7199 = vst [vmem:[#allocation7_spill] sm:$0xff] %v5719_v62 }
 0x267   :  { %3177 = vmatpush.msrb.mxu0 %v3020_v45 }
 0x269   :  { %3263 = vmatpush.xpose.msra.mxu0 %v4722_v4 }
 0x26c   :  { %4504 = vmatmul.msk.f32.vlgmr.msrb.gmra.mxu0 %vm898_vm7, %v5644_v13  ;;  %v1214_v13 = vrot.slane %v1213_v15, 1 }
 0x26e   :  { %v1215_v24 = vadd.f32 %v1214_v13, %v1213_v15 }
 0x274   :  { %3264 = vmatmul.f32.vlgmr.msra.gmra.mxu0 %v3204_v14 }
 0x2d9   :  { %v1204_v22 = vpop.f32.mrf.mxu0 }
 0x2da   :  { %v1216_v26 = vmul.f32 2.0, %v1204_v22 }
 0x2dc   :  { %v5693_v27 = vsub.f32 %v1216_v26, %v1215_v24 }
 0x2de   :  { %v1236_v28 = vperm.slane %v5693_v27, 2  ;;  %v1222_v29 = vperm.slane %v5693_v27, 0  ;;  %v1243_v32 = vperm.slane %v5693_v27, 3  ;;  %v1229_v33 = vperm.slane %v5693_v27, 1 }
 0x2df   :  { %v1257_v61 = vperm.slane %v5693_v27, 5  ;;  %v1250_v36 = vperm.slane %v5693_v27, 4  ;;  %v1266_v39 = vrot.slane %v5693_v27, 2  ;;  %v1267_v44 = vrot.slane %v5693_v27, 3 }
 0x2e0   :  { %1241 = vperm.xlu2 %4609, %v1236_v28   ;;  %1227 = vperm.xlu1 %4608, %v1222_v29   ;;  %v1269_v50 = vrot.slane %v5693_v27, 5  ;;  %v1265_v6 = vrot.slane %v5693_v27, 1  ;;  %v1268_v17 = vrot.slane %v5693_v27, 4 }
 0x2e1   :  { %v3119_v18 = vpop.f32.mrf.mxu0  ;;  %v1272_v43 = vperm.slane %v1266_v39, 0  ;;  %v1273_v51 = vperm.slane %v1267_v44, 0 }
 0x2e2   :  { %v3120_v16 = vadd.f32 %v3119_v18, %v5286_v25  ;;  %v1275_v52 = vperm.slane %v1269_v50, 0  ;;  %v1271_v8 = vperm.slane %v1265_v6, 0  ;;  %v1274_v24 = vperm.slane %v1268_v17, 0 }
 0x2e4   :  { %v3203_v30 = vmax.f32 %v3120_v16, 0.0 }
 0x2e6   :  { %3244 = vmatmul.f32.vlgmr.msra.gmra.mxu3 %v3203_v30 }
 0x2e8   :  { %1248 = vperm.xlu2 %4609, %v1243_v32   ;;  %1234 = vperm.xlu1 %4608, %v1229_v33  }
 0x2ee   :  { %3324 = vmatmul.f32.vlgmr.msrb.gmra.mxu3 %v3207_v35 }
 0x2f0   :  { %1262 = vperm.xlu2 %4609, %v1257_v61   ;;  %1255 = vperm.xlu1 %4608, %v1250_v36  }
 0x33a   :  { %v1242_v38 = vpop.permute.xlu2 %1241 }
 0x33b   :  { %vm1290_vm12 = vcmp.eq.f32.partialorder %v1242_v38, %v1272_v43  ;;  %vm1284_vm13 = vcmp.gt.f32.partialorder %v1242_v38, %v1272_v43 }
 0x33c   :  { %vm1297_vm14 = vmand %vm1290_vm12, %vm5712_vm11 }
 0x33d   :  { %vm1303_vm7 = vmor %vm1284_vm13, %vm1297_vm14 }
 0x33e   :  { %v1309_v55 = vsel %vm1303_vm7, 1.0, %v7177_v54 }
 0x33f   :  { %v1328_v57 = vsel %vm1313_vm4, %v1309_v55, 0.0 }
 0x340   :  { %v1329_v1 = vrot.slane %v1328_v57, 4 }
 0x342   :  { %v1249_v41 = vpop.permute.xlu2 %1248  ;;  %v1330_v9 = vadd.f32 %v1329_v1, %v1328_v57  ;;  %v1393_v1 = vrot.slane %v5667_v48, 2 }
 0x343   :  { %vm1291_vm15 = vcmp.eq.f32.partialorder %v1249_v41, %v1273_v51  ;;  %vm1285_vm9 = vcmp.gt.f32.partialorder %v1249_v41, %v1273_v51 }
 0x344   :  { %vm1298_vm8 = vmand %vm1291_vm15, %vm5712_vm11  ;;  %v1331_v19 = vrot.slane %v1330_v9, 2 }
 0x345   :  { %vm1304_vm12 = vmor %vm1285_vm9, %vm1298_vm8 }
 0x346   :  { %v1310_v58 = vsel %vm1304_vm12, 1.0, %v7177_v54  ;;  %v1332_v26 = vadd.f32 %v1331_v19, %v1330_v9 }
 0x347   :  { %v1335_v60 = vsel %vm1313_vm4, %v1310_v58, 0.0 }
 0x348   :  { %v1336_v7 = vrot.slane %v1335_v60, 4  ;;  %v1333_v31 = vrot.slane %v1332_v26, 1 }
 0x34a   :  { %v1263_v53 = vpop.permute.xlu2 %1262  ;;  %v1337_v14 = vadd.f32 %v1336_v7, %v1335_v60  ;;  %v1334_v41 = vadd.f32 %v1333_v31, %v1332_v26  ;;  %v1392_v60 = vrot.slane %v5667_v48, 1  ;;  %v1397_v7 = vperm.slane %v1393_v1, 0 }
 0x34b   :  { %vm1293_vm10 = vcmp.eq.f32.partialorder %v1263_v53, %v1275_v52  ;;  %vm1287_vm6 = vcmp.gt.f32.partialorder %v1263_v53, %v1275_v52  ;;  %v7175_v53 = vmov -1e+30   ;;  %v1431_v31 = vrot.slane %v5667_v48, 4 }
 0x34c   :  { %vm1300_vm5 = vmand %vm1293_vm10, %vm5712_vm11  ;;  %v1338_v22 = vrot.slane %v1337_v14, 2  ;;  %v7189_v1 = vmov 1  }
 0x34d   :  { %vm1306_vm3 = vmor %vm1287_vm6, %vm1300_vm5  ;;  %4611 = vset.pattern.permute.xlu0 %v7189_v1 }
 0x34e   :  { %v1312_v59 = vsel %vm1306_vm3, 1.0, %v7177_v54  ;;  %v1339_v27 = vadd.f32 %v1338_v22, %v1337_v14  ;;  %v1394_v14 = vrot.slane %v5667_v48, 3 }
 0x34f   :  { %v1349_v2 = vsel %vm1313_vm4, %v1312_v59, 0.0 }
 0x350   :  { %v1350_v4 = vrot.slane %v1349_v2, 4  ;;  %v1340_v39 = vrot.slane %v1339_v27, 1  ;;  %v1398_v22 = vperm.slane %v1394_v14, 0 }
 0x352   :  { %v1228_v56 = vpop.permute.xlu1 %1227  ;;  %v1351_v21 = vadd.f32 %v1350_v4, %v1349_v2  ;;  %v1341_v52 = vadd.f32 %v1340_v39, %v1339_v27 }
 0x353   :  { %vm1282_vm13 = vcmp.gt.f32.partialorder %v1228_v56, %v1222_v29  ;;  %vm1288_vm14 = vcmp.eq.f32.partialorder %v1228_v56, %v1222_v29 }
 0x354   :  { %vm1295_vm15 = vmand %vm1288_vm14, %vm5712_vm11  ;;  %v1352_v18 = vrot.slane %v1351_v21, 2  ;;  %vm1358_vm14 = vcmp.lt.f32.partialorder %v1334_v41, 3.0 }
 0x355   :  { %vm1301_vm2 = vmor %vm1282_vm13, %vm1295_vm15  ;;  %vm1359_vm15 = vcmp.lt.f32.partialorder %v1341_v52, 3.0  ;;  %v3179_v52 = vpop.f32.mrf.mxu0 }
 0x356   :  { %v1307_v23 = vsel %vm1301_vm2, 1.0, %v7177_v54  ;;  %v1353_v34 = vadd.f32 %v1352_v18, %v1351_v21 }
 0x357   :  { %v1314_v0 = vsel %vm1313_vm4, %v1307_v23, 0.0  ;;  %v1364_v23 = vsel %vm1358_vm14, 0.0, %v7175_v53  ;;  %vm7207_vm14 = vcmask 31744  }
 0x358   :  { %v1315_v3 = vrot.slane %v1314_v0, 4  ;;  %v1354_v50 = vrot.slane %v1353_v34, 1 }
 0x35a   :  { %v1316_v45 = vadd.f32 %v1315_v3, %v1314_v0  ;;  %v1235_v11 = vpop.permute.xlu1 %1234  ;;  %v1355_v59 = vadd.f32 %v1354_v50, %v1353_v34  ;;  %v1365_v3 = vsel %vm1359_vm15, 0.0, %v7175_v53  ;;  %vm7208_vm15 = vmmov %vm7207_vm14  ;;  %v3100_v50 = vadd.f32 %v5518_v10, %v5286_v25 }
 0x35b   :  { %vm1283_vm3 = vcmp.gt.f32.partialorder %v1235_v11, %v1271_v8  ;;  %vm1289_vm5 = vcmp.eq.f32.partialorder %v1235_v11, %v1271_v8  ;;  %v1396_v8 = vperm.slane %v1392_v60, 0 }
 0x35c   :  { %v1317_v12 = vrot.slane %v1316_v45, 2  ;;  %vm1296_vm6 = vmand %vm1289_vm5, %vm5712_vm11 }
 0x35d   :  { %vm1302_vm8 = vmor %vm1283_vm3, %vm1296_vm6  ;;  %vm1361_vm3 = vcmp.lt.f32.partialorder %v1355_v59, 3.0  ;;  %vm7200_vm6 = vcmask 1043459  }
 0x35e   :  { %v1308_v20 = vsel %vm1302_vm8, 1.0, %v7177_v54  ;;  %v1318_v5 = vadd.f32 %v1317_v12, %v1316_v45  ;;  %v1367_v11 = vsel %vm1361_vm3, 0.0, %v7175_v53  ;;  %vm7201_vm8 = vcmask 1044484  }
 0x35f   :  { %v1321_v15 = vsel %vm1313_vm4, %v1308_v20, 0.0  ;;  %v1395_v12 = vperm.slane %v5667_v48, 0 }
 0x360   :  { %v1322_v13 = vrot.slane %v1321_v15, 4  ;;  %v1319_v16 = vrot.slane %v1318_v5, 1 }
 0x362   :  { %v1323_v28 = vadd.f32 %v1322_v13, %v1321_v15  ;;  %v1256_v29 = vpop.permute.xlu1 %1255  ;;  %v1320_v35 = vadd.f32 %v1319_v16, %v1318_v5 }
 0x363   :  { %vm1286_vm2 = vcmp.gt.f32.partialorder %v1256_v29, %v1274_v24  ;;  %vm1292_vm9 = vcmp.eq.f32.partialorder %v1256_v29, %v1274_v24 }
 0x364   :  { %v1324_v30 = vrot.slane %v1323_v28, 2  ;;  %vm1299_vm10 = vmand %vm1292_vm9, %vm5712_vm11  ;;  %vm1356_vm12 = vcmp.lt.f32.partialorder %v1320_v35, 3.0  ;;  %v1433_v35 = vsub.f32 %v5667_v48, %v1431_v31  ;;  %v4724_v48 = vld [vmem:[%s7165_s1 + $0xe0] sm:$0x3f] }
 0x365   :  { %vm1305_vm7 = vmor %vm1286_vm2, %vm1299_vm10  ;;  %v1362_v56 = vsel %vm1356_vm12, 0.0, %v7175_v53  ;;  %vm7202_vm2 = vcmask 1045509   ;;  %vm7204_vm10 = vcmask 1046534  }
 0x366   :  { %v1325_v32 = vadd.f32 %v1324_v30, %v1323_v28  ;;  %v1311_v33 = vsel %vm1305_vm7, 1.0, %v7177_v54  ;;  %vm7203_vm9 = vmmov %vm7202_vm2  ;;  %vm7205_vm7 = vcmask 1047559  }
 0x367   :  { %v1342_v61 = vsel %vm1313_vm4, %v1311_v33, 0.0 }
 0x368   :  { %v1326_v36 = vrot.slane %v1325_v32, 1  ;;  %v1343_v38 = vrot.slane %v1342_v61, 4 }
 0x36a   :  { %v1327_v43 = vadd.f32 %v1326_v36, %v1325_v32  ;;  %v1344_v44 = vadd.f32 %v1343_v38, %v1342_v61 }
 0x36c   :  { %vm1357_vm13 = vcmp.lt.f32.partialorder %v1327_v43, 3.0  ;;  %v1345_v51 = vrot.slane %v1344_v44, 2 }
 0x36d   :  { %v1363_v55 = vsel %vm1357_vm13, 0.0, %v7175_v53  ;;  %vm7206_vm13 = vcmask 1043456  }
 0x36e   :  { %v1346_v57 = vadd.f32 %v1345_v51, %v1344_v44  ;;  %v1409_v58 = vsel %vm795_vm0, %v1363_v55, %v1362_v56  ;;  %v4723_v44 = vld [vmem:[%s7165_s1 + $0xc0] sm:$0x3f]  ;;  %v3202_v51 = vmax.f32 %v3100_v50, 0.0 }
 0x36f   :  { %v1410_v2 = vsel %vm797_vm1, %v1364_v23, %v1409_v58  ;;  %v3245_v23 = vpop.f32.mrf.mxu3 }
 0x370   :  { %v1347_v6 = vrot.slane %v1346_v57, 1  ;;  %v1411_v45 = vsel %vm7200_vm6, %v1365_v3, %v1410_v2  ;;  %v3265_v2 = vpop.f32.mrf.mxu0  ;;  %vm7209_vm6 = vmmov %vm7206_vm13 }
 0x372   :  { %v1348_v0 = vadd.f32 %v1347_v6, %v1346_v57 }
 0x374   :  { %vm1360_vm5 = vcmp.lt.f32.partialorder %v1348_v0, 3.0 }
 0x375   :  { %v1366_v9 = vsel %vm1360_vm5, 0.0, %v7175_v53 }
 0x376   :  { %v1412_v4 = vsel %vm7201_vm8, %v1366_v9, %v1411_v45 }
 0x377   :  { %v1413_v17 = vsel %vm7202_vm2, %v1367_v11, %v1412_v4  ;;  %v3325_v14 = vpop.f32.mrf.mxu3  ;;  %vm7210_vm2 = vmmov %vm7209_vm6 }
 0x378   :  { %v1417_v19 = vadd.f32 %v1413_v17, %v1397_v7  ;;  %v1416_v20 = vadd.f32 %v1413_v17, %v1396_v8  ;;  %v1415_v21 = vadd.f32 %v1413_v17, %v1395_v12  ;;  %v1418_v24 = vadd.f32 %v1413_v17, %v1398_v22  ;;  %v3285_v8 = vpop.f32.mrf.mxu1  ;;  %v4725_v22 = vld [vmem:[%s7165_s1 + $0x30] sm:$0xff] }
 0x37a   :  { %v1425_v5 = vsel %vm1313_vm4, %v1417_v19, -inf  ;;  %v1422_v15 = vsel %vm1313_vm4, %v1416_v20, -inf  ;;  %v1419_v13 = vsel %vm1313_vm4, %v1415_v21, -inf  ;;  %v1428_v26 = vsel %vm1313_vm4, %v1418_v24, -inf }
 0x37b   :  { %1426 = vmax.xlane.f32.xlu0 %v1425_v5  ;;  %1423 = vmax.xlane.f32.xlu2 %v1422_v15 }
 0x37c   :  { %1420 = vmax.xlane.f32.xlu1 %v1419_v13 }
 0x383   :  { %1429 = vmax.xlane.f32.xlu2 %v1428_v26 }
 0x3ee   :  { %v1424_v28 = vpop.xlane.xlu2 %1423  ;;  %v1427_v18 = vpop.xlane.xlu0 %1426 }
 0x3ef   :  { %v1421_v29 = vpop.xlane.xlu1 %1420  ;;  %v1439_v16 = vperm.slane %v1424_v28, %v5707_v42  ;;  %v1440_v27 = vperm.slane %v1427_v18, %v5707_v42  ;;  %v7187_v28 = vmov 5  }
 0x3f0   :  { %v1438_v30 = vperm.slane %v1421_v29, %v5707_v42 }
 0x3f2   :  { %v1442_v32 = vsel %vm7203_vm9, %v1439_v16, %v1438_v30  ;;  %v7179_v16 = vmov 0  }
 0x3f3   :  { %v1443_v61 = vsel %vm7204_vm10, %v1440_v27, %v1442_v32  ;;  %vm7211_vm10 = vmmov %vm7207_vm14 }
 0x3f6   :  { %v1430_v33 = vpop.xlane.xlu2 %1429 }
 0x3f7   :  { %v1441_v34 = vperm.slane %v1430_v33, %v5707_v42  ;;  %v1998_v42 = vld [vmem:[%s7164_s0 + $0x110] sm:$0xff] }
 0x3f9   :  { %v1444_v36 = vsel %vm7205_vm7, %v1441_v34, %v1443_v61 }
 0x3fa   :  { %v1446_v38 = vadd.f32 %v1444_v36, %v1433_v35 }
 0x3fc   :  { %vm1447_vm12 = vcmp.ge.f32.partialorder %v1446_v38, 0.0  ;;  %v1448_v39 = vmul.f32 0.2, %v1446_v38 }
 0x3fe   :  { %v1449_v41 = vsel %vm1447_vm12, %v1446_v38, %v1448_v39 }
 0x3ff   :  { %v1461_v43 = vrot.slane %v1449_v41, 4  ;;  %v7183_v41 = vmov 3  }
 0x401   :  { %4401 = vmatpush.msk.msra.mxu2 %vm7206_vm13, %v1461_v43 }
 0x402   :  { %4402 = vmatmul.msk.f32.vlgmr.msra.gmra.mxu2 %vm7207_vm14, %v5664_v40  ;;  %v3180_v40 = vadd.f32 %v3179_v52, %v5286_v25 }
 0x403   :  { %3223 = vmatpush.xpose.msrb.mxu2 %v4723_v44 }
 0x404   :  { %v3206_v55 = vmax.f32 %v3180_v40, 0.0 }
 0x407   :  { %3303 = vmatpush.xpose.msra.mxu2 %v4724_v48 }
 0x40a   :  { %4403 = vmatmul.msk.f32.gmra.mxu2 %vm7208_vm15, %v5659_v47  ;;  %v7185_v47 = vmov 2   ;;  %vm7212_vm15 = vmmov %vm7211_vm10 }
 0x40b   :  { %4612 = vset.pattern.permute.xlu2 %v7185_v47 }
 0x412   :  { %3224 = vmatmul.f32.vlgmr.msrb.gmra.mxu2 %v3202_v51 }
 0x41a   :  { %3304 = vmatmul.f32.vlgmr.msra.gmra.mxu2 %v3206_v55 }
 0x485   :  { %v1485_v56 = vpop.f32.mrf.mxu2 }
 0x486   :  { %v1486_v57 = vadd.f32 %v1485_v56, %v5719_v62 }
 0x488   :  { %v1491_v58 = vsub.f32 0.0, %v1486_v57 }
 0x48a   :  { %v1493_v59 = vmul.f32 1.442695, %v1491_v58 }
 0x48c   :  { %4704 = vpow2.f32 %v1493_v59 }
 0x48d   :  { %v1488_v6 = vpop.f32.mrf.mxu2 }
 0x48e   :  { %v1489_v30 = vadd.f32 %v1488_v6, %v5703_v37  ;;  %v1774_v37 = vld [vmem:[%s7164_s0 + $0x100] sm:$0xff] }
 0x490   :  { %v1492_v32 = vsub.f32 0.0, %v1489_v30 }
 0x492   :  { %v4705_v10 = vpop.eup %4704  ;;  %v1495_v35 = vmul.f32 1.442695, %v1492_v32 }
 0x493   :  { %v1497_v60 = vadd.f32 1.0, %v4705_v10 }
 0x495   :  { %4706 = vrcp.f32 %v1497_v60  ;;  %v3225_v25 = vpop.f32.mrf.mxu2  ;;  %v1510_v17 = vand.u32 2147483648, %v1497_v60  ;;  %v1508_v20 = vand.u32 2147483647, %v1497_v60  ;;  %vm1504_vm5 = vweird.f32 %v1497_v60 }
 0x496   :  { %v3246_v0 = vadd.f32 %v3245_v23, %v3225_v25  ;;  %4708 = vpow2.f32 %v1495_v35 }
 0x497   :  { %v1511_v15 = vor.u32 1.1754944e-38, %v1510_v17  ;;  %vm1509_vm9 = vcmp.eq.f32.partialorder %v1508_v20, 8.507059e+37 }
 0x498   :  { %v3266_v3 = vadd.f32 %v3265_v2, %v3246_v0 }
 0x49a   :  { %v3286_v45 = vadd.f32 %v3285_v8, %v3266_v3 }
 0x49b   :  { %v4707_v7 = vpop.eup %4706 }
 0x49c   :  { %v1500_v9 = vmul.f32 %v4707_v7, %v1497_v60  ;;  %vm1505_vm3 = vweird.f32 %v4707_v7  ;;  %v4709_v44 = vpop.eup %4708 }
 0x49d   :  { %v3305_v11 = vpop.f32.mrf.mxu2  ;;  %vm1506_vm8 = vmor %vm1504_vm5, %vm1505_vm3  ;;  %v1498_v50 = vadd.f32 1.0, %v4709_v44  ;;  %vm7213_vm3 = vcmask 44032  }
 0x49e   :  { %v1501_v4 = vsub.f32 1.0, %v1500_v9  ;;  %v3306_v12 = vadd.f32 %v3305_v11, %v3286_v45 }
 0x49f   :  { %4710 = vrcp.f32 %v1498_v50  ;;  %v1525_v59 = vand.u32 2147483648, %v1498_v50  ;;  %vm1519_vm12 = vweird.f32 %v1498_v50  ;;  %v1523_v6 = vand.u32 2147483647, %v1498_v50 }
 0x4a0   :  { %v1502_v19 = vmul.f32 %v4707_v7, %v1501_v4  ;;  %v5790_v21 = vadd.f32 %v3325_v14, %v3306_v12 }
 0x4a1   :  { %v1526_v60 = vor.u32 1.1754944e-38, %v1525_v59  ;;  %vm1524_vm14 = vcmp.eq.f32.partialorder %v1523_v6, 8.507059e+37  ;;  %v1881_v59 = vld [vmem:[%s7164_s0 + $0x18] sm:$0xff] }
 0x4a2   :  { %v1503_v5 = vadd.f32 %v4707_v7, %v1502_v19  ;;  %3328 = vxpose.xlu1.b32.start.end [1/1] (short) (narrow) %v5790_v21, 8  ;;  %4506 = vmatpush.msk.msrb.mxu0 %vm7209_vm6, %v5790_v21 }
 0x4a3   :  { %4508 = vmatpush.msk.msrb.mxu1 %vm7210_vm2, %v5790_v21 }
 0x4a4   :  { %v1507_v13 = vsel %vm1506_vm8, %v4707_v7, %v1503_v5  ;;  %4509 = vmatmul.msk.f32.vlgmr.msrb.gmra.mxu1 %vm7211_vm10, %v4725_v22 }
 0x4a5   :  { %v1512_v24 = vsel %vm1509_vm9, %v1511_v15, %v1507_v13  ;;  %v4711_v51 = vpop.eup %4710 }
 0x4a6   :  { %v5801_v26 = vperm.slane %v1512_v24, 0  ;;  %v1547_v29 = vrot.slane %v1512_v24, 1  ;;  %v1552_v27 = vrot.slane %v1512_v24, 6  ;;  %v1549_v31 = vrot.slane %v1512_v24, 3 }
 0x4a7   :  { %v1551_v61 = vrot.slane %v1512_v24, 5  ;;  %v1548_v36 = vrot.slane %v1512_v24, 2  ;;  %v1553_v43 = vrot.slane %v1512_v24, 7  ;;  %v1550_v52 = vrot.slane %v1512_v24, 4 }
 0x4a8   :  { %1786 = vperm.xlu2 %4612, %v5801_v26   ;;  %1674 = vperm.xlu0 %4611, %v5801_v26   ;;  %v5809_v18 = vperm.slane %v1547_v29, 0  ;;  %v5816_v33 = vperm.slane %v1552_v27, 0  ;;  %v5818_v34 = vperm.slane %v1549_v31, 0  ;;  %v1515_v40 = vmul.f32 %v4711_v51, %v1498_v50  ;;  %v1529_v50 = vld [vmem:[%s7164_s0] sm:$0xff] }
 0x4a9   :  { %v5822_v38 = vperm.slane %v1551_v61, 0  ;;  %v5824_v39 = vperm.slane %v1548_v36, 0  ;;  %v5829_v48 = vperm.slane %v1553_v43, 0  ;;  %v5837_v55 = vperm.slane %v1550_v52, 0  ;;  %v1657_v52 = vld [vmem:[%s7164_s0 + $0x8] sm:$0xff] }
 0x4aa   :  { %v1516_v56 = vsub.f32 1.0, %v1515_v40  ;;  %vm1520_vm7 = vweird.f32 %v4711_v51 }
 0x4ab   :  { %vm1521_vm13 = vmor %vm1519_vm12, %vm1520_vm7 }
 0x4ac   :  { %v1517_v57 = vmul.f32 %v4711_v51, %v1516_v56 }
 0x4ae   :  { %v1518_v58 = vadd.f32 %v4711_v51, %v1517_v57 }
 0x4b0   :  { %4615 = vset.pattern.permute.xlu2 %v7187_v28  ;;  %4614 = vset.pattern.permute.xlu0 %v7181_v46  ;;  %v1522_v10 = vsel %vm1521_vm13, %v4711_v51, %v1518_v58 }
 0x4b1   :  { %2106 = vperm.xlu2 %4615, %v5801_v26   ;;  %2010 = vperm.xlu0 %4614, %v5801_v26   ;;  %v1527_v23 = vsel %vm1524_vm14, %v1526_v60, %v1522_v10  ;;  %v1993_v10 = vld [vmem:[%s7164_s0 + $0x20] sm:$0xff] }
 0x4b2   :  { %v5846_v25 = vperm.slane %v1527_v23, 0  ;;  %v1556_v0 = vrot.slane %v1527_v23, 3  ;;  %v1559_v3 = vrot.slane %v1527_v23, 6  ;;  %v1554_v9 = vrot.slane %v1527_v23, 1 }
 0x4b3   :  { %v1557_v4 = vrot.slane %v1527_v23, 4  ;;  %v1560_v17 = vrot.slane %v1527_v23, 7  ;;  %v1555_v5 = vrot.slane %v1527_v23, 2  ;;  %v1558_v22 = vrot.slane %v1527_v23, 5 }
 0x4b4   :  { %v5853_v2 = vperm.slane %v1556_v0, 0  ;;  %v5863_v8 = vperm.slane %v1559_v3, 0  ;;  %v5871_v11 = vperm.slane %v1554_v9, 0 }
 0x4b5   :  { %v5879_v14 = vperm.slane %v1557_v4, 0  ;;  %v5887_v20 = vperm.slane %v1560_v17, 0  ;;  %v5895_v13 = vperm.slane %v1555_v5, 0  ;;  %v4726_v17 = vld [vmem:[%s7164_s0 + $0x28] sm:$0xff] }
 0x4b9   :  { %4616 = vset.pattern.permute.xlu2 %v7179_v16  ;;  %4620 = vset.pattern.permute.xlu0 %v7185_v47 }
 0x4ba   :  { %1790 = vperm.xlu0 %4620, %v5809_v18   ;;  %1582 = vperm.xlu2 %4616, %v5809_v18  }
 0x4c2   :  { %1810 = vperm.xlu0 %4620, %v5816_v33   ;;  %1590 = vperm.xlu2 %4616, %v5818_v34  }
 0x4ca   :  { %4624 = vset.pattern.permute.xlu0 %v7183_v41  ;;  %1598 = vperm.xlu2 %4616, %v5822_v38  }
 0x4cb   :  { %1906 = vperm.xlu0 %4624, %v5824_v39  }
 0x4d2   :  { %1606 = vperm.xlu2 %4616, %v5829_v48  }
 0x4d3   :  { %1926 = vperm.xlu0 %4624, %v5829_v48  }
 0x4da   :  { %4619 = vset.pattern.permute.xlu2 %v7189_v1 }
 0x4db   :  { %4628 = vset.pattern.permute.xlu0 %v7181_v46  ;;  %1682 = vperm.xlu2 %4619, %v5824_v39  }
 0x4dc   :  { %2030 = vperm.xlu0 %4628, %v5822_v38  }
 0x4e3   :  { %1690 = vperm.xlu2 %4619, %v5837_v55  }
 0x4e4   :  { %4629 = vset.pattern.permute.xlu0 %v7187_v28 }
 0x4e5   :  { %2110 = vperm.xlu0 %4629, %v5809_v18  }
 0x4eb   :  { %1698 = vperm.xlu2 %4619, %v5816_v33  }
 0x4ed   :  { %2130 = vperm.xlu0 %4629, %v5816_v33  }
 0x4f3   :  { %4622 = vset.pattern.permute.xlu2 %v7185_v47 }
 0x4f4   :  { %1798 = vperm.xlu2 %4622, %v5818_v34  }
 0x4f5   :  { %4636 = vset.pattern.permute.xlu0 %v7181_v46  ;;  %4610 = vset.pattern.permute.xlu1 %v7179_v16 }
 0x4f6   :  { %2042 = vperm.xlu0 %4636, %v5846_v25  }
 0x4fc   :  { %1578 = vperm.xlu1 %4610, %v5801_v26   ;;  %1806 = vperm.xlu2 %4622, %v5822_v38  }
 0x4fe   :  { %4642 = vset.pattern.permute.xlu0 %v7189_v1 }
 0x4ff   :  { %1718 = vperm.xlu0 %4642, %v5853_v2  }
 0x502   :  { %v5857_v7 = vpop.permute.xlu2 %1786 }
 0x504   :  { %4613 = vset.pattern.permute.xlu1 %v7183_v41  ;;  %4623 = vset.pattern.permute.xlu2 %v7183_v41 }
 0x505   :  { %1898 = vperm.xlu1 %4613, %v5801_v26   ;;  %1902 = vperm.xlu2 %4623, %v5809_v18   ;;  %v5903_v26 = vperm.slane %v1558_v22, 0 }
 0x507   :  { %1730 = vperm.xlu0 %4642, %v5863_v8  }
 0x50b   :  { %v5866_v45 = vpop.permute.xlu2 %2106 }
 0x50d   :  { %4617 = vset.pattern.permute.xlu1 %v7179_v16  ;;  %1914 = vperm.xlu2 %4623, %v5837_v55  }
 0x50e   :  { %1586 = vperm.xlu1 %4617, %v5824_v39  }
 0x50f   :  { %4643 = vset.pattern.permute.xlu0 %v7185_v47 }
 0x510   :  { %1822 = vperm.xlu0 %4643, %v5871_v11  }
 0x514   :  { %v5875_v12 = vpop.permute.xlu2 %1582 }
 0x515   :  { %1922 = vperm.xlu2 %4623, %v5816_v33  }
 0x516   :  { %1594 = vperm.xlu1 %4617, %v5837_v55  }
 0x518   :  { %1834 = vperm.xlu0 %4643, %v5879_v14  }
 0x51a   :  { %v1675_v36 = vpop.permute.xlu0 %1674 }
 0x51b   :  { %v1737_v57 = vmul.f32 %v1675_v36, %v1657_v52 }
 0x51c   :  { %v5882_v19 = vpop.permute.xlu2 %1590 }
 0x51d   :  { %4627 = vset.pattern.permute.xlu2 %v7181_v46 }
 0x51e   :  { %1602 = vperm.xlu1 %4617, %v5816_v33   ;;  %2018 = vperm.xlu2 %4627, %v5824_v39  }
 0x520   :  { %1846 = vperm.xlu0 %4643, %v5887_v20  }
 0x523   :  { %v2011_v44 = vpop.permute.xlu0 %2010 }
 0x524   :  { %v5890_v15 = vpop.permute.xlu2 %1598  ;;  %v2073_v9 = vmul.f32 %v2011_v44, %v1993_v10 }
 0x526   :  { %4618 = vset.pattern.permute.xlu1 %v7189_v1  ;;  %2026 = vperm.xlu2 %4627, %v5837_v55  }
 0x527   :  { %1678 = vperm.xlu1 %4618, %v5809_v18  }
 0x528   :  { %4647 = vset.pattern.permute.xlu0 %v7183_v41 }
 0x529   :  { %1938 = vperm.xlu0 %4647, %v5895_v13  }
 0x52c   :  { %v5899_v24 = vpop.permute.xlu2 %1606  ;;  %v5971_v60 = vpop.permute.xlu0 %1790 }
 0x52e   :  { %2038 = vperm.xlu2 %4627, %v5829_v48  }
 0x52f   :  { %1686 = vperm.xlu1 %4618, %v5818_v34  }
 0x531   :  { %1950 = vperm.xlu0 %4647, %v5903_v26  }
 0x535   :  { %v5906_v29 = vpop.permute.xlu2 %1682 }
 0x536   :  { %4631 = vset.pattern.permute.xlu2 %v7187_v28 }
 0x537   :  { %1694 = vperm.xlu1 %4618, %v5822_v38   ;;  %2118 = vperm.xlu2 %4631, %v5818_v34  }
 0x539   :  { %4651 = vset.pattern.permute.xlu0 %v7181_v46 }
 0x53a   :  { %2054 = vperm.xlu0 %4651, %v5853_v2  }
 0x53d   :  { %v5913_v30 = vpop.permute.xlu2 %1690 }
 0x53f   :  { %1702 = vperm.xlu1 %4618, %v5829_v48   ;;  %2126 = vperm.xlu2 %4631, %v5822_v38  }
 0x542   :  { %2066 = vperm.xlu0 %4651, %v5863_v8  }
 0x545   :  { %v5918_v27 = vpop.permute.xlu2 %1698 }
 0x546   :  { %v3344_v31 = vpop.trf.xlu1 }
 0x547   :  { %4507 = vmatmul.msk.f32.vlgmr.msrb.gmra.mxu0 %vm7212_vm15, %v3344_v31  ;;  %4621 = vset.pattern.permute.xlu1 %v7185_v47 }
 0x548   :  { %4633 = vset.pattern.permute.xlu2 %v7189_v1  ;;  %1794 = vperm.xlu1 %4621, %v5824_v39  }
 0x549   :  { %1706 = vperm.xlu2 %4633, %v5846_v25  }
 0x54a   :  { %4652 = vset.pattern.permute.xlu0 %v7187_v28 }
 0x54b   :  { %2142 = vperm.xlu0 %4652, %v5871_v11  }
 0x54e   :  { %v5927_v32 = vpop.permute.xlu2 %1798 }
 0x550   :  { %1802 = vperm.xlu1 %4621, %v5837_v55  }
 0x551   :  { %4634 = vset.pattern.permute.xlu2 %v7185_v47 }
 0x552   :  { %1818 = vperm.xlu2 %4634, %v5846_v25  }
 0x553   :  { %2154 = vperm.xlu0 %4652, %v5879_v14  }
 0x556   :  { %v5933_v35 = vpop.permute.xlu2 %1806 }
 0x558   :  { %1814 = vperm.xlu1 %4621, %v5829_v48  }
 0x55a   :  { %4637 = vset.pattern.permute.xlu2 %v7187_v28 }
 0x55b   :  { %2138 = vperm.xlu2 %4637, %v5846_v25   ;;  %2166 = vperm.xlu0 %4652, %v5887_v20  }
 0x55f   :  { %v5939_v61 = vpop.permute.xlu2 %1902 }
 0x560   :  { %4625 = vset.pattern.permute.xlu1 %v7183_v41 }
 0x561   :  { %1910 = vperm.xlu1 %4625, %v5818_v34  }
 0x563   :  { %4638 = vset.pattern.permute.xlu2 %v7179_v16  ;;  %4656 = vset.pattern.permute.xlu0 %v5676_v63 }
 0x564   :  { %1614 = vperm.xlu2 %4638, %v5871_v11  }
 0x567   :  { %v5946_v43 = vpop.permute.xlu2 %1914 }
 0x569   :  { %1918 = vperm.xlu1 %4625, %v5822_v38   ;;  %v1769_v38 = vld [vmem:[%s7164_s0 + $0x10] sm:$0xff] }
 0x56a   :  { %v1849_v6 = vmul.f32 %v5857_v7, %v1769_v38  ;;  %v2169_v7 = vmul.f32 %v4726_v17, %v5866_v45 }
 0x56c   :  { %1622 = vperm.xlu2 %4638, %v5853_v2  }
 0x56e   :  { %v1579_v51 = vpop.permute.xlu1 %1578 }
 0x56f   :  { %v5956_v40 = vpop.permute.xlu2 %1922  ;;  %v1641_v56 = vmul.f32 %v1579_v51, %v1529_v50  ;;  %v5985_v50 = vpop.permute.xlu0 %1810 }
 0x571   :  { %4626 = vset.pattern.permute.xlu1 %v7181_v46  ;;  %v1753_v58 = vadd.f32 %v1737_v57, %v1641_v56 }
 0x572   :  { %2014 = vperm.xlu1 %4626, %v5809_v18  }
 0x573   :  { %v1865_v23 = vadd.f32 %v1849_v6, %v1753_v58 }
 0x574   :  { %1630 = vperm.xlu2 %4638, %v5903_v26  }
 0x577   :  { %v1899_v18 = vpop.permute.xlu1 %1898  ;;  %v5995_v44 = vpop.permute.xlu0 %1906 }
 0x578   :  { %v1961_v0 = vmul.f32 %v1899_v18, %v1881_v59  ;;  %v5973_v3 = vpop.permute.xlu2 %2018 }
 0x57a   :  { %v1977_v4 = vadd.f32 %v1961_v0, %v1865_v23  ;;  %2022 = vperm.xlu1 %4626, %v5818_v34  }
 0x57c   :  { %v2089_v5 = vadd.f32 %v2073_v9, %v1977_v4  ;;  %1638 = vperm.xlu2 %4638, %v5887_v20  }
 0x57e   :  { %v2185_v22 = vadd.f32 %v2169_v7, %v2089_v5 }
 0x580   :  { %2201 = vst [vmem:[#allocation2] sm:$0xff] %v2185_v22  ;;  %v5981_v31 = vpop.permute.xlu1 %1586  ;;  %v5983_v36 = vpop.permute.xlu2 %2026 }
 0x582   :  { %2034 = vperm.xlu1 %4626, %v5816_v33   ;;  %v6004_v33 = vpop.permute.xlu0 %1926 }
 0x584   :  { %4641 = vset.pattern.permute.xlu2 %v7189_v1 }
 0x585   :  { %1714 = vperm.xlu2 %4641, %v5895_v13  }
 0x588   :  { %v5990_v34 = vpop.permute.xlu1 %1594  ;;  %v5992_v45 = vpop.permute.xlu2 %2038 }
 0x58a   :  { %4630 = vset.pattern.permute.xlu1 %v7187_v28 }
 0x58b   :  { %2114 = vperm.xlu1 %4630, %v5824_v39   ;;  %v6014_v39 = vpop.permute.xlu0 %2030 }
 0x58d   :  { %1726 = vperm.xlu2 %4641, %v5903_v26  }
 0x590   :  { %v5999_v51 = vpop.permute.xlu1 %1602 }
 0x591   :  { %v6001_v52 = vpop.permute.xlu2 %2118 }
 0x593   :  { %2122 = vperm.xlu1 %4630, %v5837_v55   ;;  %v6024_v55 = vpop.permute.xlu0 %2110 }
 0x595   :  { %4645 = vset.pattern.permute.xlu2 %v7185_v47 }
 0x596   :  { %1830 = vperm.xlu2 %4645, %v5853_v2  }
 0x599   :  { %v6008_v56 = vpop.permute.xlu1 %1678  ;;  %v6010_v57 = vpop.permute.xlu2 %2126 }
 0x59b   :  { %2134 = vperm.xlu1 %4630, %v5829_v48   ;;  %v3386_v48 = vmul.f32 %v5790_v21, %v5790_v21  ;;  %v6036_v0 = vpop.permute.xlu0 %2130 }
 0x59d   :  { %v3387_v10 = vsel %vm7213_vm3, %v3386_v48, 0.0 }
 0x59e   :  { %1842 = vperm.xlu2 %4645, %v5863_v8   ;;  %v3388_v23 = vrot.slane %v3387_v10, 4 }
 0x5a0   :  { %v3389_v21 = vadd.f32 %v3388_v23, %v3387_v10 }
 0x5a1   :  { %v6016_v38 = vpop.permute.xlu1 %1686 }
 0x5a2   :  { %v3390_v4 = vrot.slane %v3389_v21, 2 }
 0x5a3   :  { %v6018_v58 = vpop.permute.xlu2 %1706  ;;  %4632 = vset.pattern.permute.xlu1 %v7179_v16  ;;  %v6045_v17 = vpop.permute.xlu0 %2042 }
 0x5a4   :  { %1610 = vperm.xlu1 %4632, %v5846_v25   ;;  %v3391_v7 = vadd.f32 %v3390_v4, %v3389_v21 }
 0x5a6   :  { %4646 = vset.pattern.permute.xlu2 %v7183_v41  ;;  %v3392_v22 = vrot.slane %v3391_v7, 1 }
 0x5a7   :  { %1934 = vperm.xlu2 %4646, %v5871_v11  }
 0x5a8   :  { %v3393_v23 = vadd.f32 %v3392_v22, %v3391_v7 }
 0x5a9   :  { %v1695_v59 = vpop.permute.xlu1 %1694 }
 0x5ac   :  { %v6028_v6 = vpop.permute.xlu2 %1818  ;;  %4635 = vset.pattern.permute.xlu1 %v7183_v41 }
 0x5ad   :  { %1930 = vperm.xlu1 %4635, %v5846_v25  }
 0x5af   :  { %1946 = vperm.xlu2 %4646, %v5879_v14  }
 0x5b1   :  { %v6034_v18 = vpop.permute.xlu1 %1702 }
 0x5b5   :  { %v6038_v9 = vpop.permute.xlu2 %2138  ;;  %4639 = vset.pattern.permute.xlu1 %v7179_v16  ;;  %v6057_v16 = vpop.permute.xlu0 %1718 }
 0x5b6   :  { %1618 = vperm.xlu1 %4639, %v5895_v13   ;;  %7215 = vst [vmem:[#allocation9_spill] sm:$0xff] %v6057_v16 }
 0x5b7   :  { %1958 = vperm.xlu2 %4646, %v5887_v20  }
 0x5ba   :  { %v6043_v25 = vpop.permute.xlu1 %1794 }
 0x5bd   :  { %v6070_v7 = vpop.permute.xlu0 %1730 }
 0x5be   :  { %v6047_v5 = vpop.permute.xlu2 %1614  ;;  %1626 = vperm.xlu1 %4639, %v5879_v14   ;;  %7217 = vst [vmem:[#allocation11_spill] sm:$0xff] %v6070_v7 }
 0x5bf   :  { %4650 = vset.pattern.permute.xlu2 %v7181_v46 }
 0x5c0   :  { %2050 = vperm.xlu2 %4650, %v5895_v13  }
 0x5c2   :  { %v6052_v48 = vpop.permute.xlu1 %1802 }
 0x5c4   :  { %v3383_v10 = vpop.f32.mrf.mxu0 }
 0x5c5   :  { %v3394_v53 = vmul.f32 2.0, %v3383_v10  ;;  %v1534_v10 = vld [vmem:[%s7164_s0 + $0xf0] sm:$0xff]  ;;  %v6103_v7 = vpop.permute.xlu0 %1822 }
 0x5c6   :  { %v6054_v54 = vpop.permute.xlu2 %1622  ;;  %1634 = vperm.xlu1 %4639, %v5863_v8   ;;  %v1646_v47 = vmul.f32 %v5890_v15, %v1534_v10  ;;  %v1886_v15 = vld [vmem:[%s7164_s0 + $0x108] sm:$0xff] }
 0x5c7   :  { %7214 = vst [vmem:[#allocation8_spill] sm:$0xff] %v6054_v54  ;;  %v6059_v21 = vsub.f32 %v3394_v53, %v3393_v23  ;;  %v1662_v53 = vld [vmem:[%s7164_s0 + $0xf8] sm:$0xff] }
 0x5c8   :  { %2062 = vperm.xlu2 %4650, %v5903_v26  }
 0x5c9   :  { %v3403_v4 = vperm.slane %v6059_v21, 1  ;;  %v3424_v22 = vperm.slane %v6059_v21, 4 }
 0x5ca   :  { %v6063_v46 = vpop.permute.xlu1 %1814 }
 0x5cb   :  { %3408 = vperm.xlu0 %4656, %v3403_v4   ;;  %v1742_v4 = vmul.f32 %v1695_v59, %v1662_v53  ;;  %v1854_v53 = vmul.f32 %v5933_v35, %v1774_v37  ;;  %v2078_v37 = vmul.f32 %v6014_v39, %v1998_v42  ;;  %v1660_v42 = vld [vmem:[%s7164_s0 + $0x98] sm:$0xff]  ;;  %v1532_v39 = vld [vmem:[%s7164_s0 + $0x90] sm:$0xff] }
 0x5cd   :  { %v1758_v62 = vadd.f32 %v1742_v4, %v1646_v47  ;;  %v7218_v47 = vmov 1  }
 0x5ce   :  { %v6065_v41 = vpop.permute.xlu2 %1630  ;;  %4640 = vset.pattern.permute.xlu1 %v7189_v1 }
 0x5cf   :  { %7216 = vst [vmem:[#allocation10_spill] sm:$0xff] %v6065_v41  ;;  %1710 = vperm.xlu1 %4640, %v5871_v11   ;;  %v4727_v41 = vld [vmem:[%s7164_s0 + $0x118] sm:$0xff] }
 0x5d0   :  { %4654 = vset.pattern.permute.xlu2 %v7187_v28  ;;  %v1658_v28 = vld [vmem:[%s7164_s0 + $0x38] sm:$0xff] }
 0x5d1   :  { %2150 = vperm.xlu2 %4654, %v5853_v2   ;;  %v1738_v59 = vmul.f32 %v6008_v56, %v1658_v28  ;;  %v1770_v28 = vld [vmem:[%s7164_s0 + $0x40] sm:$0xff]  ;;  %v1870_v56 = vadd.f32 %v1854_v53, %v1758_v62  ;;  %v2174_v62 = vmul.f32 %v4727_v41, %v6010_v57  ;;  %v1740_v41 = vmul.f32 %v6016_v38, %v1660_v42  ;;  %v1663_v42 = vld [vmem:[%s7164_s0 + $0x128] sm:$0xff] }
 0x5d3   :  { %3429 = vperm.xlu0 %4656, %v3424_v22   ;;  %v1911_v23 = vpop.permute.xlu1 %1910  ;;  %v1530_v22 = vld [vmem:[%s7164_s0 + $0x30] sm:$0xff] }
 0x5d4   :  { %v1642_v10 = vmul.f32 %v5875_v12, %v1530_v22  ;;  %v1850_v12 = vmul.f32 %v5971_v60, %v1770_v28 }
 0x5d6   :  { %v6084_v1 = vpop.permute.xlu2 %1638  ;;  %v1754_v54 = vadd.f32 %v1738_v59, %v1642_v10  ;;  %v1644_v10 = vmul.f32 %v5882_v19, %v1532_v39  ;;  %v4728_v19 = vld [vmem:[%s7164_s0 + $0x58] sm:$0xff] }
 0x5d7   :  { %1722 = vperm.xlu1 %4640, %v5879_v14   ;;  %v2170_v38 = vmul.f32 %v4728_v19, %v6024_v55 }
 0x5d8   :  { %v1866_v60 = vadd.f32 %v1850_v12, %v1754_v54  ;;  %v6134_v54 = vpop.permute.xlu0 %1834  ;;  %v7219_v12 = vmov 2  }
 0x5d9   :  { %2162 = vperm.xlu2 %4654, %v5863_v8  }
 0x5db   :  { %v1919_v16 = vpop.permute.xlu1 %1918  ;;  %4658 = vset.pattern.permute.xlu0 %v7218_v47  ;;  %v1882_v47 = vld [vmem:[%s7164_s0 + $0x48] sm:$0xff] }
 0x5dc   :  { %v1966_v4 = vmul.f32 %v1919_v16, %v1886_v15  ;;  %v1994_v15 = vld [vmem:[%s7164_s0 + $0x50] sm:$0xff]  ;;  %v1962_v53 = vmul.f32 %v5939_v61, %v1882_v47  ;;  %v1884_v61 = vld [vmem:[%s7164_s0 + $0xa8] sm:$0xff]  ;;  %v1756_v47 = vadd.f32 %v1740_v41, %v1644_v10 }
 0x5dd   :  { %v1964_v55 = vmul.f32 %v1911_v23, %v1884_v61  ;;  %v1775_v41 = vld [vmem:[%s7164_s0 + $0x130] sm:$0xff] }
 0x5de   :  { %v1982_v35 = vadd.f32 %v1966_v4, %v1870_v56  ;;  %v1772_v56 = vld [vmem:[%s7164_s0 + $0xa0] sm:$0xff]  ;;  %v1771_v61 = vld [vmem:[%s7164_s0 + $0x70] sm:$0xff] }
 0x5df   :  { %v6111_v22 = vpop.permute.xlu2 %1714  ;;  %1734 = vperm.xlu1 %4640, %v5887_v20   ;;  %v1535_v4 = vld [vmem:[%s7164_s0 + $0x120] sm:$0xff] }
 0x5e0   :  { %v2094_v16 = vadd.f32 %v2078_v37, %v1982_v35 }
 0x5e1   :  { %4655 = vset.pattern.permute.xlu2 %v5676_v63  ;;  %v1978_v63 = vadd.f32 %v1962_v53, %v1866_v60  ;;  %v1647_v60 = vmul.f32 %v5999_v51, %v1535_v4  ;;  %v6180_v4 = vpop.permute.xlu0 %1846 }
 0x5e2   :  { %v2190_v59 = vadd.f32 %v2174_v62, %v2094_v16  ;;  %v6153_v62 = vperm.slane %v6059_v21, 0  ;;  %v1852_v16 = vmul.f32 %v5927_v32, %v1772_v56  ;;  %v1531_v32 = vld [vmem:[%s7164_s0 + $0x60] sm:$0xff] }
 0x5e4   :  { %2206 = vst [vmem:[#allocation2 + $0x28] sm:$0xff] %v2190_v59  ;;  %v2015_v57 = vpop.permute.xlu1 %2014  ;;  %v1996_v59 = vld [vmem:[%s7164_s0 + $0xb0] sm:$0xff]  ;;  %v1868_v53 = vadd.f32 %v1852_v16, %v1756_v47  ;;  %v1643_v47 = vmul.f32 %v5981_v31, %v1531_v32 }
 0x5e5   :  { %v2074_v28 = vmul.f32 %v2015_v57, %v1994_v15  ;;  %v1743_v15 = vmul.f32 %v5918_v27, %v1663_v42  ;;  %v1659_v27 = vld [vmem:[%s7164_s0 + $0x68] sm:$0xff] }
 0x5e6   :  { %v1980_v23 = vadd.f32 %v1964_v55, %v1868_v53  ;;  %v1739_v16 = vmul.f32 %v5906_v29, %v1659_v27  ;;  %v1999_v55 = vld [vmem:[%s7164_s0 + $0x140] sm:$0xff] }
 0x5e7   :  { %v2090_v37 = vadd.f32 %v2074_v28, %v1978_v63  ;;  %v6149_v35 = vpop.permute.xlu2 %1726  ;;  %4644 = vset.pattern.permute.xlu1 %v7219_v12  ;;  %v1759_v51 = vadd.f32 %v1743_v15, %v1647_v60  ;;  %v1855_v63 = vmul.f32 %v5985_v50, %v1775_v41  ;;  %v4729_v28 = vld [vmem:[%s7164_s0 + $0xb8] sm:$0xff]  ;;  %v1851_v60 = vmul.f32 %v6043_v25, %v1771_v61  ;;  %v1533_v53 = vld [vmem:[%s7164_s0 + $0xc0] sm:$0xff] }
 0x5e8   :  { %1826 = vperm.xlu1 %4644, %v5895_v13   ;;  %v2172_v56 = vmul.f32 %v4729_v28, %v6001_v52  ;;  %v1887_v50 = vld [vmem:[%s7164_s0 + $0x138] sm:$0xff]  ;;  %v1645_v27 = vmul.f32 %v5990_v34, %v1533_v53  ;;  %v1995_v61 = vld [vmem:[%s7164_s0 + $0x80] sm:$0xff] }
 0x5e9   :  { %v2186_v39 = vadd.f32 %v2170_v38, %v2090_v37  ;;  %3401 = vperm.xlu2 %4655, %v6153_v62   ;;  %v3410_v38 = vperm.slane %v6059_v21, 2  ;;  %v1871_v52 = vadd.f32 %v1855_v63, %v1759_v51  ;;  %v1883_v15 = vld [vmem:[%s7164_s0 + $0x78] sm:$0xff]  ;;  %v1773_v51 = vld [vmem:[%s7164_s0 + $0xd0] sm:$0xff]  ;;  %v2075_v34 = vmul.f32 %v5973_v3, %v1995_v61  ;;  %v1997_v53 = vld [vmem:[%s7164_s0 + $0xe0] sm:$0xff] }
 0x5ea   :  { %v1963_v63 = vmul.f32 %v5995_v44, %v1883_v15  ;;  %v1853_v44 = vmul.f32 %v6052_v48, %v1773_v51  ;;  %v1536_v3 = vld [vmem:[%s7164_s0 + $0x150] sm:$0xff]  ;;  %v7221_v61 = vmov 4  }
 0x5eb   :  { %2202 = vst [vmem:[#allocation2 + $0x8] sm:$0xff] %v2186_v39  ;;  %v1967_v39 = vmul.f32 %v5956_v40, %v1887_v50  ;;  %v4730_v40 = vld [vmem:[%s7164_s0 + $0x148] sm:$0xff] }
 0x5ec   :  { %v2023_v57 = vpop.permute.xlu1 %2022  ;;  %v2175_v32 = vmul.f32 %v4730_v40, %v6036_v0  ;;  %v6224_v0 = vpop.permute.xlu0 %1938 }
 0x5ed   :  { %v2076_v10 = vmul.f32 %v2023_v57, %v1996_v59  ;;  %v1755_v59 = vadd.f32 %v1739_v16, %v1643_v47  ;;  %v1983_v29 = vadd.f32 %v1967_v39, %v1871_v52  ;;  %v1661_v57 = vld [vmem:[%s7164_s0 + $0xc8] sm:$0xff]  ;;  %v1885_v52 = vld [vmem:[%s7164_s0 + $0xd8] sm:$0xff]  ;;  %v3431_v39 = vperm.slane %v6059_v21, 5 }
 0x5ef   :  { %v2092_v19 = vadd.f32 %v2076_v10, %v1980_v23  ;;  %v1867_v25 = vadd.f32 %v1851_v60, %v1755_v59  ;;  %v3417_v10 = vperm.slane %v6059_v21, 3  ;;  %v1965_v59 = vmul.f32 %v5946_v43, %v1885_v52 }
 0x5f0   :  { %v6190_v37 = vpop.permute.xlu2 %1830  ;;  %1838 = vperm.xlu1 %4644, %v5903_v26   ;;  %v2077_v43 = vmul.f32 %v5983_v36, %v1997_v53  ;;  %v2000_v36 = vld [vmem:[%s7164_s0 + $0x170] sm:$0xff] }
 0x5f1   :  { %v2188_v42 = vadd.f32 %v2172_v56, %v2092_v19  ;;  %3415 = vperm.xlu2 %4655, %v3410_v38   ;;  %v7220_v56 = vmov 3   ;;  %v1741_v38 = vmul.f32 %v5913_v30, %v1661_v57  ;;  %v1979_v50 = vadd.f32 %v1963_v63, %v1867_v25  ;;  %v4731_v30 = vld [vmem:[%s7164_s0 + $0x88] sm:$0xff] }
 0x5f3   :  { %2204 = vst [vmem:[#allocation2 + $0x18] sm:$0xff] %v2188_v42  ;;  %v1757_v47 = vadd.f32 %v1741_v38, %v1645_v27  ;;  %v1664_v42 = vld [vmem:[%s7164_s0 + $0x158] sm:$0xff] }
 0x5f4   :  { %v2035_v31 = vpop.permute.xlu1 %2034  ;;  %v6256_v40 = vpop.permute.xlu0 %1950 }
 0x5f5   :  { %v2079_v41 = vmul.f32 %v2035_v31, %v1999_v55  ;;  %v1869_v60 = vadd.f32 %v1853_v44, %v1757_v47  ;;  %v1776_v55 = vld [vmem:[%s7164_s0 + $0x160] sm:$0xff]  ;;  %v1744_v31 = vmul.f32 %v6034_v18, %v1664_v42  ;;  %v4733_v47 = vld [vmem:[%s7164_s0 + $0x178] sm:$0xff] }
 0x5f6   :  { %v1856_v57 = vmul.f32 %v6063_v46, %v1776_v55 }
 0x5f7   :  { %v2095_v23 = vadd.f32 %v2079_v41, %v1983_v29  ;;  %v1648_v41 = vmul.f32 %v5899_v24, %v1536_v3  ;;  %v1981_v25 = vadd.f32 %v1965_v59, %v1869_v60  ;;  %v1665_v60 = vld [vmem:[%s7164_s0 + $0x188] sm:$0xff] }
 0x5f8   :  { %v6218_v28 = vpop.permute.xlu2 %1842  ;;  %4648 = vset.pattern.permute.xlu1 %v7220_v56 }
 0x5f9   :  { %v2191_v19 = vadd.f32 %v2175_v32, %v2095_v23  ;;  %3422 = vperm.xlu2 %4655, %v3417_v10   ;;  %1942 = vperm.xlu1 %4648, %v5853_v2   ;;  %v2091_v2 = vadd.f32 %v2075_v34, %v1979_v50  ;;  %v1760_v18 = vadd.f32 %v1744_v31, %v1648_v41  ;;  %v1888_v32 = vld [vmem:[%s7164_s0 + $0x168] sm:$0xff]  ;;  %v2001_v31 = vld [vmem:[%s7164_s0 + $0x1a0] sm:$0xff] }
 0x5fa   :  { %v2093_v10 = vadd.f32 %v2077_v43, %v1981_v25  ;;  %v1968_v46 = vmul.f32 %v6004_v33, %v1888_v32  ;;  %v2080_v50 = vmul.f32 %v5992_v45, %v2000_v36  ;;  %v2081_v41 = vmul.f32 %v6045_v17, %v2001_v31  ;;  %v1669_v31 = vld [vmem:[%s7164_s0 + $0x248] sm:$0xff] }
 0x5fb   :  { %2207 = vst [vmem:[#allocation2 + $0x30] sm:$0xff] %v2191_v19  ;;  %v1872_v23 = vadd.f32 %v1856_v57, %v1760_v18  ;;  %v7222_v19 = vmov 0   ;;  %v7223_v57 = vmov 5  }
 0x5fc   :  { %v6275_v44 = vpop.permute.xlu0 %2054 }
 0x5fd   :  { %v2115_v16 = vpop.permute.xlu1 %2114  ;;  %v1984_v38 = vadd.f32 %v1968_v46, %v1872_v23 }
 0x5fe   :  { %v2171_v48 = vmul.f32 %v4731_v30, %v2115_v16 }
 0x5ff   :  { %v2096_v34 = vadd.f32 %v2080_v50, %v1984_v38  ;;  %v1666_v38 = vld [vmem:[%s7164_s0 + $0x1b8] sm:$0xff]  ;;  %v1778_v50 = vld [vmem:[%s7164_s0 + $0x1c0] sm:$0xff] }
 0x600   :  { %v2187_v15 = vadd.f32 %v2171_v48, %v2091_v2  ;;  %v1745_v48 = vmul.f32 %v6018_v58, %v1665_v60 }
 0x601   :  { %3436 = vperm.xlu2 %4655, %v3431_v39   ;;  %v6251_v29 = vpop.permute.xlu2 %1934  ;;  %1954 = vperm.xlu1 %4648, %v5863_v8   ;;  %v4732_v8 = vld [vmem:[%s7164_s0 + $0xe8] sm:$0xff]  ;;  %v1889_v39 = vld [vmem:[%s7164_s0 + $0x198] sm:$0xff] }
 0x602   :  { %2203 = vst [vmem:[#allocation2 + $0x10] sm:$0xff] %v2187_v15 }
 0x604   :  { %v6289_v2 = vpop.permute.xlu0 %2066 }
 0x605   :  { %v2123_v51 = vpop.permute.xlu1 %2122 }
 0x606   :  { %v2173_v24 = vmul.f32 %v4732_v8, %v2123_v51 }
 0x608   :  { %v2189_v63 = vadd.f32 %v2173_v24, %v2093_v10 }
 0x609   :  { %v6269_v27 = vpop.permute.xlu2 %1946  ;;  %4649 = vset.pattern.permute.xlu1 %v7221_v61  ;;  %4657 = vset.pattern.permute.xlu2 %v7222_v19 }
 0x60a   :  { %2205 = vst [vmem:[#allocation2 + $0x20] sm:$0xff] %v2189_v63  ;;  %2046 = vperm.xlu1 %4649, %v5871_v11   ;;  %v1537_v11 = vld [vmem:[%s7164_s0 + $0x180] sm:$0xff] }
 0x60c   :  { %v6305_v53 = vpop.permute.xlu0 %2142 }
 0x60d   :  { %v2135_v33 = vpop.permute.xlu1 %2134 }
 0x60e   :  { %v2176_v52 = vmul.f32 %v4733_v47, %v2135_v33  ;;  %v3442_v33 = vrot.slane %v6059_v21, 4 }
 0x610   :  { %v2192_v42 = vadd.f32 %v2176_v52, %v2096_v34 }
 0x611   :  { %v6281_v16 = vpop.permute.xlu2 %1958 }
 0x612   :  { %2208 = vst [vmem:[#allocation2 + $0x38] sm:$0xff] %v2192_v42  ;;  %2058 = vperm.xlu1 %4649, %v5879_v14   ;;  %v1777_v14 = vld [vmem:[%s7164_s0 + $0x190] sm:$0xff]  ;;  %v1858_v42 = vmul.f32 %v6103_v7, %v1778_v50 }
 0x613   :  { %v1857_v59 = vmul.f32 %v6028_v6, %v1777_v14  ;;  %v4734_v6 = vld [vmem:[%s7164_s0 + $0x1a8] sm:$0xff] }
 0x614   :  { %v2177_v43 = vmul.f32 %v4734_v6, %v6038_v9  ;;  %v6318_v10 = vpop.permute.xlu0 %2154  ;;  %v3439_v9 = vrot.slane %v6059_v21, 1 }
 0x616   :  { %v1611_v45 = vpop.permute.xlu1 %1610  ;;  %v3445_v63 = vperm.slane %v3439_v9, 0 }
 0x617   :  { %v1649_v30 = vmul.f32 %v1611_v45, %v1537_v11  ;;  %v1890_v11 = vld [vmem:[%s7164_s0 + $0x1c8] sm:$0xff] }
 0x618   :  { %v1970_v7 = vmul.f32 %v6251_v29, %v1890_v11  ;;  %v1781_v29 = vld [vmem:[%s7164_s0 + $0x250] sm:$0xff] }
 0x619   :  { %v1761_v3 = vadd.f32 %v1745_v48, %v1649_v30  ;;  %v3448_v30 = vperm.slane %v3442_v33, 0  ;;  %v1544_v33 = vld [vmem:[%s7164_s0 + $0x2d0] sm:$0xff] }
 0x61a   :  { %2070 = vperm.xlu1 %4649, %v5887_v20   ;;  %v6296_v55 = vpop.permute.xlu2 %2050 }
 0x61b   :  { %v1873_v15 = vadd.f32 %v1857_v59, %v1761_v3  ;;  %v1541_v3 = vld [vmem:[%s7164_s0 + $0x240] sm:$0xff] }
 0x61f   :  { %v1931_v58 = vpop.permute.xlu1 %1930 }
 0x620   :  { %v1969_v20 = vmul.f32 %v1931_v58, %v1889_v39  ;;  %v7224_v39 = vmov 0.0  }
 0x622   :  { %v1985_v25 = vadd.f32 %v1969_v20, %v1873_v15  ;;  %4653 = vset.pattern.permute.xlu1 %v7223_v57  ;;  %v6314_v51 = vpop.permute.xlu2 %2062 }
 0x623   :  { %2146 = vperm.xlu1 %4653, %v5895_v13   ;;  %v6324_v13 = vpop.permute.xlu0 %2166 }
 0x624   :  { %v2097_v18 = vadd.f32 %v2081_v41, %v1985_v25 }
 0x626   :  { %v2193_v32 = vadd.f32 %v2177_v43, %v2097_v18  ;;  %v1861_v18 = vmul.f32 %v6134_v54, %v1781_v29  ;;  %v3441_v54 = vrot.slane %v6059_v21, 3 }
 0x628   :  { %2209 = vst [vmem:[#allocation2 + $0x40] sm:$0xff] %v2193_v32  ;;  %v6316_v23 = vpop.permute.xlu1 %1618  ;;  %v1893_v32 = vld [vmem:[%s7164_s0 + $0x258] sm:$0xff] }
 0x62b   :  { %2158 = vperm.xlu1 %4653, %v5903_v26   ;;  %v6321_v8 = vpop.permute.xlu2 %2150  ;;  %v1538_v26 = vld [vmem:[%s7164_s0 + $0x1b0] sm:$0xff] }
 0x62c   :  { %v1650_v47 = vmul.f32 %v6047_v5, %v1538_v26  ;;  %v3440_v5 = vrot.slane %v6059_v21, 2 }
 0x62e   :  { %v3446_v43 = vperm.slane %v3440_v5, 0  ;;  %v1656_v5 = vmul.f32 %v6084_v1, %v1544_v33 }
 0x630   :  { %v1627_v17 = vpop.permute.xlu1 %1626 }
 0x631   :  { %v1653_v41 = vmul.f32 %v1627_v17, %v1541_v3  ;;  %v1973_v17 = vmul.f32 %v6269_v27, %v1893_v32  ;;  %v3447_v3 = vperm.slane %v3441_v54, 0  ;;  %v3443_v32 = vrot.slane %v6059_v21, 5  ;;  %v1891_v21 = vld [vmem:[%s7164_s0 + $0x1f8] sm:$0xff] }
 0x633   :  { %4661 = vset.pattern.permute.xlu1 %v7221_v61  ;;  %v6329_v46 = vpop.permute.xlu2 %2162 }
 0x638   :  { %v6326_v24 = vpop.permute.xlu1 %1634 }
 0x63d   :  { %v3409_v36 = vpop.permute.xlu0 %3408 }
 0x63e   :  { %vm3463_vm5 = vcmp.eq.f32.partialorder %v3409_v36, %v3445_v63  ;;  %vm3457_vm6 = vcmp.gt.f32.partialorder %v3409_v36, %v3445_v63 }
 0x63f   :  { %vm3469_vm8 = vmand %vm3463_vm5, %vm5712_vm11 }
 0x640   :  { %vm3475_vm2 = vmor %vm3457_vm6, %vm3469_vm8 }
 0x641   :  { %v1711_v34 = vpop.permute.xlu1 %1710  ;;  %v3481_v59 = vsel %vm3475_vm2, 1.0, %v7224_v39 }
 0x642   :  { %v1746_v52 = vmul.f32 %v1711_v34, %v1666_v38  ;;  %v3493_v25 = vsel %vm1313_vm4, %v3481_v59, 0.0  ;;  %v1896_v59 = vld [vmem:[%s7164_s0 + $0x2e8] sm:$0xff] }
 0x643   :  { %v3402_v45 = vpop.permute.xlu2 %3401  ;;  %v3494_v38 = vrot.slane %v3493_v25, 4 }
 0x644   :  { %v1762_v60 = vadd.f32 %v1746_v52, %v1650_v47  ;;  %vm3456_vm9 = vcmp.gt.f32.partialorder %v3402_v45, %v6153_v62  ;;  %vm3462_vm10 = vcmp.eq.f32.partialorder %v3402_v45, %v6153_v62  ;;  %v1784_v45 = vld [vmem:[%s7164_s0 + $0x2e0] sm:$0xff] }
 0x645   :  { %vm3468_vm7 = vmand %vm3462_vm10, %vm5712_vm11  ;;  %v3430_v48 = vpop.permute.xlu0 %3429 }
 0x646   :  { %v1874_v14 = vadd.f32 %v1858_v42, %v1762_v60  ;;  %vm3474_vm12 = vmor %vm3456_vm9, %vm3468_vm7  ;;  %vm3460_vm13 = vcmp.gt.f32.partialorder %v3430_v48, %v3448_v30  ;;  %vm3466_vm14 = vcmp.eq.f32.partialorder %v3430_v48, %v3448_v30  ;;  %v1672_v42 = vld [vmem:[%s7164_s0 + $0x2d8] sm:$0xff]  ;;  %v3495_v60 = vadd.f32 %v3494_v38, %v3493_v25 }
 0x647   :  { %v3480_v62 = vsel %vm3474_vm12, 1.0, %v7224_v39  ;;  %vm3472_vm15 = vmand %vm3466_vm14, %vm5712_vm11 }
 0x648   :  { %v3486_v58 = vsel %vm1313_vm4, %v3480_v62, 0.0  ;;  %v6368_v15 = vadd.f32 %v1970_v7, %v1874_v14  ;;  %vm3478_vm3 = vmor %vm3460_vm13, %vm3472_vm15  ;;  %v3496_v1 = vrot.slane %v3495_v60, 2 }
 0x649   :  { %v1723_v20 = vpop.permute.xlu1 %1722  ;;  %v3487_v9 = vrot.slane %v3486_v58, 4  ;;  %v3484_v36 = vsel %vm3478_vm3, 1.0, %v7224_v39 }
 0x64a   :  { %v1749_v6 = vmul.f32 %v1723_v20, %v1669_v31  ;;  %v3514_v47 = vsel %vm1313_vm4, %v3484_v36, 0.0  ;;  %v1539_v20 = vld [vmem:[%s7164_s0 + $0x1e0] sm:$0xff]  ;;  %v3497_v54 = vadd.f32 %v3496_v1, %v3495_v60  ;;  %v7225_v1 = vld [vmem:[#allocation10_spill] sm:$0xff] }
 0x64b   :  { %v3416_v63 = vpop.permute.xlu2 %3415  ;;  %v3488_v34 = vadd.f32 %v3487_v9, %v3486_v58  ;;  %v3515_v7 = vrot.slane %v3514_v47, 4  ;;  %v1864_v58 = vmul.f32 %v6180_v4, %v1784_v45  ;;  %v1651_v9 = vmul.f32 %v6316_v23, %v1539_v20 }
 0x64c   :  { %v1765_v26 = vadd.f32 %v1749_v6, %v1653_v41  ;;  %vm3458_vm5 = vcmp.gt.f32.partialorder %v3416_v63, %v3446_v43  ;;  %vm3464_vm6 = vcmp.eq.f32.partialorder %v3416_v63, %v3446_v43  ;;  %v1667_v6 = vld [vmem:[%s7164_s0 + $0x1e8] sm:$0xff]  ;;  %v1976_v43 = vmul.f32 %v6281_v16, %v1896_v59 }
 0x64d   :  { %vm3470_vm8 = vmand %vm3464_vm6, %vm5712_vm11  ;;  %v3489_v62 = vrot.slane %v3488_v34, 2  ;;  %v1747_v16 = vmul.f32 %v6111_v22, %v1667_v6 }
 0x64e   :  { %v1877_v50 = vadd.f32 %v1861_v18, %v1765_v26  ;;  %vm3476_vm2 = vmor %vm3458_vm5, %vm3470_vm8  ;;  %v3516_v18 = vadd.f32 %v3515_v7, %v3514_v47  ;;  %v3449_v47 = vperm.slane %v3443_v32, 0  ;;  %v1542_v7 = vld [vmem:[%s7164_s0 + $0x270] sm:$0xff] }
 0x64f   :  { %v3482_v52 = vsel %vm3476_vm2, 1.0, %v7224_v39  ;;  %v3490_v63 = vadd.f32 %v3489_v62, %v3488_v34 }
 0x650   :  { %v3500_v11 = vsel %vm1313_vm4, %v3482_v52, 0.0  ;;  %v6389_v27 = vadd.f32 %v1973_v17, %v1877_v50  ;;  %v1779_v17 = vld [vmem:[%s7164_s0 + $0x1f0] sm:$0xff]  ;;  %v3517_v23 = vrot.slane %v3516_v18, 2  ;;  %v1670_v52 = vld [vmem:[%s7164_s0 + $0x278] sm:$0xff] }
 0x651   :  { %v3501_v30 = vrot.slane %v3500_v11, 4  ;;  %v1735_v48 = vpop.permute.xlu1 %1734  ;;  %v3491_v45 = vrot.slane %v3490_v63, 1  ;;  %v1750_v62 = vmul.f32 %v6149_v35, %v1670_v52  ;;  %v1894_v35 = vld [vmem:[%s7164_s0 + $0x288] sm:$0xff] }
 0x652   :  { %v1752_v14 = vmul.f32 %v1735_v48, %v1672_v42  ;;  %v2003_v42 = vld [vmem:[%s7164_s0 + $0x200] sm:$0xff] }
 0x653   :  { %v3502_v31 = vadd.f32 %v3501_v30, %v3500_v11  ;;  %v3423_v29 = vpop.permute.xlu2 %3422  ;;  %v1763_v11 = vadd.f32 %v1747_v16, %v1651_v9 }
 0x654   :  { %v1768_v41 = vadd.f32 %v1752_v14, %v1656_v5  ;;  %vm3459_vm9 = vcmp.gt.f32.partialorder %v3423_v29, %v3447_v3  ;;  %vm3465_vm10 = vcmp.eq.f32.partialorder %v3423_v29, %v3447_v3  ;;  %v1971_v5 = vmul.f32 %v6224_v0, %v1891_v21  ;;  %v7226_v21 = vld [vmem:[#allocation8_spill] sm:$0xff] }
 0x655   :  { %v3503_v25 = vrot.slane %v3502_v31, 2  ;;  %vm3471_vm7 = vmand %vm3465_vm10, %vm5712_vm11  ;;  %v3498_v14 = vrot.slane %v3497_v54, 1  ;;  %v3518_v29 = vadd.f32 %v3517_v23, %v3516_v18  ;;  %vm7232_vm10 = vcmask 1045509  }
 0x656   :  { %v1880_v4 = vadd.f32 %v1864_v58, %v1768_v41  ;;  %vm3477_vm12 = vmor %vm3459_vm9, %vm3471_vm7  ;;  %v3492_v58 = vadd.f32 %v3491_v45, %v3490_v63  ;;  %vm7235_vm7 = vcmask 1046534  }
 0x657   :  { %v3483_v36 = vsel %vm3477_vm12, 1.0, %v7224_v39  ;;  %v3504_v26 = vadd.f32 %v3503_v25, %v3502_v31  ;;  %v2083_v31 = vmul.f32 %v6296_v55, %v2003_v42  ;;  %v1654_v25 = vmul.f32 %v7225_v1, %v1542_v7  ;;  %v1540_v55 = vld [vmem:[%s7164_s0 + $0x210] sm:$0xff]  ;;  %v6460_v42 = vpop.f32.mrf.mxu1 }
 0x658   :  { %v3507_v38 = vsel %vm1313_vm4, %v3483_v36, 0.0  ;;  %v6415_v50 = vadd.f32 %v1976_v43, %v1880_v4  ;;  %v3499_v18 = vadd.f32 %v3498_v14, %v3497_v54  ;;  %v3519_v63 = vrot.slane %v3518_v29, 1 }
 0x659   :  { %v3508_v33 = vrot.slane %v3507_v38, 4  ;;  %v3505_v48 = vrot.slane %v3504_v26, 1  ;;  %v1766_v9 = vadd.f32 %v1750_v62, %v1654_v25  ;;  %v1974_v54 = vmul.f32 %v6256_v40, %v1894_v35  ;;  %v2004_v25 = vld [vmem:[%s7164_s0 + $0x230] sm:$0xff] }
 0x65a   :  { %v1827_v34 = vpop.permute.xlu1 %1826  ;;  %v1652_v23 = vmul.f32 %v7226_v21, %v1540_v55  ;;  %vm3529_vm6 = vcmp.lt.f32.partialorder %v3499_v18, 3.0  ;;  %v3520_v40 = vadd.f32 %v3519_v63, %v3518_v29  ;;  %v7230_v63 = vld [vmem:[#allocation11_spill] sm:$0xff]  ;;  %vm7236_vm12 = vcmask 1047559  }
 0x65b   :  { %v3509_v22 = vadd.f32 %v3508_v33, %v3507_v38  ;;  %v1859_v60 = vmul.f32 %v1827_v34, %v1779_v17  ;;  %v3437_v30 = vpop.permute.xlu2 %3436  ;;  %v3506_v6 = vadd.f32 %v3505_v48, %v3504_v26  ;;  %v1668_v26 = vld [vmem:[%s7164_s0 + $0x218] sm:$0xff]  ;;  %v1780_v38 = vld [vmem:[%s7164_s0 + $0x220] sm:$0xff]  ;;  %v2006_v34 = vld [vmem:[%s7164_s0 + $0x290] sm:$0xff] }
 0x65c   :  { %vm3461_vm13 = vcmp.gt.f32.partialorder %v3437_v30, %v3449_v47  ;;  %vm3467_vm14 = vcmp.eq.f32.partialorder %v3437_v30, %v3449_v47  ;;  %v2086_v48 = vmul.f32 %v6314_v51, %v2006_v34  ;;  %vm3532_vm2 = vcmp.lt.f32.partialorder %v3520_v40, 3.0 }
 0x65d   :  { %v3510_v3 = vrot.slane %v3509_v22, 2  ;;  %v1875_v59 = vadd.f32 %v1859_v60, %v1763_v11  ;;  %vm3473_vm15 = vmand %vm3467_vm14, %vm5712_vm11  ;;  %vm3528_vm11 = vcmp.lt.f32.partialorder %v3492_v58, 3.0  ;;  %vm3530_vm5 = vcmp.lt.f32.partialorder %v3506_v6, 3.0  ;;  %v7227_v11 = vld [vmem:[#allocation9_spill] sm:$0xff] }
 0x65e   :  { %vm3479_vm3 = vmor %vm3461_vm13, %vm3473_vm15  ;;  %v1748_v45 = vmul.f32 %v7227_v11, %v1668_v26  ;;  %v7228_v60 = vmov -1e+30   ;;  %vm7237_vm14 = vcmask 1043456   ;;  %vm7238_vm15 = vcmask 31744  }
 0x65f   :  { %v3511_v20 = vadd.f32 %v3510_v3, %v3509_v22  ;;  %v1987_v41 = vadd.f32 %v1971_v5, %v1875_v59  ;;  %v3485_v0 = vsel %vm3479_vm3, 1.0, %v7224_v39  ;;  %v1860_v22 = vmul.f32 %v6190_v37, %v1780_v38  ;;  %v1543_v3 = vld [vmem:[%s7164_s0 + $0x2a0] sm:$0xff]  ;;  %vm7239_vm3 = vmmov %vm7238_vm15 }
 0x660   :  { %v3521_v43 = vsel %vm1313_vm4, %v3485_v0, 0.0  ;;  %v3534_v30 = vsel %vm3528_vm11, 0.0, %v7228_v60  ;;  %v3536_v5 = vsel %vm3530_vm5, 0.0, %v7228_v60  ;;  %v3535_v59 = vsel %vm3529_vm6, 0.0, %v7228_v60  ;;  %v1671_v0 = vld [vmem:[%s7164_s0 + $0x2a8] sm:$0xff] }
 0x661   :  { %v3512_v4 = vrot.slane %v3511_v20, 1  ;;  %v3522_v39 = vrot.slane %v3521_v43, 4  ;;  %v6447_v32 = vadd.f32 %v2083_v31, %v1987_v41  ;;  %v3562_v31 = vrot.slane %v6460_v42, 2 }
 0x662   :  { %v1839_v36 = vpop.permute.xlu1 %1838  ;;  %v3561_v37 = vrot.slane %v6460_v42, 1  ;;  %v1764_v58 = vadd.f32 %v1748_v45, %v1652_v23  ;;  %v3578_v29 = vsel %vm795_vm0, %v3535_v59, %v3534_v30  ;;  %vm7229_vm0 = vcmask 1043459  }
 0x663   :  { %v3513_v17 = vadd.f32 %v3512_v4, %v3511_v20  ;;  %v3523_v16 = vadd.f32 %v3522_v39, %v3521_v43  ;;  %v1862_v33 = vmul.f32 %v1839_v36, %v1782_v49  ;;  %v1892_v20 = vld [vmem:[%s7164_s0 + $0x228] sm:$0xff]  ;;  %v3579_v1 = vsel %vm797_vm1, %v3536_v5, %v3578_v29  ;;  %v2007_v5 = vld [vmem:[%s7164_s0 + $0x2c0] sm:$0xff] }
 0x664   :  { %v1876_v6 = vadd.f32 %v1860_v22, %v1764_v58  ;;  %v1655_v43 = vmul.f32 %v6326_v24, %v1543_v3  ;;  %v3566_v4 = vperm.slane %v3562_v31, 0  ;;  %v3565_v39 = vperm.slane %v3561_v37, 0  ;;  %v1783_v24 = vld [vmem:[%s7164_s0 + $0x2b0] sm:$0xff]  ;;  %v4736_v37 = vld [vmem:[%s7164_s0 + $0x2c8] sm:$0xff] }
 0x665   :  { %vm3531_vm8 = vcmp.lt.f32.partialorder %v3513_v17, 3.0  ;;  %v3524_v47 = vrot.slane %v3523_v16, 2  ;;  %v1878_v52 = vadd.f32 %v1862_v33, %v1766_v9  ;;  %v3564_v9 = vperm.slane %v6460_v42, 0 }
 0x666   :  { %v3537_v62 = vsel %vm3531_vm8, 0.0, %v7228_v60  ;;  %v1751_v36 = vmul.f32 %v7230_v63, %v1671_v0  ;;  %v3538_v26 = vsel %vm3532_vm2, 0.0, %v7228_v60  ;;  %v2084_v38 = vmul.f32 %v6275_v44, %v2004_v25  ;;  %v4737_v25 = vld [vmem:[%s7164_s0 + $0x1d8] sm:$0xff] }
 0x667   :  { %v3525_v7 = vadd.f32 %v3524_v47, %v3523_v16  ;;  %v1990_v14 = vadd.f32 %v1974_v54, %v1878_v52  ;;  %v3580_v55 = vsel %vm7229_vm0, %v3537_v62, %v3579_v1  ;;  %vm7231_vm1 = vcmask 1044484   ;;  %v4735_v54 = vld [vmem:[%s7164_s0 + $0x238] sm:$0xff] }
 0x668   :  { %v3581_v33 = vsel %vm7231_vm1, %v3538_v26, %v3580_v55  ;;  %v2180_v21 = vmul.f32 %v4735_v54, %v6321_v8  ;;  %v1767_v23 = vadd.f32 %v1751_v36, %v1655_v43  ;;  %v3563_v44 = vrot.slane %v6460_v42, 3  ;;  %v4739_v36 = vld [vmem:[%s7164_s0 + $0x2f8] sm:$0xff] }
 0x669   :  { %v3526_v51 = vrot.slane %v3525_v7, 1  ;;  %v6478_v41 = vadd.f32 %v2086_v48, %v1990_v14  ;;  %v1863_v22 = vmul.f32 %v6218_v28, %v1783_v24  ;;  %v2087_v59 = vmul.f32 %v6289_v2, %v2007_v5  ;;  %v4741_v54 = vld [vmem:[%s7164_s0 + $0x298] sm:$0xff] }
 0x66a   :  { %v3567_v14 = vperm.slane %v3563_v44, 0  ;;  %v2183_v58 = vmul.f32 %v4736_v37, %v6329_v46  ;;  %v2184_v26 = vmul.f32 %v4739_v36, %v6324_v13  ;;  %v7233_v44 = vld [vmem:[#allocation6_spill] sm:$0xff] }
 0x66b   :  { %v3527_v49 = vadd.f32 %v3526_v51, %v3525_v7  ;;  %v1943_v35 = vpop.permute.xlu1 %1942  ;;  %v1879_v28 = vadd.f32 %v1863_v22, %v1767_v23 }
 0x66c   :  { %v1972_v18 = vmul.f32 %v1943_v35, %v1892_v20  ;;  %v2002_v20 = vld [vmem:[%s7164_s0 + $0x1d0] sm:$0xff] }
 0x66d   :  { %vm3533_vm9 = vcmp.lt.f32.partialorder %v3527_v49, 3.0  ;;  %v2005_v49 = vld [vmem:[%s7164_s0 + $0x260] sm:$0xff] }
 0x66e   :  { %v1988_v17 = vadd.f32 %v1972_v18, %v1876_v6  ;;  %v3539_v16 = vsel %vm3533_vm9, 0.0, %v7228_v60  ;;  %v1895_v60 = vld [vmem:[%s7164_s0 + $0x2b8] sm:$0xff]  ;;  %v2178_v6 = vmul.f32 %v4737_v25, %v6305_v53  ;;  %v4738_v18 = vld [vmem:[%s7164_s0 + $0x268] sm:$0xff]  ;;  %v2008_v53 = vld [vmem:[%s7164_s0 + $0x2f0] sm:$0xff] }
 0x66f   :  { %v3582_v34 = vsel %vm7232_vm10, %v3539_v16, %v3581_v33 }
 0x670   :  { %v2100_v47 = vadd.f32 %v2084_v38, %v1988_v17  ;;  %v3586_v52 = vadd.f32 %v3582_v34, %v3566_v4  ;;  %v3585_v11 = vadd.f32 %v3582_v34, %v3565_v39  ;;  %v3584_v45 = vadd.f32 %v3582_v34, %v3564_v9 }
 0x671   :  { %v3587_v31 = vadd.f32 %v3582_v34, %v3567_v14  ;;  %v2181_v4 = vmul.f32 %v4738_v18, %v6318_v10  ;;  %v4742_v14 = vld [vmem:[%s7165_s1 + $0x60] sm:$0xff] }
 0x672   :  { %v2196_v30 = vadd.f32 %v2180_v21, %v2100_v47  ;;  %v3594_v40 = vsel %vm1313_vm4, %v3586_v52, -inf  ;;  %v3591_v8 = vsel %vm1313_vm4, %v3585_v11, -inf  ;;  %v3588_v48 = vsel %vm1313_vm4, %v3584_v45, -inf }
 0x673   :  { %3595 = vmax.xlane.f32.xlu1 %v3594_v40  ;;  %3592 = vmax.xlane.f32.xlu2 %v3591_v8  ;;  %v1955_v7 = vpop.permute.xlu1 %1954  ;;  %v3597_v0 = vsel %vm1313_vm4, %v3587_v31, -inf  ;;  %v3600_v11 = vrot.slane %v6460_v42, 4  ;;  %vm7234_vm4 = vmmov %vm7232_vm10 }
 0x674   :  { %2212 = vst [vmem:[#allocation2 + $0x58] sm:$0xff] %v2196_v30  ;;  %3589 = vmax.xlane.f32.xlu0 %v3588_v48  ;;  %v1975_v3 = vmul.f32 %v1955_v7, %v1895_v60 }
 0x675   :  { %v3602_v30 = vsub.f32 %v6460_v42, %v3600_v11  ;;  %v4743_v42 = vld [vmem:[%s7165_s1 + $0x90] sm:$0xff] }
 0x676   :  { %v1991_v62 = vadd.f32 %v1975_v3, %v1879_v28  ;;  %v7240_v3 = vld [vmem:[#allocation7_spill] sm:$0xff] }
 0x678   :  { %v2103_v29 = vadd.f32 %v2087_v59, %v1991_v62 }
 0x67a   :  { %v2199_v51 = vadd.f32 %v2183_v58, %v2103_v29 }
 0x67c   :  { %2215 = vst [vmem:[#allocation2 + $0x70] sm:$0xff] %v2199_v51  ;;  %3598 = vmax.xlane.f32.xlu0 %v3597_v0  ;;  %v2047_v1 = vpop.permute.xlu1 %2046 }
 0x67d   :  { %v2082_v2 = vmul.f32 %v2047_v1, %v2002_v20 }
 0x67f   :  { %v2098_v46 = vadd.f32 %v2082_v2, %v6368_v15 }
 0x681   :  { %v2194_v43 = vadd.f32 %v2178_v6, %v2098_v46 }
 0x683   :  { %2210 = vst [vmem:[#allocation2 + $0x48] sm:$0xff] %v2194_v43 }
 0x684   :  { %v2059_v35 = vpop.permute.xlu1 %2058 }
 0x685   :  { %v2085_v55 = vmul.f32 %v2059_v35, %v2005_v49 }
 0x687   :  { %v2101_v39 = vadd.f32 %v2085_v55, %v6389_v27  ;;  %v4740_v27 = vld [vmem:[%s7164_s0 + $0x208] sm:$0xff]  ;;  %v7241_v55 = vmov 1  }
 0x689   :  { %v2197_v9 = vadd.f32 %v2181_v4, %v2101_v39 }
 0x68b   :  { %2213 = vst [vmem:[#allocation2 + $0x60] sm:$0xff] %v2197_v9 }
 0x68c   :  { %v2071_v15 = vpop.permute.xlu1 %2070 }
 0x68d   :  { %v2088_v63 = vmul.f32 %v2071_v15, %v2008_v53 }
 0x68f   :  { %v2104_v38 = vadd.f32 %v2088_v63, %v6415_v50 }
 0x691   :  { %v2200_v24 = vadd.f32 %v2184_v26, %v2104_v38 }
 0x693   :  { %2216 = vst [vmem:[#allocation2 + $0x78] sm:$0xff] %v2200_v24 }
 0x695   :  { %v2147_v10 = vpop.permute.xlu1 %2146 }
 0x696   :  { %v2179_v17 = vmul.f32 %v4740_v27, %v2147_v10 }
 0x698   :  { %v2195_v16 = vadd.f32 %v2179_v17, %v6447_v32 }
 0x69a   :  { %2211 = vst [vmem:[#allocation2 + $0x50] sm:$0xff] %v2195_v16  ;;  %v7242_v16 = vld [vmem:[#allocation5_spill] sm:$0xff] }
 0x69d   :  { %v2159_v33 = vpop.permute.xlu1 %2158 }
 0x69e   :  { %v2182_v21 = vmul.f32 %v4741_v54, %v2159_v33 }
 0x6a0   :  { %v2198_v13 = vadd.f32 %v2182_v21, %v6478_v41 }
 0x6a2   :  { %2214 = vst [vmem:[#allocation2 + $0x68] sm:$0xff] %v2198_v13 }
 0x6e6   :  { %v3593_v50 = vpop.xlane.xlu2 %3592  ;;  %v3596_v34 = vpop.xlane.xlu1 %3595 }
 0x6e7   :  { %v3590_v23 = vpop.xlane.xlu0 %3589  ;;  %v3608_v47 = vperm.slane %v3593_v50, %v7233_v44  ;;  %v3609_v32 = vperm.slane %v3596_v34, %v7233_v44 }
 0x6e8   :  { %v3607_v52 = vperm.slane %v3590_v23, %v7233_v44 }
 0x6ea   :  { %v3611_v45 = vsel %vm7234_vm4, %v3608_v47, %v3607_v52 }
 0x6eb   :  { %v3612_v41 = vsel %vm7235_vm7, %v3609_v32, %v3611_v45 }
 0x6ef   :  { %v3599_v22 = vpop.xlane.xlu0 %3598 }
 0x6f0   :  { %v3610_v60 = vperm.slane %v3599_v22, %v7233_v44 }
 0x6f2   :  { %v3613_v40 = vsel %vm7236_vm12, %v3610_v60, %v3612_v41 }
 0x6f3   :  { %v3615_v8 = vadd.f32 %v3613_v40, %v3602_v30 }
 0x6f5   :  { %vm3616_vm13 = vcmp.ge.f32.partialorder %v3615_v8, 0.0  ;;  %v3617_v48 = vmul.f32 0.2, %v3615_v8 }
 0x6f7   :  { %v3618_v5 = vsel %vm3616_vm13, %v3615_v8, %v3617_v48 }
 0x6f8   :  { %v3620_v7 = vrot.slane %v3618_v5, 4  ;;  %v4529_v5 = vld [vmem:[%s7164_s0 + $0x308] sm:$0xff] }
 0x6fa   :  { %4510 = vmatpush.msk.msrb.mxu2 %vm7237_vm14, %v3620_v7 }
 0x6fb   :  { %4511 = vmatmul.msk.f32.vlgmr.msrb.gmra.mxu2 %vm7238_vm15, %v4742_v14 }
 0x703   :  { %4512 = vmatmul.msk.f32.gmra.mxu2 %vm7239_vm3, %v4743_v42  ;;  %v4513_v42 = vld [vmem:[%s7164_s0 + $0x300] sm:$0xff] }
 0x77e   :  { %v3640_v28 = vpop.f32.mrf.mxu2 }
 0x77f   :  { %v3641_v59 = vadd.f32 %v3640_v28, %v7240_v3  ;;  %v4545_v3 = vld [vmem:[%s7164_s0 + $0x310] sm:$0xff] }
 0x781   :  { %v3646_v62 = vsub.f32 0.0, %v3641_v59 }
 0x783   :  { %v3648_v31 = vmul.f32 1.442695, %v3646_v62  ;;  %v4515_v62 = vld [vmem:[%s7164_s0 + $0x360] sm:$0xff] }
 0x785   :  { %4712 = vpow2.f32 %v3648_v31  ;;  %v4531_v31 = vld [vmem:[%s7164_s0 + $0x368] sm:$0xff] }
 0x786   :  { %v3643_v17 = vpop.f32.mrf.mxu2 }
 0x787   :  { %v3644_v33 = vadd.f32 %v3643_v17, %v7242_v16 }
 0x789   :  { %v3647_v54 = vsub.f32 0.0, %v3644_v33 }
 0x78b   :  { %v4713_v37 = vpop.eup %4712  ;;  %v3650_v21 = vmul.f32 1.442695, %v3647_v54 }
 0x78c   :  { %v3652_v58 = vadd.f32 1.0, %v4713_v37 }
 0x78e   :  { %4714 = vrcp.f32 %v3652_v58  ;;  %v3665_v0 = vand.u32 2147483648, %v3652_v58  ;;  %v3663_v2 = vand.u32 2147483647, %v3652_v58  ;;  %vm3659_vm5 = vweird.f32 %v3652_v58 }
 0x78f   :  { %4716 = vpow2.f32 %v3650_v21 }
 0x790   :  { %v3666_v6 = vor.u32 1.1754944e-38, %v3665_v0  ;;  %vm3664_vm8 = vcmp.eq.f32.partialorder %v3663_v2, 8.507059e+37 }
 0x794   :  { %v4715_v29 = vpop.eup %4714 }
 0x795   :  { %v3655_v51 = vmul.f32 %v4715_v29, %v3652_v58  ;;  %vm3660_vm11 = vweird.f32 %v4715_v29  ;;  %v4717_v13 = vpop.eup %4716 }
 0x796   :  { %vm3661_vm6 = vmor %vm3659_vm5, %vm3660_vm11  ;;  %v3653_v50 = vadd.f32 1.0, %v4717_v13 }
 0x797   :  { %v3656_v20 = vsub.f32 1.0, %v3655_v51 }
 0x798   :  { %4718 = vrcp.f32 %v3653_v50  ;;  %v3680_v45 = vand.u32 2147483648, %v3653_v50  ;;  %vm3674_vm0 = vweird.f32 %v3653_v50  ;;  %v3678_v60 = vand.u32 2147483647, %v3653_v50 }
 0x799   :  { %v3657_v1 = vmul.f32 %v4715_v29, %v3656_v20  ;;  %v4561_v20 = vld [vmem:[%s7164_s0 + $0x318] sm:$0xff] }
 0x79a   :  { %v3681_v41 = vor.u32 1.1754944e-38, %v3680_v45  ;;  %vm3679_vm1 = vcmp.eq.f32.partialorder %v3678_v60, 8.507059e+37 }
 0x79b   :  { %v3658_v25 = vadd.f32 %v4715_v29, %v3657_v1 }
 0x79d   :  { %v3662_v46 = vsel %vm3661_vm6, %v4715_v29, %v3658_v25 }
 0x79e   :  { %v3667_v43 = vsel %vm3664_vm8, %v3666_v6, %v3662_v46  ;;  %v4719_v34 = vpop.eup %4718 }
 0x79f   :  { %v3716_v49 = vperm.slane %v3667_v43, 0  ;;  %v3703_v35 = vrot.slane %v3667_v43, 2  ;;  %v3706_v4 = vrot.slane %v3667_v43, 5  ;;  %v3704_v9 = vrot.slane %v3667_v43, 3 }
 0x7a0   :  { %v3702_v53 = vrot.slane %v3667_v43, 1  ;;  %v3705_v36 = vrot.slane %v3667_v43, 4  ;;  %v3707_v38 = vrot.slane %v3667_v43, 6  ;;  %v3708_v24 = vrot.slane %v3667_v43, 7  ;;  %v4577_v43 = vld [vmem:[%s7164_s0 + $0x320] sm:$0xff] }
 0x7a1   :  { %4165 = vperm.xlu1 %4661, %v3716_v49   ;;  %3829 = vperm.xlu0 %4658, %v3716_v49   ;;  %v6573_v18 = vperm.slane %v3703_v35, 0  ;;  %v6577_v39 = vperm.slane %v3706_v4, 0  ;;  %v3719_v15 = vperm.slane %v3704_v9, 0  ;;  %v3670_v44 = vmul.f32 %v4719_v34, %v3653_v50  ;;  %v4534_v50 = vld [vmem:[%s7164_s0 + $0x3f8] sm:$0xff] }
 0x7a2   :  { %3733 = vperm.xlu2 %4657, %v3716_v49   ;;  %v6584_v63 = vperm.slane %v3702_v53, 0  ;;  %v6589_v26 = vperm.slane %v3705_v36, 0  ;;  %v6593_v10 = vperm.slane %v3707_v38, 0  ;;  %v6595_v27 = vperm.slane %v3708_v24, 0 }
 0x7a3   :  { %v3671_v47 = vsub.f32 1.0, %v3670_v44  ;;  %vm3675_vm2 = vweird.f32 %v4719_v34 }
 0x7a4   :  { %vm3676_vm9 = vmor %vm3674_vm0, %vm3675_vm2 }
 0x7a5   :  { %v3672_v11 = vmul.f32 %v4719_v34, %v3671_v47 }
 0x7a7   :  { %v3673_v32 = vadd.f32 %v4719_v34, %v3672_v11 }
 0x7a9   :  { %4666 = vset.pattern.permute.xlu1 %v7241_v55  ;;  %4659 = vset.pattern.permute.xlu0 %v7219_v12  ;;  %v3677_v30 = vsel %vm3676_vm9, %v4719_v34, %v3673_v32 }
 0x7aa   :  { %4660 = vset.pattern.permute.xlu2 %v7220_v56  ;;  %3941 = vperm.xlu0 %4659, %v3716_v49   ;;  %v6632_v48 = vsel %vm3679_vm1, %v3681_v41, %v3677_v30 }
 0x7ab   :  { %4053 = vperm.xlu2 %4660, %v3716_v49   ;;  %3837 = vperm.xlu1 %4666, %v6573_v18   ;;  %v6641_v14 = vperm.slane %v6632_v48, 0  ;;  %v3709_v38 = vrot.slane %v6632_v48, 1  ;;  %v3711_v33 = vrot.slane %v6632_v48, 3  ;;  %v3714_v34 = vrot.slane %v6632_v48, 6 }
 0x7ac   :  { %v3710_v41 = vrot.slane %v6632_v48, 2 }
 0x7ad   :  { %v6687_v16 = vperm.slane %v3709_v38, 0  ;;  %v6700_v13 = vperm.slane %v3711_v33, 0  ;;  %v6717_v32 = vperm.slane %v3714_v34, 0  ;;  %v4564_v33 = vld [vmem:[%s7164_s0 + $0x3a8] sm:$0xff] }
 0x7b2   :  { %4662 = vset.pattern.permute.xlu0 %v7223_v57 }
 0x7b3   :  { %4664 = vset.pattern.permute.xlu2 %v7222_v19  ;;  %3849 = vperm.xlu1 %4666, %v6577_v39  }
 0x7b4   :  { %4261 = vperm.xlu0 %4662, %v3716_v49   ;;  %3741 = vperm.xlu2 %4664, %v6573_v18  }
 0x7bb   :  { %4668 = vset.pattern.permute.xlu1 %v7219_v12 }
 0x7bc   :  { %4663 = vset.pattern.permute.xlu0 %v7222_v19  ;;  %3745 = vperm.xlu2 %4664, %v3719_v15  }
 0x7bd   :  { %3945 = vperm.xlu1 %4668, %v6584_v63   ;;  %3737 = vperm.xlu0 %4663, %v6584_v63  }
 0x7c4   :  { %3749 = vperm.xlu2 %4664, %v6589_v26  }
 0x7c5   :  { %3953 = vperm.xlu1 %4668, %v3719_v15   ;;  %3753 = vperm.xlu0 %4663, %v6577_v39  }
 0x7cc   :  { %3757 = vperm.xlu2 %4664, %v6593_v10  }
 0x7cd   :  { %3965 = vperm.xlu1 %4668, %v6593_v10   ;;  %3761 = vperm.xlu0 %4663, %v6595_v27  }
 0x7d4   :  { %4665 = vset.pattern.permute.xlu2 %v7241_v55 }
 0x7d5   :  { %4672 = vset.pattern.permute.xlu1 %v7220_v56  ;;  %3833 = vperm.xlu2 %4665, %v6584_v63  }
 0x7d6   :  { %4061 = vperm.xlu1 %4672, %v6573_v18   ;;  %4667 = vset.pattern.permute.xlu0 %v7241_v55 }
 0x7d7   :  { %3845 = vperm.xlu0 %4667, %v6589_v26  }
 0x7dd   :  { %3841 = vperm.xlu2 %4665, %v3719_v15  }
 0x7de   :  { %4069 = vperm.xlu1 %4672, %v6589_v26  }
 0x7df   :  { %3857 = vperm.xlu0 %4667, %v6595_v27  }
 0x7e5   :  { %3853 = vperm.xlu2 %4665, %v6593_v10  }
 0x7e6   :  { %4081 = vperm.xlu1 %4672, %v6595_v27  }
 0x7e7   :  { %4670 = vset.pattern.permute.xlu0 %v7219_v12 }
 0x7e8   :  { %3961 = vperm.xlu0 %4670, %v6577_v39  }
 0x7ed   :  { %4669 = vset.pattern.permute.xlu2 %v7219_v12 }
 0x7ee   :  { %4676 = vset.pattern.permute.xlu1 %v7221_v61  ;;  %3949 = vperm.xlu2 %4669, %v6573_v18  }
 0x7ef   :  { %4177 = vperm.xlu1 %4676, %v3719_v15  }
 0x7f0   :  { %4671 = vset.pattern.permute.xlu0 %v7220_v56 }
 0x7f1   :  { %4057 = vperm.xlu0 %4671, %v6584_v63  }
 0x7f6   :  { %3957 = vperm.xlu2 %4669, %v6589_v26  }
 0x7f7   :  { %4185 = vperm.xlu1 %4676, %v6577_v39  }
 0x7f9   :  { %4077 = vperm.xlu0 %4671, %v6593_v10  }
 0x7fc   :  { %v3734_v23 = vpop.permute.xlu2 %3733 }
 0x7fd   :  { %v3796_v59 = vmul.f32 %v4513_v42, %v3734_v23  ;;  %v4518_v23 = vld [vmem:[%s7164_s0 + $0x3f0] sm:$0xff] }
 0x7fe   :  { %3969 = vperm.xlu2 %4669, %v6595_v27  }
 0x7ff   :  { %4677 = vset.pattern.permute.xlu1 %v7223_v57 }
 0x800   :  { %4265 = vperm.xlu1 %4677, %v6584_v63  }
 0x801   :  { %4675 = vset.pattern.permute.xlu0 %v7221_v61 }
 0x802   :  { %4173 = vperm.xlu0 %4675, %v6573_v18  }
 0x805   :  { %v4054_v52 = vpop.permute.xlu2 %4053 }
 0x806   :  { %4673 = vset.pattern.permute.xlu2 %v7220_v56  ;;  %v4116_v46 = vmul.f32 %v4561_v20, %v4054_v52  ;;  %v4530_v20 = vld [vmem:[%s7164_s0 + $0x338] sm:$0xff] }
 0x807   :  { %4065 = vperm.xlu2 %4673, %v3719_v15  }
 0x808   :  { %4273 = vperm.xlu1 %4677, %v3719_v15  }
 0x80a   :  { %4193 = vperm.xlu0 %4675, %v6595_v27  }
 0x80e   :  { %v3742_v22 = vpop.permute.xlu2 %3741 }
 0x80f   :  { %4073 = vperm.xlu2 %4673, %v6577_v39   ;;  %v3798_v0 = vmul.f32 %v4515_v62, %v3742_v22 }
 0x810   :  { %4285 = vperm.xlu1 %4677, %v6593_v10  }
 0x812   :  { %4679 = vset.pattern.permute.xlu0 %v7223_v57 }
 0x813   :  { %4281 = vperm.xlu0 %4679, %v6577_v39   ;;  %v4166_v40 = vpop.permute.xlu1 %4165  ;;  %v3830_v8 = vpop.permute.xlu0 %3829  ;;  %v3712_v39 = vrot.slane %v6632_v48, 4 }
 0x814   :  { %v3892_v28 = vmul.f32 %v4529_v5, %v3830_v8  ;;  %v4228_v35 = vmul.f32 %v4577_v43, %v4166_v40  ;;  %v4532_v43 = vld [vmem:[%s7164_s0 + $0x398] sm:$0xff] }
 0x815   :  { %v6683_v17 = vperm.slane %v3712_v39, 0  ;;  %v4562_v39 = vld [vmem:[%s7164_s0 + $0x348] sm:$0xff] }
 0x816   :  { %v6637_v7 = vpop.permute.xlu2 %3745  ;;  %v3908_v58 = vadd.f32 %v3892_v28, %v3796_v59  ;;  %v3715_v28 = vrot.slane %v6632_v48, 7 }
 0x817   :  { %4674 = vset.pattern.permute.xlu2 %v7221_v61 }
 0x818   :  { %4681 = vset.pattern.permute.xlu1 %v7241_v55  ;;  %4169 = vperm.xlu2 %4674, %v6584_v63   ;;  %v4744_v63 = vld [vmem:[%s7164_s0 + $0x328] sm:$0xff] }
 0x819   :  { %3861 = vperm.xlu1 %4681, %v6641_v14  }
 0x81b   :  { %4682 = vset.pattern.permute.xlu0 %v7219_v12 }
 0x81c   :  { %3973 = vperm.xlu0 %4682, %v6641_v14   ;;  %v3942_v37 = vpop.permute.xlu0 %3941 }
 0x81d   :  { %v4004_v29 = vmul.f32 %v4545_v3, %v3942_v37  ;;  %v3838_v51 = vpop.permute.xlu1 %3837 }
 0x81e   :  { %v3894_v1 = vmul.f32 %v4531_v31, %v3838_v51  ;;  %v6663_v2 = vpop.permute.xlu2 %3749  ;;  %v6759_v31 = vperm.slane %v3715_v28, 0 }
 0x81f   :  { %v4020_v25 = vadd.f32 %v4004_v29, %v3908_v58 }
 0x820   :  { %v6665_v6 = vadd.f32 %v3894_v1, %v3798_v0  ;;  %4181 = vperm.xlu2 %4674, %v6589_v26  }
 0x821   :  { %4684 = vset.pattern.permute.xlu1 %v7221_v61  ;;  %v4132_v49 = vadd.f32 %v4116_v46, %v4020_v25 }
 0x822   :  { %4197 = vperm.xlu1 %4684, %v6641_v14  }
 0x823   :  { %v4244_v15 = vadd.f32 %v4228_v35, %v4132_v49  ;;  %v4516_v35 = vld [vmem:[%s7164_s0 + $0x390] sm:$0xff] }
 0x824   :  { %4685 = vset.pattern.permute.xlu0 %v7223_v57 }
 0x825   :  { %4293 = vperm.xlu0 %4685, %v6641_v14   ;;  %v3850_v4 = vpop.permute.xlu1 %3849 }
 0x826   :  { %v4262_v9 = vpop.permute.xlu0 %4261  ;;  %v6676_v53 = vpop.permute.xlu2 %3757  ;;  %v3897_v52 = vmul.f32 %v4534_v50, %v3850_v4  ;;  %v4546_v4 = vld [vmem:[%s7164_s0 + $0x340] sm:$0xff] }
 0x827   :  { %v4324_v36 = vmul.f32 %v4744_v63, %v4262_v9  ;;  %v3799_v63 = vmul.f32 %v4516_v35, %v6637_v7 }
 0x828   :  { %4189 = vperm.xlu2 %4674, %v6593_v10  }
 0x829   :  { %v4340_v24 = vadd.f32 %v4324_v36, %v4244_v15 }
 0x82a   :  { %4688 = vset.pattern.permute.xlu1 %v7222_v19 }
 0x82b   :  { %4357 = vst [vmem:[#allocation2 + $0x80] sm:$0xff] %v4340_v24  ;;  %3781 = vperm.xlu1 %4688, %v6683_v17   ;;  %v4548_v24 = vld [vmem:[%s7164_s0 + $0x3a0] sm:$0xff] }
 0x82d   :  { %4686 = vset.pattern.permute.xlu0 %v7222_v19 }
 0x82e   :  { %3769 = vperm.xlu0 %4686, %v6687_v16  }
 0x82f   :  { %v6692_v54 = vpop.permute.xlu1 %3945  ;;  %v6694_v10 = vpop.permute.xlu2 %3833 }
 0x830   :  { %v6696_v21 = vpop.permute.xlu0 %3737  ;;  %4678 = vset.pattern.permute.xlu2 %v7223_v57  ;;  %v3893_v0 = vmul.f32 %v4530_v20, %v6694_v10  ;;  %v4005_v36 = vmul.f32 %v4546_v4, %v6692_v54  ;;  %v4578_v10 = vld [vmem:[%s7164_s0 + $0x350] sm:$0xff] }
 0x831   :  { %4269 = vperm.xlu2 %4678, %v6573_v18  }
 0x833   :  { %4691 = vset.pattern.permute.xlu1 %v7241_v55 }
 0x834   :  { %3873 = vperm.xlu1 %4691, %v6700_v13  }
 0x836   :  { %3777 = vperm.xlu0 %4686, %v6700_v13  }
 0x837   :  { %v6712_v44 = vpop.permute.xlu1 %3953  ;;  %v6714_v18 = vpop.permute.xlu2 %3841 }
 0x838   :  { %v3754_v47 = vpop.permute.xlu0 %3753  ;;  %v3895_v15 = vmul.f32 %v4532_v43, %v6714_v18 }
 0x839   :  { %v3801_v11 = vmul.f32 %v4518_v23, %v3754_v47  ;;  %4277 = vperm.xlu2 %4678, %v6589_v26   ;;  %v6733_v26 = vperm.slane %v3710_v41, 0  ;;  %v4007_v23 = vmul.f32 %v4548_v24, %v6712_v44  ;;  %v4745_v41 = vld [vmem:[%s7164_s0 + $0x358] sm:$0xff]  ;;  %v4535_v44 = vld [vmem:[%s7164_s0 + $0x428] sm:$0xff] }
 0x83b   :  { %v6719_v45 = vadd.f32 %v3897_v52, %v3801_v11 }
 0x83c   :  { %3885 = vperm.xlu1 %4691, %v6717_v32  }
 0x83e   :  { %3789 = vperm.xlu0 %4686, %v6717_v32  }
 0x83f   :  { %v6723_v22 = vpop.permute.xlu1 %3965  ;;  %v6725_v60 = vpop.permute.xlu2 %3853 }
 0x840   :  { %v6727_v30 = vpop.permute.xlu0 %3761 }
 0x841   :  { %4289 = vperm.xlu2 %4678, %v6595_v27   ;;  %v3713_v27 = vrot.slane %v6632_v48, 5 }
 0x843   :  { %v6747_v42 = vperm.slane %v3713_v27, 0 }
 0x844   :  { %4692 = vset.pattern.permute.xlu1 %v7219_v12 }
 0x845   :  { %3977 = vperm.xlu1 %4692, %v6687_v16  }
 0x846   :  { %4690 = vset.pattern.permute.xlu0 %v7241_v55 }
 0x847   :  { %3869 = vperm.xlu0 %4690, %v6733_v26  }
 0x848   :  { %v6737_v40 = vpop.permute.xlu1 %4061  ;;  %v6739_v8 = vpop.permute.xlu2 %3949 }
 0x849   :  { %v6741_v5 = vpop.permute.xlu0 %3845  ;;  %4680 = vset.pattern.permute.xlu2 %v7222_v19 }
 0x84a   :  { %3765 = vperm.xlu2 %4680, %v6641_v14  }
 0x84d   :  { %3989 = vperm.xlu1 %4692, %v6683_v17  }
 0x84f   :  { %3881 = vperm.xlu0 %4690, %v6747_v42  }
 0x850   :  { %v6751_v3 = vpop.permute.xlu1 %4069  ;;  %v6753_v59 = vpop.permute.xlu2 %3957 }
 0x851   :  { %v6755_v62 = vpop.permute.xlu0 %3857 }
 0x852   :  { %4683 = vset.pattern.permute.xlu2 %v7220_v56 }
 0x853   :  { %4085 = vperm.xlu2 %4683, %v6641_v14  }
 0x855   :  { %4001 = vperm.xlu1 %4692, %v6759_v31  }
 0x857   :  { %4694 = vset.pattern.permute.xlu0 %v7219_v12 }
 0x858   :  { %v6763_v37 = vpop.permute.xlu1 %4081  ;;  %3985 = vperm.xlu0 %4694, %v6700_v13   ;;  %v6766_v48 = vpop.permute.xlu2 %3969 }
 0x85a   :  { %v6768_v58 = vpop.permute.xlu0 %3961 }
 0x85b   :  { %4687 = vset.pattern.permute.xlu2 %v7222_v19  ;;  %v4514_v19 = vld [vmem:[%s7164_s0 + $0x330] sm:$0xff] }
 0x85c   :  { %3773 = vperm.xlu2 %4687, %v6733_v26   ;;  %v3797_v1 = vmul.f32 %v4514_v19, %v6696_v21  ;;  %v3911_v21 = vadd.f32 %v3895_v15, %v3799_v63  ;;  %v3898_v19 = vmul.f32 %v4535_v44, %v6725_v60  ;;  %v4746_v60 = vld [vmem:[%s7164_s0 + $0x3b8] sm:$0xff] }
 0x85d   :  { %4696 = vset.pattern.permute.xlu1 %v7220_v56 }
 0x85e   :  { %4093 = vperm.xlu1 %4696, %v6733_v26   ;;  %v3909_v9 = vadd.f32 %v3893_v0, %v3797_v1  ;;  %v4023_v11 = vadd.f32 %v4007_v23, %v3911_v21  ;;  %v4550_v0 = vld [vmem:[%s7164_s0 + $0x400] sm:$0xff]  ;;  %v4547_v21 = vld [vmem:[%s7164_s0 + $0x370] sm:$0xff] }
 0x85f   :  { %v4009_v63 = vmul.f32 %v4550_v0, %v6768_v58  ;;  %v4549_v0 = vld [vmem:[%s7164_s0 + $0x3d0] sm:$0xff] }
 0x860   :  { %3997 = vperm.xlu0 %4694, %v6717_v32   ;;  %v4021_v50 = vadd.f32 %v4005_v36, %v3909_v9 }
 0x861   :  { %v4178_v14 = vpop.permute.xlu1 %4177  ;;  %v4066_v29 = vpop.permute.xlu2 %4065  ;;  %v4025_v58 = vadd.f32 %v4009_v63, %v6719_v45 }
 0x862   :  { %v4119_v34 = vmul.f32 %v4564_v33, %v4066_v29  ;;  %v4580_v29 = vld [vmem:[%s7164_s0 + $0x3b0] sm:$0xff] }
 0x863   :  { %v4058_v51 = vpop.permute.xlu0 %4057  ;;  %v4231_v1 = vmul.f32 %v4580_v29, %v4178_v14  ;;  %v4551_v14 = vld [vmem:[%s7164_s0 + $0x430] sm:$0xff] }
 0x864   :  { %3785 = vperm.xlu2 %4687, %v6747_v42   ;;  %v4117_v38 = vmul.f32 %v4562_v39, %v4058_v51  ;;  %v4135_v51 = vadd.f32 %v4119_v34, %v4023_v11  ;;  %v4566_v39 = vld [vmem:[%s7164_s0 + $0x408] sm:$0xff]  ;;  %v4563_v11 = vld [vmem:[%s7164_s0 + $0x378] sm:$0xff] }
 0x866   :  { %4105 = vperm.xlu1 %4696, %v6747_v42   ;;  %v4133_v18 = vadd.f32 %v4117_v38, %v4021_v50  ;;  %v4247_v9 = vadd.f32 %v4231_v1, %v4135_v51 }
 0x868   :  { %4695 = vset.pattern.permute.xlu0 %v7220_v56 }
 0x869   :  { %v6786_v25 = vpop.permute.xlu1 %4185  ;;  %4089 = vperm.xlu0 %4695, %v6687_v16   ;;  %v4074_v46 = vpop.permute.xlu2 %4073 }
 0x86a   :  { %v4121_v33 = vmul.f32 %v4566_v39, %v4074_v46 }
 0x86b   :  { %v4078_v49 = vpop.permute.xlu0 %4077 }
 0x86c   :  { %3793 = vperm.xlu2 %4687, %v6759_v31  }
 0x86e   :  { %4700 = vset.pattern.permute.xlu1 %v7221_v61 }
 0x86f   :  { %4209 = vperm.xlu1 %4700, %v6700_v13  }
 0x871   :  { %4101 = vperm.xlu0 %4695, %v6683_v17  }
 0x872   :  { %v4266_v7 = vpop.permute.xlu1 %4265  ;;  %v4170_v54 = vpop.permute.xlu2 %4169 }
 0x873   :  { %v4229_v47 = vmul.f32 %v4578_v10, %v4170_v54  ;;  %v4325_v27 = vmul.f32 %v4745_v41, %v4266_v7  ;;  %v4010_v10 = vmul.f32 %v4551_v14, %v6723_v22  ;;  %v4583_v7 = vld [vmem:[%s7164_s0 + $0x440] sm:$0xff]  ;;  %v4582_v22 = vld [vmem:[%s7164_s0 + $0x410] sm:$0xff]  ;;  %v4137_v54 = vadd.f32 %v4121_v33, %v4025_v58  ;;  %v4533_v41 = vld [vmem:[%s7164_s0 + $0x3c8] sm:$0xff] }
 0x874   :  { %v6818_v52 = vpop.permute.xlu0 %4173  ;;  %4689 = vset.pattern.permute.xlu2 %v7241_v55  ;;  %v4519_v55 = vld [vmem:[%s7164_s0 + $0x420] sm:$0xff] }
 0x875   :  { %v4245_v28 = vadd.f32 %v4229_v47, %v4133_v18  ;;  %3865 = vperm.xlu2 %4689, %v6687_v16   ;;  %v3802_v4 = vmul.f32 %v4519_v55, %v6676_v53  ;;  %v4567_v53 = vld [vmem:[%s7164_s0 + $0x438] sm:$0xff]  ;;  %v4233_v47 = vmul.f32 %v4582_v22, %v6786_v25 }
 0x876   :  { %v4122_v50 = vmul.f32 %v4567_v53, %v4078_v49  ;;  %v4006_v49 = vmul.f32 %v4547_v21, %v6739_v8  ;;  %v4579_v8 = vld [vmem:[%s7164_s0 + $0x380] sm:$0xff]  ;;  %v4520_v21 = vld [vmem:[%s7164_s0 + $0x450] sm:$0xff] }
 0x877   :  { %v4341_v20 = vadd.f32 %v4325_v27, %v4245_v28  ;;  %4221 = vperm.xlu1 %4700, %v6717_v32   ;;  %v3914_v38 = vadd.f32 %v3898_v19, %v3802_v4  ;;  %v4747_v27 = vld [vmem:[%s7164_s0 + $0x448] sm:$0xff]  ;;  %v4249_v51 = vadd.f32 %v4233_v47, %v4137_v54  ;;  %v4517_v19 = vld [vmem:[%s7164_s0 + $0x3c0] sm:$0xff]  ;;  %v3896_v4 = vmul.f32 %v4533_v41, %v6741_v5 }
 0x878   :  { %v4022_v25 = vadd.f32 %v4006_v49, %v6665_v6  ;;  %v4230_v6 = vmul.f32 %v4579_v8, %v6818_v52  ;;  %v4565_v52 = vld [vmem:[%s7164_s0 + $0x3d8] sm:$0xff]  ;;  %v3803_v22 = vmul.f32 %v4520_v21, %v6727_v30  ;;  %v4584_v30 = vld [vmem:[%s7164_s0 + $0x470] sm:$0xff] }
 0x879   :  { %4358 = vst [vmem:[#allocation2 + $0x88] sm:$0xff] %v4341_v20  ;;  %4113 = vperm.xlu0 %4695, %v6759_v31   ;;  %v4026_v46 = vadd.f32 %v4010_v10, %v3914_v38  ;;  %v4748_v20 = vld [vmem:[%s7164_s0 + $0x418] sm:$0xff]  ;;  %v4120_v58 = vmul.f32 %v4565_v52, %v6751_v3  ;;  %v4750_v3 = vld [vmem:[%s7164_s0 + $0x3e8] sm:$0xff] }
 0x87a   :  { %v4274_v43 = vpop.permute.xlu1 %4273  ;;  %v6840_v35 = vpop.permute.xlu2 %4181 }
 0x87b   :  { %v4327_v15 = vmul.f32 %v4746_v60, %v4274_v43  ;;  %v4138_v34 = vadd.f32 %v4122_v50, %v4026_v46  ;;  %v4118_v43 = vmul.f32 %v4563_v11, %v6737_v40  ;;  %v4008_v60 = vmul.f32 %v4549_v0, %v6753_v59  ;;  %v4749_v40 = vld [vmem:[%s7164_s0 + $0x388] sm:$0xff]  ;;  %v4581_v59 = vld [vmem:[%s7164_s0 + $0x3e0] sm:$0xff] }
 0x87c   :  { %v6856_v36 = vpop.permute.xlu0 %4193  ;;  %v4552_v50 = vld [vmem:[%s7164_s0 + $0x460] sm:$0xff] }
 0x87d   :  { %v4343_v24 = vadd.f32 %v4327_v15, %v4247_v9  ;;  %3877 = vperm.xlu2 %4689, %v6683_v17   ;;  %v3800_v9 = vmul.f32 %v4517_v19, %v6663_v2  ;;  %v4134_v15 = vadd.f32 %v4118_v43, %v4022_v25  ;;  %v4536_v2 = vld [vmem:[%s7164_s0 + $0x458] sm:$0xff]  ;;  %v4011_v46 = vmul.f32 %v4552_v50, %v6766_v48  ;;  %v4526_v50 = vld [vmem:[%s7164_s0 + $0x570] sm:$0xff] }
 0x87e   :  { %v4235_v11 = vmul.f32 %v4584_v30, %v6856_v36  ;;  %v4569_v43 = vld [vmem:[%s7164_s0 + $0x498] sm:$0xff] }
 0x87f   :  { %4360 = vst [vmem:[#allocation2 + $0x98] sm:$0xff] %v4343_v24  ;;  %4701 = vset.pattern.permute.xlu1 %v7223_v57  ;;  %v3912_v63 = vadd.f32 %v3896_v4, %v3800_v9  ;;  %v4246_v53 = vadd.f32 %v4230_v6, %v4134_v15 }
 0x880   :  { %4297 = vperm.xlu1 %4701, %v6687_v16  }
 0x881   :  { %4699 = vset.pattern.permute.xlu0 %v7221_v61  ;;  %v4024_v38 = vadd.f32 %v4008_v60, %v3912_v63 }
 0x882   :  { %v4286_v23 = vpop.permute.xlu1 %4285  ;;  %4205 = vperm.xlu0 %4699, %v6733_v26   ;;  %v4190_v45 = vpop.permute.xlu2 %4189 }
 0x883   :  { %v4234_v18 = vmul.f32 %v4583_v7, %v4190_v45  ;;  %v4330_v28 = vmul.f32 %v4747_v27, %v4286_v23  ;;  %v3899_v7 = vmul.f32 %v4536_v2, %v6755_v62  ;;  %v4136_v49 = vadd.f32 %v4120_v58, %v4024_v38  ;;  %v4539_v38 = vld [vmem:[%s7164_s0 + $0x4e8] sm:$0xff]  ;;  %v4542_v58 = vld [vmem:[%s7164_s0 + $0x578] sm:$0xff] }
 0x885   :  { %v4250_v44 = vadd.f32 %v4234_v18, %v4138_v34  ;;  %v4282_v29 = vpop.permute.xlu0 %4281  ;;  %3889 = vperm.xlu2 %4689, %v6759_v31   ;;  %v3915_v23 = vadd.f32 %v3899_v7, %v3803_v22 }
 0x886   :  { %v4329_v55 = vmul.f32 %v4748_v20, %v4282_v29 }
 0x887   :  { %v4346_v1 = vadd.f32 %v4330_v28, %v4250_v44  ;;  %v4027_v48 = vadd.f32 %v4011_v46, %v3915_v23  ;;  %v4751_v44 = vld [vmem:[%s7164_s0 + $0x478] sm:$0xff] }
 0x888   :  { %v4345_v39 = vadd.f32 %v4329_v55, %v4249_v51  ;;  %4309 = vperm.xlu1 %4701, %v6683_v17   ;;  %v4521_v51 = vld [vmem:[%s7164_s0 + $0x480] sm:$0xff]  ;;  %v4537_v55 = vld [vmem:[%s7164_s0 + $0x488] sm:$0xff] }
 0x889   :  { %4363 = vst [vmem:[#allocation2 + $0xb0] sm:$0xff] %v4346_v1 }
 0x88a   :  { %4362 = vst [vmem:[#allocation2 + $0xa8] sm:$0xff] %v4345_v39  ;;  %4217 = vperm.xlu0 %4699, %v6747_v42   ;;  %v4585_v39 = vld [vmem:[%s7164_s0 + $0x4a0] sm:$0xff] }
 0x88b   :  { %v4270_v14 = vpop.permute.xlu2 %4269  ;;  %v3862_v24 = vpop.permute.xlu1 %3861 }
 0x88c   :  { %v4326_v5 = vmul.f32 %v4749_v40, %v4270_v14 }
 0x88d   :  { %4693 = vset.pattern.permute.xlu2 %v7219_v12  ;;  %v4232_v12 = vmul.f32 %v4581_v59, %v6840_v35  ;;  %v4568_v35 = vld [vmem:[%s7164_s0 + $0x468] sm:$0xff] }
 0x88e   :  { %v4342_v33 = vadd.f32 %v4326_v5, %v4246_v53  ;;  %v3974_v10 = vpop.permute.xlu0 %3973  ;;  %3981 = vperm.xlu2 %4693, %v6733_v26   ;;  %v4123_v47 = vmul.f32 %v4568_v35, %v6763_v37  ;;  %v4752_v53 = vld [vmem:[%s7164_s0 + $0x4a8] sm:$0xff] }
 0x88f   :  { %v4248_v45 = vadd.f32 %v4232_v12, %v4136_v49 }
 0x890   :  { %4359 = vst [vmem:[#allocation2 + $0x90] sm:$0xff] %v4342_v33  ;;  %4321 = vperm.xlu1 %4701, %v6759_v31   ;;  %v4139_v8 = vadd.f32 %v4123_v47, %v4027_v48 }
 0x892   :  { %4703 = vset.pattern.permute.xlu0 %v7223_v57  ;;  %v4251_v28 = vadd.f32 %v4235_v11, %v4139_v8  ;;  %v4540_v8 = vld [vmem:[%s7164_s0 + $0x518] sm:$0xff] }
 0x893   :  { %4305 = vperm.xlu0 %4703, %v6700_v13   ;;  %v4278_v54 = vpop.permute.xlu2 %4277 }
 0x894   :  { %v4328_v62 = vmul.f32 %v4750_v3, %v4278_v54  ;;  %v4198_v41 = vpop.permute.xlu1 %4197 }
 0x895   :  { %v4236_v15 = vmul.f32 %v4585_v39, %v4198_v41  ;;  %v4524_v41 = vld [vmem:[%s7164_s0 + $0x510] sm:$0xff] }
 0x896   :  { %v4344_v34 = vadd.f32 %v4328_v62, %v4248_v45  ;;  %3993 = vperm.xlu2 %4693, %v6747_v42   ;;  %v4559_v39 = vld [vmem:[%s7164_s0 + $0x5b0] sm:$0xff] }
 0x897   :  { %v4294_v18 = vpop.permute.xlu0 %4293 }
 0x898   :  { %4361 = vst [vmem:[#allocation2 + $0xa0] sm:$0xff] %v4344_v34  ;;  %v4332_v40 = vmul.f32 %v4752_v53, %v4294_v18  ;;  %v4575_v53 = vld [vmem:[%s7164_s0 + $0x5b8] sm:$0xff] }
 0x89b   :  { %4317 = vperm.xlu0 %4703, %v6717_v32   ;;  %v4290_v27 = vpop.permute.xlu2 %4289 }
 0x89c   :  { %v4331_v29 = vmul.f32 %v4751_v44, %v4290_v27  ;;  %v4556_v27 = vld [vmem:[%s7164_s0 + $0x520] sm:$0xff] }
 0x89d   :  { %v6954_v36 = vpop.permute.xlu1 %3781 }
 0x89e   :  { %v4347_v25 = vadd.f32 %v4331_v29, %v4251_v28  ;;  %4697 = vset.pattern.permute.xlu2 %v7220_v56  ;;  %v3900_v56 = vmul.f32 %v4537_v55, %v3862_v24  ;;  %v4572_v29 = vld [vmem:[%s7164_s0 + $0x528] sm:$0xff] }
 0x89f   :  { %4097 = vperm.xlu2 %4697, %v6700_v13   ;;  %v4553_v13 = vld [vmem:[%s7164_s0 + $0x490] sm:$0xff] }
 0x8a0   :  { %4364 = vst [vmem:[#allocation2 + $0xb8] sm:$0xff] %v4347_v25  ;;  %v6952_v37 = vpop.permute.xlu0 %3769  ;;  %v4012_v4 = vmul.f32 %v4553_v13, %v3974_v10 }
 0x8a4   :  { %v3766_v20 = vpop.permute.xlu2 %3765 }
 0x8a5   :  { %v3804_v19 = vmul.f32 %v4521_v51, %v3766_v20 }
 0x8a6   :  { %v3874_v6 = vpop.permute.xlu1 %3873 }
 0x8a7   :  { %4109 = vperm.xlu2 %4697, %v6717_v32   ;;  %v3916_v1 = vadd.f32 %v3900_v56, %v3804_v19  ;;  %v3903_v25 = vmul.f32 %v4540_v8, %v3874_v6  ;;  %v4538_v56 = vld [vmem:[%s7164_s0 + $0x4b8] sm:$0xff] }
 0x8a8   :  { %v3778_v0 = vpop.permute.xlu0 %3777 }
 0x8a9   :  { %v4028_v60 = vadd.f32 %v4012_v4, %v3916_v1  ;;  %v3807_v44 = vmul.f32 %v4524_v41, %v3778_v0  ;;  %v4527_v1 = vld [vmem:[%s7164_s0 + $0x5a0] sm:$0xff]  ;;  %v4522_v0 = vld [vmem:[%s7164_s0 + $0x4b0] sm:$0xff]  ;;  %v4543_v4 = vld [vmem:[%s7164_s0 + $0x5a8] sm:$0xff] }
 0x8aa   :  { %v4591_v41 = vld [vmem:[%s7164_s0 + $0x5c0] sm:$0xff] }
 0x8ab   :  { %v3919_v19 = vadd.f32 %v3903_v25, %v3807_v44  ;;  %v4557_v44 = vld [vmem:[%s7164_s0 + $0x550] sm:$0xff] }
 0x8ad   :  { %v4086_v9 = vpop.permute.xlu2 %4085 }
 0x8ae   :  { %v4124_v32 = vmul.f32 %v4569_v43, %v4086_v9  ;;  %v6979_v2 = vpop.permute.xlu1 %3885  ;;  %v4588_v9 = vld [vmem:[%s7164_s0 + $0x530] sm:$0xff] }
 0x8af   :  { %4698 = vset.pattern.permute.xlu2 %v7221_v61  ;;  %v4523_v61 = vld [vmem:[%s7164_s0 + $0x4e0] sm:$0xff] }
 0x8b0   :  { %v4140_v14 = vadd.f32 %v4124_v32, %v4028_v60  ;;  %v6973_v63 = vpop.permute.xlu0 %3789  ;;  %4201 = vperm.xlu2 %4698, %v6687_v16  }
 0x8b1   :  { %v3810_v32 = vmul.f32 %v4527_v1, %v6973_v63 }
 0x8b2   :  { %v4252_v5 = vadd.f32 %v4236_v15, %v4140_v14  ;;  %v3805_v14 = vmul.f32 %v4522_v0, %v6952_v37  ;;  %v4541_v37 = vld [vmem:[%s7164_s0 + $0x548] sm:$0xff] }
 0x8b3   :  { %v4755_v0 = vld [vmem:[%s7164_s0 + $0x5c8] sm:$0xff] }
 0x8b4   :  { %v4348_v52 = vadd.f32 %v4332_v40, %v4252_v5  ;;  %v3906_v40 = vmul.f32 %v4543_v4, %v6979_v2  ;;  %v4554_v5 = vld [vmem:[%s7164_s0 + $0x4c0] sm:$0xff] }
 0x8b6   :  { %4365 = vst [vmem:[#allocation2 + $0xc0] sm:$0xff] %v4348_v52  ;;  %v3774_v59 = vpop.permute.xlu2 %3773 }
 0x8b7   :  { %v3806_v24 = vmul.f32 %v4523_v61, %v3774_v59  ;;  %v6996_v7 = vpop.permute.xlu1 %3977  ;;  %v4570_v59 = vld [vmem:[%s7164_s0 + $0x4c8] sm:$0xff] }
 0x8b8   :  { %4213 = vperm.xlu2 %4698, %v6683_v17  }
 0x8b9   :  { %v3870_v16 = vpop.permute.xlu0 %3869 }
 0x8ba   :  { %v3902_v33 = vmul.f32 %v4539_v38, %v3870_v16  ;;  %v3922_v16 = vadd.f32 %v3906_v40, %v3810_v32  ;;  %v4589_v32 = vld [vmem:[%s7164_s0 + $0x560] sm:$0xff] }
 0x8bc   :  { %v6988_v10 = vadd.f32 %v3902_v33, %v3806_v24 }
 0x8be   :  { %v3786_v21 = vpop.permute.xlu2 %3785 }
 0x8bf   :  { %v3809_v17 = vmul.f32 %v4526_v50, %v3786_v21  ;;  %v7005_v54 = vpop.permute.xlu1 %3989  ;;  %v4753_v21 = vld [vmem:[%s7164_s0 + $0x538] sm:$0xff] }
 0x8c0   :  { %4225 = vperm.xlu2 %4698, %v6759_v31  }
 0x8c1   :  { %v3882_v12 = vpop.permute.xlu0 %3881 }
 0x8c2   :  { %v3905_v22 = vmul.f32 %v4542_v58, %v3882_v12  ;;  %v4013_v58 = vmul.f32 %v4554_v5, %v6996_v7  ;;  %v4560_v5 = vld [vmem:[%s7164_s0 + $0x5e0] sm:$0xff] }
 0x8c4   :  { %v6999_v46 = vadd.f32 %v3905_v22, %v3809_v17  ;;  %v4525_v17 = vld [vmem:[%s7164_s0 + $0x540] sm:$0xff] }
 0x8c6   :  { %v7001_v49 = vpop.permute.xlu2 %3793 }
 0x8c7   :  { %v7008_v62 = vpop.permute.xlu1 %4001 }
 0x8c8   :  { %4702 = vset.pattern.permute.xlu2 %v7223_v57 }
 0x8c9   :  { %4301 = vperm.xlu2 %4702, %v6733_v26  }
 0x8ca   :  { %v3986_v23 = vpop.permute.xlu0 %3985 }
 0x8cb   :  { %v4015_v51 = vmul.f32 %v4556_v27, %v3986_v23 }
 0x8cd   :  { %v4031_v43 = vadd.f32 %v4015_v51, %v3919_v19  ;;  %v4754_v51 = vld [vmem:[%s7164_s0 + $0x4d8] sm:$0xff] }
 0x8cf   :  { %v3866_v45 = vpop.permute.xlu2 %3865 }
 0x8d0   :  { %v7010_v30 = vpop.permute.xlu1 %4093  ;;  %v3901_v6 = vmul.f32 %v4538_v56, %v3866_v45  ;;  %v4586_v45 = vld [vmem:[%s7164_s0 + $0x4d0] sm:$0xff] }
 0x8d1   :  { %4313 = vperm.xlu2 %4702, %v6747_v42  }
 0x8d2   :  { %v3998_v3 = vpop.permute.xlu0 %3997  ;;  %v3917_v63 = vadd.f32 %v3901_v6, %v3805_v14 }
 0x8d3   :  { %v4018_v52 = vmul.f32 %v4559_v39, %v3998_v3  ;;  %v4528_v39 = vld [vmem:[%s7164_s0 + $0x5d0] sm:$0xff] }
 0x8d5   :  { %v4034_v22 = vadd.f32 %v4018_v52, %v3922_v16  ;;  %v4576_v52 = vld [vmem:[%s7164_s0 + $0x5e8] sm:$0xff] }
 0x8d7   :  { %v3878_v31 = vpop.permute.xlu2 %3877 }
 0x8d8   :  { %v7016_v57 = vpop.permute.xlu1 %4105  ;;  %v3904_v3 = vmul.f32 %v4541_v37, %v3878_v31  ;;  %v4573_v31 = vld [vmem:[%s7164_s0 + $0x558] sm:$0xff] }
 0x8db   :  { %v4090_v35 = vpop.permute.xlu0 %4089 }
 0x8dc   :  { %v4125_v12 = vmul.f32 %v4570_v59, %v4090_v35  ;;  %v3808_v35 = vmul.f32 %v4525_v17, %v6954_v36  ;;  %v4544_v36 = vld [vmem:[%s7164_s0 + $0x5d8] sm:$0xff] }
 0x8dd   :  { %v4757_v17 = vld [vmem:[%s7164_s0 + $0x5f8] sm:$0xff] }
 0x8de   :  { %v3920_v25 = vadd.f32 %v3904_v3, %v3808_v35 }
 0x8df   :  { %v7012_v48 = vpop.permute.xlu2 %3889 }
 0x8e1   :  { %v4210_v42 = vpop.permute.xlu1 %4209 }
 0x8e2   :  { %v4239_v61 = vmul.f32 %v4588_v9, %v4210_v42  ;;  %v4029_v42 = vadd.f32 %v4013_v58, %v3917_v63 }
 0x8e3   :  { %v7014_v34 = vpop.permute.xlu0 %4101 }
 0x8e4   :  { %v4141_v27 = vadd.f32 %v4125_v12, %v4029_v42  ;;  %v4128_v4 = vmul.f32 %v4573_v31, %v7014_v34 }
 0x8e8   :  { %v7018_v26 = vpop.permute.xlu2 %3981 }
 0x8e9   :  { %v4222_v20 = vpop.permute.xlu1 %4221 }
 0x8eb   :  { %v7020_v18 = vpop.permute.xlu0 %4113 }
 0x8ec   :  { %v4131_v16 = vmul.f32 %v4576_v52, %v7020_v18  ;;  %v4587_v18 = vld [vmem:[%s7164_s0 + $0x500] sm:$0xff] }
 0x8f0   :  { %v7022_v47 = vpop.permute.xlu2 %3993 }
 0x8f2   :  { %v4298_v24 = vpop.permute.xlu1 %4297 }
 0x8f3   :  { %v4333_v19 = vmul.f32 %v4754_v51, %v4298_v24  ;;  %v4592_v24 = vld [vmem:[%s7164_s0 + $0x5f0] sm:$0xff] }
 0x8f4   :  { %v7024_v11 = vpop.permute.xlu0 %4205 }
 0x8f9   :  { %v4098_v28 = vpop.permute.xlu2 %4097 }
 0x8fa   :  { %v4127_v13 = vmul.f32 %v4572_v29, %v4098_v28  ;;  %v4242_v29 = vmul.f32 %v4591_v41, %v4222_v20  ;;  %v4016_v20 = vmul.f32 %v4557_v44, %v7005_v54  ;;  %v4310_v9 = vpop.permute.xlu1 %4309  ;;  %v3811_v54 = vmul.f32 %v4528_v39, %v7001_v49  ;;  %v4555_v49 = vld [vmem:[%s7164_s0 + $0x4f0] sm:$0xff]  ;;  %v4574_v44 = vld [vmem:[%s7164_s0 + $0x588] sm:$0xff] }
 0x8fb   :  { %v4238_v41 = vmul.f32 %v4587_v18, %v7024_v11 }
 0x8fc   :  { %v7038_v55 = vpop.permute.xlu0 %4217  ;;  %v4143_v15 = vadd.f32 %v4127_v13, %v4031_v43  ;;  %v4032_v14 = vadd.f32 %v4016_v20, %v3920_v25 }
 0x8fe   :  { %v4255_v2 = vadd.f32 %v4239_v61, %v4143_v15  ;;  %v3907_v15 = vmul.f32 %v4544_v36, %v7012_v48  ;;  %v4144_v34 = vadd.f32 %v4128_v4, %v4032_v14  ;;  %v4756_v48 = vld [vmem:[%s7164_s0 + $0x568] sm:$0xff] }
 0x8ff   :  { %v4336_v61 = vmul.f32 %v4756_v48, %v4310_v9 }
 0x900   :  { %v3923_v59 = vadd.f32 %v3907_v15, %v3811_v54 }
 0x901   :  { %v4110_v60 = vpop.permute.xlu2 %4109 }
 0x902   :  { %v4130_v33 = vmul.f32 %v4575_v53, %v4110_v60 }
 0x904   :  { %v4146_v8 = vadd.f32 %v4130_v33, %v4034_v22 }
 0x905   :  { %v4306_v38 = vpop.permute.xlu0 %4305 }
 0x906   :  { %v4335_v50 = vmul.f32 %v4753_v21, %v4306_v38  ;;  %v4258_v1 = vadd.f32 %v4242_v29, %v4146_v8  ;;  %v4019_v38 = vmul.f32 %v4560_v5, %v7008_v62  ;;  %v4322_v21 = vpop.permute.xlu1 %4321  ;;  %v4571_v62 = vld [vmem:[%s7164_s0 + $0x4f8] sm:$0xff] }
 0x907   :  { %v4339_v22 = vmul.f32 %v4757_v17, %v4322_v21  ;;  %v4126_v42 = vmul.f32 %v4571_v62, %v7010_v30  ;;  %v4590_v30 = vld [vmem:[%s7164_s0 + $0x590] sm:$0xff] }
 0x908   :  { %v4351_v23 = vadd.f32 %v4335_v50, %v4255_v2  ;;  %v4035_v33 = vadd.f32 %v4019_v38, %v3923_v59  ;;  %v4014_v2 = vmul.f32 %v4555_v49, %v7018_v26  ;;  %v4241_v29 = vmul.f32 %v4590_v30, %v7038_v55 }
 0x90a   :  { %4368 = vst [vmem:[#allocation2 + $0xd8] sm:$0xff] %v4351_v23  ;;  %v4202_v7 = vpop.permute.xlu2 %4201  ;;  %v4147_v58 = vadd.f32 %v4131_v16, %v4035_v33  ;;  %v4030_v26 = vadd.f32 %v4014_v2, %v6988_v10 }
 0x90b   :  { %v4237_v28 = vmul.f32 %v4586_v45, %v4202_v7  ;;  %v4558_v45 = vld [vmem:[%s7164_s0 + $0x580] sm:$0xff] }
 0x90c   :  { %v4017_v8 = vmul.f32 %v4558_v45, %v7022_v47  ;;  %v4142_v7 = vadd.f32 %v4126_v42, %v4030_v26  ;;  %v4129_v47 = vmul.f32 %v4574_v44, %v7016_v57 }
 0x90d   :  { %v4253_v56 = vadd.f32 %v4237_v28, %v4141_v27  ;;  %v4318_v13 = vpop.permute.xlu0 %4317  ;;  %v4758_v28 = vld [vmem:[%s7164_s0 + $0x508] sm:$0xff] }
 0x90e   :  { %v4338_v43 = vmul.f32 %v4755_v0, %v4318_v13  ;;  %v4254_v27 = vadd.f32 %v4238_v41, %v4142_v7  ;;  %v4033_v11 = vadd.f32 %v4017_v8, %v6999_v46 }
 0x90f   :  { %v4349_v6 = vadd.f32 %v4333_v19, %v4253_v56  ;;  %v4759_v56 = vld [vmem:[%s7164_s0 + $0x598] sm:$0xff] }
 0x910   :  { %v4354_v60 = vadd.f32 %v4338_v43, %v4258_v1  ;;  %v4145_v25 = vadd.f32 %v4129_v47, %v4033_v11 }
 0x911   :  { %4366 = vst [vmem:[#allocation2 + $0xc8] sm:$0xff] %v4349_v6 }
 0x912   :  { %4371 = vst [vmem:[#allocation2 + $0xf0] sm:$0xff] %v4354_v60  ;;  %v4214_v53 = vpop.permute.xlu2 %4213  ;;  %v4257_v19 = vadd.f32 %v4241_v29, %v4145_v25 }
 0x913   :  { %v4240_v40 = vmul.f32 %v4589_v32, %v4214_v53 }
 0x915   :  { %v4256_v63 = vadd.f32 %v4240_v40, %v4144_v34 }
 0x917   :  { %v4352_v37 = vadd.f32 %v4336_v61, %v4256_v63 }
 0x919   :  { %4369 = vst [vmem:[#allocation2 + $0xe0] sm:$0xff] %v4352_v37 }
 0x91a   :  { %v4226_v50 = vpop.permute.xlu2 %4225 }
 0x91b   :  { %v4243_v12 = vmul.f32 %v4592_v24, %v4226_v50 }
 0x91d   :  { %v4259_v23 = vadd.f32 %v4243_v12, %v4147_v58 }
 0x91f   :  { %v4355_v3 = vadd.f32 %v4339_v22, %v4259_v23 }
 0x921   :  { %4372 = vst [vmem:[#allocation2 + $0xf8] sm:$0xff] %v4355_v3 }
 0x923   :  { %v4302_v35 = vpop.permute.xlu2 %4301 }
 0x924   :  { %v4334_v10 = vmul.f32 %v4758_v28, %v4302_v35 }
 0x926   :  { %v4350_v31 = vadd.f32 %v4334_v10, %v4254_v27 }
 0x928   :  { %4367 = vst [vmem:[#allocation2 + $0xd0] sm:$0xff] %v4350_v31 }
 0x92b   :  { %v4314_v51 = vpop.permute.xlu2 %4313 }
 0x92c   :  { %v4337_v46 = vmul.f32 %v4759_v56, %v4314_v51 }
 0x92e   :  { %v4353_v57 = vadd.f32 %v4337_v46, %v4257_v19 }
 0x930   :  { %4370 = vst [vmem:[#allocation2 + $0xe8] sm:$0xff] %v4353_v57 }
 0x931   :  { %4385 = dma.vmem_to_hbm [thread:$0]  %s4378_s21, 4096, %s4380_s24, [#allocation3], %s4796_s27, %s4796_s27, %s4797_s28  }
 0x932   :  { %4784 = dma.done.wait [#allocation3], 4096  }
 0x933   :  { %4785 = vsyncadd [#allocation3], 4294963200 }
 0x934   :  { %4390 = vsyncpa [#allocation3], 1 }

</bundles_post_ra>
